<compile_context>
chip_gen: v6e
topology: v6e:2x2x1
jax: 0.10.0
libtpu: 0.0.40
codegen_flags: <defaults>
</compile_context>

<pallas_src>
import functools

import jax
import jax.numpy as jnp
from jax import lax
from jax.experimental import pallas as pl
from jax.experimental.pallas import tpu as pltpu

BERT_DIM = 768


# ----------------------------------------------------------------------------
# Pallas kernel: one fused bidirectional LSTM layer (+ optional final Linear)
# ----------------------------------------------------------------------------
def _bilstm_kernel(*refs, hidden_dim, seq_len, batch, has_fc, unroll):
    """Fused bidirectional LSTM layer, both directions in one program.

    Inputs (whole-array VMEM refs):
      x_ref:     (S*B, D)    flat time-major input (row = t*B + b), bf16
      w_ih_ref:  (D, 8H)     fw|bw input->gate weights concatenated, bf16
      w_hh_ref:  (2, H, 4H)  per-direction hidden->gate weights, bf16
      b_ref:     (1, 8H)     fw|bw (b_ih + b_hh) concatenated, f32
      h0_ref, c0_ref: (2, B, H) initial states [fw, bw], f32
      (optional) fc_w_ref (2H, O) f32, fc_b_ref (1, O) f32
    Outputs:
      out_ref:   (S, B, 2H)  per-timestep hidden states, fw in [:H], bw in [H:], bf16
      hlast_ref: (B, 2H)     final hidden states [fw | bw], f32
      (optional) logits_ref (B, O) f32
    Scratch:
      xproj_sc:  (S, B, 8H)  f32 precomputed input projection (bias folded in)
    Gate order matches PyTorch: [i, f, g, o].
    """
    if has_fc:
        (x_ref, w_ih_ref, w_hh_ref, b_ref, h0_ref, c0_ref, fc_w_ref, fc_b_ref,
         out_ref, hlast_ref, logits_ref, xproj_sc) = refs
    else:
        (x_ref, w_ih_ref, w_hh_ref, b_ref, h0_ref, c0_ref,
         out_ref, hlast_ref, xproj_sc) = refs
        fc_w_ref = fc_b_ref = logits_ref = None

    H = hidden_dim
    G = 4 * H
    S = seq_len

    # ---- Phase 1: one N=8H MXU matmul for BOTH directions, bias folded in. --
    # Stored into a time-major (S, B, 8H) scratch so the serial loop reads
    # tile-aligned slabs via xproj_sc[t] (the one-time relayout here is off
    # the serial critical path).
    proj = (jnp.dot(x_ref[...], w_ih_ref[...],
                    preferred_element_type=jnp.float32) + b_ref[...])
    xproj_sc[...] = proj.reshape(S, batch, 2 * G)

    # ---- Phase 2: serial recurrence; fw and bw chains interleaved. ----------
    w_hh_fw = w_hh_ref[0]                      # (H, 4H) bf16
    w_hh_bw = w_hh_ref[1]                      # (H, 4H) bf16

    def lstm_cell(gates, c):
        # TODO(synk): at production scale pick H multiple of 128 so these
        # per-gate slices (and the half-width out stores) are lane-aligned.
        i_g = jax.nn.sigmoid(gates[:, 0 * H:1 * H])
        f_g = jax.nn.sigmoid(gates[:, 1 * H:2 * H])
        g_g = jnp.tanh(gates[:, 2 * H:3 * H])
        o_g = jax.nn.sigmoid(gates[:, 3 * H:4 * H])
        c_new = f_g * c + i_g * g_g
        h_new = o_g * jnp.tanh(c_new)
        return h_new, c_new

    def step(s, carry):
        h_fw, c_fw, h_bw, c_bw = carry
        t_fw = s
        t_bw = S - 1 - s                       # in-kernel time reversal
        gx_fw = xproj_sc[t_fw][:, 0:G]         # (B, 4H), lane-tile aligned slice
        gx_bw = xproj_sc[t_bw][:, G:2 * G]
        # bf16 operands, f32 accumulation (MXU-native on the serial chain).
        gates_fw = gx_fw + jnp.dot(h_fw.astype(jnp.bfloat16), w_hh_fw,
                                   preferred_element_type=jnp.float32)
        gates_bw = gx_bw + jnp.dot(h_bw.astype(jnp.bfloat16), w_hh_bw,
                                   preferred_element_type=jnp.float32)
        h_fw_new, c_fw_new = lstm_cell(gates_fw, c_fw)
        h_bw_new, c_bw_new = lstm_cell(gates_bw, c_bw)
        out_ref[t_fw, :, 0:H] = h_fw_new.astype(out_ref.dtype)
        out_ref[t_bw, :, H:2 * H] = h_bw_new.astype(out_ref.dtype)
        return (h_fw_new, c_fw_new, h_bw_new, c_bw_new)

    init = (h0_ref[0], c0_ref[0], h0_ref[1], c0_ref[1])
    h_fw, _c_fw, h_bw, _c_bw = lax.fori_loop(0, S, step, init, unroll=unroll)

    # Final hidden states, already concatenated [fw | bw] (= torch.cat of
    # hidden_last[-2], hidden_last[-1] for the top layer).
    hlast_ref[:, 0:H] = h_fw
    hlast_ref[:, H:2 * H] = h_bw

    if has_fc:
        # Fused final Linear (self.fc) on the top layer's last hidden state.
        # TODO(synk): nn.Dropout(p=0.5) treated as inference-mode identity.
        hcat = hlast_ref[...]                  # (B, 2H) f32
        logits_ref[...] = (
            jnp.dot(hcat, fc_w_ref[...], preferred_element_type=jnp.float32)
            + fc_b_ref[...]
        ).astype(logits_ref.dtype)


# ----------------------------------------------------------------------------
# Wrapper around pallas_call
# ----------------------------------------------------------------------------
def bilstm_layer(x_flat, w_ih_cat, w_hh_t, b_cat, h0, c0, *, seq_len, batch,
                 fc_w_t=None, fc_b=None):
    """x_flat: (S*B, D) flat time-major input.

    Returns (seq_out (S, B, 2H) bf16, h_last (B, 2H) f32[, logits (B, O) f32]).
    """
    H = h0.shape[-1]
    G = 4 * H
    has_fc = fc_w_t is not None
    unroll = min(8, seq_len)   # partial unroll: enough for LLO visibility

    kernel = functools.partial(
        _bilstm_kernel, hidden_dim=H, seq_len=seq_len, batch=batch,
        has_fc=has_fc, unroll=unroll)

    vmem = pl.BlockSpec(memory_space=pltpu.MemorySpace.VMEM)
    inputs = [x_flat, w_ih_cat, w_hh_t, b_cat, h0, c0]
    out_shape = [
        jax.ShapeDtypeStruct((seq_len, batch, 2 * H), jnp.bfloat16),
        jax.ShapeDtypeStruct((batch, 2 * H), jnp.float32),
    ]
    if has_fc:
        inputs += [fc_w_t, fc_b]
        out_shape.append(
            jax.ShapeDtypeStruct((batch, fc_w_t.shape[1]), jnp.float32))

    return pl.pallas_call(
        kernel,
        out_shape=tuple(out_shape),
        in_specs=[vmem] * len(inputs),
        out_specs=tuple([vmem] * len(out_shape)),
        scratch_shapes=[pltpu.VMEM((seq_len, batch, 2 * G), jnp.float32)],
    )(*inputs)


# ----------------------------------------------------------------------------
# Parameter construction (deterministic, synthetic)
# ----------------------------------------------------------------------------
def init_params(key, *, vocab_size, hidden_dim, output_size, n_layers):
    keys = iter(jax.random.split(key, 4 + 8 * n_layers))
    params = {}
    # TODO(synk): full pretrained BERT encoder not reproduced; a deterministic
    # bf16 embedding table producing 768-d features stands in for bert(x)[0].
    params["bert_emb"] = (
        jax.random.normal(next(keys), (vocab_size, BERT_DIM), jnp.float32) * 0.02
    ).astype(jnp.bfloat16)

    scale = 1.0 / (hidden_dim ** 0.5)
    lstm = []
    for layer in range(n_layers):
        d_in = BERT_DIM if layer == 0 else 2 * hidden_dim
        w_ih_dirs, w_hh_dirs, b_dirs = [], [], []
        for _ in range(2):  # forward, backward
            w_ih = jax.random.uniform(next(keys), (4 * hidden_dim, d_in),
                                      jnp.float32, -scale, scale)
            w_hh = jax.random.uniform(next(keys), (4 * hidden_dim, hidden_dim),
                                      jnp.float32, -scale, scale)
            b_ih = jax.random.uniform(next(keys), (4 * hidden_dim,),
                                      jnp.float32, -scale, scale)
            b_hh = jax.random.uniform(next(keys), (4 * hidden_dim,),
                                      jnp.float32, -scale, scale)
            w_ih_dirs.append(w_ih.T)                 # (d_in, 4H)
            w_hh_dirs.append(w_hh.T)                 # (H, 4H)
            b_dirs.append(b_ih + b_hh)               # (4H,)
        lstm.append({
            # fw|bw gate columns concatenated -> one N=8H input projection.
            "w_ih_cat": jnp.concatenate(w_ih_dirs, axis=1).astype(jnp.bfloat16),
            "w_hh_t": jnp.stack(w_hh_dirs).astype(jnp.bfloat16),   # (2, H, 4H)
            "b_cat": jnp.concatenate(b_dirs)[None, :],             # (1, 8H) f32
        })
    params["lstm"] = lstm

    fc_in = 2 * hidden_dim
    fscale = 1.0 / (fc_in ** 0.5)
    fc_w = jax.random.uniform(next(keys), (output_size, fc_in),
                              jnp.float32, -fscale, fscale)
    fc_b = jax.random.uniform(next(keys), (output_size,),
                              jnp.float32, -fscale, fscale)
    params["fc_w_t"] = fc_w.T                        # (2H, O)
    params["fc_b"] = fc_b[None, :]                   # (1, O)
    return params


# ----------------------------------------------------------------------------
# Forward pass (mirrors bert_lstm.forward with bidirectional=True)
# ----------------------------------------------------------------------------
def bert_lstm_forward(params, x_ids, hidden):
    h0_all, c0_all = hidden                     # (n_layers*2, B, H) each
    n_layers = len(params["lstm"])
    B, S = x_ids.shape
    H = h0_all.shape[-1]

    # "BERT" features, gathered directly into the flat time-major layout
    # (row = t*B + b) so no transpose of the (S,B,768) tensor is needed.
    x = params["bert_emb"][x_ids.T.reshape(-1)]          # (S*B, 768), bf16

    out = None
    for layer in range(n_layers):
        p = params["lstm"][layer]
        h0 = h0_all[2 * layer:2 * layer + 2]             # (2, B, H)
        c0 = c0_all[2 * layer:2 * layer + 2]
        is_last = layer == n_layers - 1
        if is_last:
            # Final Linear fused into the top layer's kernel finalize.
            _seq_out, _hlast, out = bilstm_layer(
                x, p["w_ih_cat"], p["w_hh_t"], p["b_cat"], h0, c0,
                seq_len=S, batch=B,
                fc_w_t=params["fc_w_t"], fc_b=params["fc_b"])
        else:
            seq_out, _hlast = bilstm_layer(
                x, p["w_ih_cat"], p["w_hh_t"], p["b_cat"], h0, c0,
                seq_len=S, batch=B)
            # (S, B, 2H) -> (S*B, 2H): free row-major reshape, no concat/copy.
            x = seq_out.reshape(S * B, 2 * H)
    return out


def init_hidden(batch_size, hidden_dim, n_layers, bidirectional=True):
    number = 2 if bidirectional else 1
    shape = (n_layers * number, batch_size, hidden_dim)
    return (jnp.zeros(shape, jnp.float32), jnp.zeros(shape, jnp.float32))


# ----------------------------------------------------------------------------
if __name__ == "__main__":
    B, S = 2, 8
    HIDDEN_DIM = 32
    OUTPUT_SIZE = 4
    N_LAYERS = 2
    VOCAB = 100

    key = jax.random.PRNGKey(0)
    pkey, xkey = jax.random.split(key)
    params = init_params(pkey, vocab_size=VOCAB, hidden_dim=HIDDEN_DIM,
                         output_size=OUTPUT_SIZE, n_layers=N_LAYERS)

    x_ids = jax.random.randint(xkey, (B, S), 0, VOCAB, dtype=jnp.int32)
    hidden = init_hidden(B, HIDDEN_DIM, N_LAYERS, bidirectional=True)

    fwd = jax.jit(bert_lstm_forward)
    out = fwd(params, x_ids, hidden)
    out = jax.block_until_ready(out)
    assert out.shape == (B, OUTPUT_SIZE) and out.dtype == jnp.float32
    print("KERNEL_OK")
</pallas_src>

<mosaic_0001>
module attributes {stable_mosaic.version = 11 : i64} {
  func.func @_bilstm_kernel(%arg0: memref<16x64xbf16, #tpu.memory_space<vmem>>, %arg1: memref<64x256xbf16, #tpu.memory_space<vmem>>, %arg2: memref<2x32x128xbf16, #tpu.memory_space<vmem>>, %arg3: memref<1x256xf32, #tpu.memory_space<vmem>>, %arg4: memref<2x2x32xf32, #tpu.memory_space<vmem>>, %arg5: memref<2x2x32xf32, #tpu.memory_space<vmem>>, %arg6: memref<64x4xf32, #tpu.memory_space<vmem>>, %arg7: memref<1x4xf32, #tpu.memory_space<vmem>>, %arg8: memref<8x2x64xbf16, #tpu.memory_space<vmem>>, %arg9: memref<2x64xf32, #tpu.memory_space<vmem>>, %arg10: memref<2x4xf32, #tpu.memory_space<vmem>>, %arg11: memref<8x2x256xf32, #tpu.memory_space<vmem>>) attributes {dimension_semantics = [], scalar_prefetch = 0 : i64, scratch_operands = 1 : i64, tpu.core_type = #tpu.core_type<tc>} {
    %c0 = arith.constant 0 : index
    %c0_0 = arith.constant 0 : index
    %0 = vector.load %arg0[%c0, %c0_0] : memref<16x64xbf16, #tpu.memory_space<vmem>>, vector<16x64xbf16>
    %c0_1 = arith.constant 0 : index
    %c0_2 = arith.constant 0 : index
    %1 = vector.load %arg1[%c0_1, %c0_2] : memref<64x256xbf16, #tpu.memory_space<vmem>>, vector<64x256xbf16>
    %cst = arith.constant dense<0.000000e+00> : vector<16x256xf32>
    %2 = tpu.matmul %0, %1, %cst {dimension_numbers = #tpu.dot_dimension_numbers<[1], [0], [0], [1], [0, 0, 1, 1], [], []>} : vector<16x64xbf16>, vector<64x256xbf16>, vector<16x256xf32> -> vector<16x256xf32>
    %c0_3 = arith.constant 0 : index
    %c0_4 = arith.constant 0 : index
    %3 = vector.load %arg3[%c0_3, %c0_4] : memref<1x256xf32, #tpu.memory_space<vmem>>, vector<1x256xf32>
    %4 = vector.broadcast %3 : vector<1x256xf32> to vector<16x256xf32>
    %5 = arith.addf %2, %4 : vector<16x256xf32>
    %6 = vector.shape_cast %5 : vector<16x256xf32> to vector<8x2x256xf32>
    %c0_5 = arith.constant 0 : index
    %c0_6 = arith.constant 0 : index
    %c0_7 = arith.constant 0 : index
    %7 = vector.load %arg11[%c0_5, %c0_6, %c0_7] : memref<8x2x256xf32, #tpu.memory_space<vmem>>, vector<8x2x256xf32>
    tpu.vector_store %arg11[%c0_5, %c0_6, %c0_7], %6 {strides = array<i32>} : memref<8x2x256xf32, #tpu.memory_space<vmem>>, vector<8x2x256xf32>,
    %c0_8 = arith.constant 0 : index
    %c0_9 = arith.constant 0 : index
    %c0_10 = arith.constant 0 : index
    %8 = vector.load %arg2[%c0_8, %c0_9, %c0_10] : memref<2x32x128xbf16, #tpu.memory_space<vmem>>, vector<1x32x128xbf16>
    %9 = vector.shape_cast %8 : vector<1x32x128xbf16> to vector<32x128xbf16>
    %c1 = arith.constant 1 : index
    %c0_11 = arith.constant 0 : index
    %c0_12 = arith.constant 0 : index
    %10 = vector.load %arg2[%c1, %c0_11, %c0_12] : memref<2x32x128xbf16, #tpu.memory_space<vmem>>, vector<1x32x128xbf16>
    %11 = vector.shape_cast %10 : vector<1x32x128xbf16> to vector<32x128xbf16>
    %c0_13 = arith.constant 0 : index
    %c0_14 = arith.constant 0 : index
    %c0_15 = arith.constant 0 : index
    %12 = vector.load %arg4[%c0_13, %c0_14, %c0_15] : memref<2x2x32xf32, #tpu.memory_space<vmem>>, vector<1x2x32xf32>
    %13 = vector.shape_cast %12 : vector<1x2x32xf32> to vector<2x32xf32>
    %c0_16 = arith.constant 0 : index
    %c0_17 = arith.constant 0 : index
    %c0_18 = arith.constant 0 : index
    %14 = vector.load %arg5[%c0_16, %c0_17, %c0_18] : memref<2x2x32xf32, #tpu.memory_space<vmem>>, vector<1x2x32xf32>
    %15 = vector.shape_cast %14 : vector<1x2x32xf32> to vector<2x32xf32>
    %c1_19 = arith.constant 1 : index
    %c0_20 = arith.constant 0 : index
    %c0_21 = arith.constant 0 : index
    %16 = vector.load %arg4[%c1_19, %c0_20, %c0_21] : memref<2x2x32xf32, #tpu.memory_space<vmem>>, vector<1x2x32xf32>
    %17 = vector.shape_cast %16 : vector<1x2x32xf32> to vector<2x32xf32>
    %c1_22 = arith.constant 1 : index
    %c0_23 = arith.constant 0 : index
    %c0_24 = arith.constant 0 : index
    %18 = vector.load %arg5[%c1_22, %c0_23, %c0_24] : memref<2x2x32xf32, #tpu.memory_space<vmem>>, vector<1x2x32xf32>
    %19 = vector.shape_cast %18 : vector<1x2x32xf32> to vector<2x32xf32>
    %c0_i32 = arith.constant 0 : i32
    %c7_i32 = arith.constant 7 : i32
    %20 = arith.subi %c7_i32, %c0_i32 : i32
    %21 = arith.index_cast %c0_i32 : i32 to index
    %c0_25 = arith.constant 0 : index
    %c0_26 = arith.constant 0 : index
    %22 = vector.load %arg11[%21, %c0_25, %c0_26] : memref<8x2x256xf32, #tpu.memory_space<vmem>>, vector<1x2x256xf32>
    %23 = vector.shape_cast %22 : vector<1x2x256xf32> to vector<2x256xf32>
    %24 = vector.extract_strided_slice %23 {offsets = [0, 0], sizes = [2, 128], strides = [1, 1]} : vector<2x256xf32> to vector<2x128xf32>
    %25 = arith.index_cast %20 : i32 to index
    %c0_27 = arith.constant 0 : index
    %c0_28 = arith.constant 0 : index
    %26 = vector.load %arg11[%25, %c0_27, %c0_28] : memref<8x2x256xf32, #tpu.memory_space<vmem>>, vector<1x2x256xf32>
    %27 = vector.shape_cast %26 : vector<1x2x256xf32> to vector<2x256xf32>
    %28 = vector.extract_strided_slice %27 {offsets = [0, 128], sizes = [2, 128], strides = [1, 1]} : vector<2x256xf32> to vector<2x128xf32>
    %29 = arith.truncf %13 : vector<2x32xf32> to vector<2x32xbf16>
    %cst_29 = arith.constant dense<0.000000e+00> : vector<2x128xf32>
    %30 = tpu.matmul %29, %9, %cst_29 {dimension_numbers = #tpu.dot_dimension_numbers<[1], [0], [0], [1], [0, 0, 1, 1], [], []>} : vector<2x32xbf16>, vector<32x128xbf16>, vector<2x128xf32> -> vector<2x128xf32>
    %31 = arith.addf %24, %30 : vector<2x128xf32>
    %32 = arith.truncf %17 : vector<2x32xf32> to vector<2x32xbf16>
    %cst_30 = arith.constant dense<0.000000e+00> : vector<2x128xf32>
    %33 = tpu.matmul %32, %11, %cst_30 {dimension_numbers = #tpu.dot_dimension_numbers<[1], [0], [0], [1], [0, 0, 1, 1], [], []>} : vector<2x32xbf16>, vector<32x128xbf16>, vector<2x128xf32> -> vector<2x128xf32>
    %34 = arith.addf %28, %33 : vector<2x128xf32>
    %35 = vector.extract_strided_slice %31 {offsets = [0, 0], sizes = [2, 32], strides = [1, 1]} : vector<2x128xf32> to vector<2x32xf32>
    %36 = arith.negf %35 : vector<2x32xf32>
    %37 = math.exp %36 : vector<2x32xf32>
    %cst_31 = arith.constant 1.000000e+00 : f32
    %38 = vector.broadcast %cst_31 : f32 to vector<2x32xf32>
    %39 = arith.addf %38, %37 : vector<2x32xf32>
    %40 = arith.divf %38, %39 : vector<2x32xf32>
    %41 = vector.extract_strided_slice %31 {offsets = [0, 32], sizes = [2, 32], strides = [1, 1]} : vector<2x128xf32> to vector<2x32xf32>
    %42 = arith.negf %41 : vector<2x32xf32>
    %43 = math.exp %42 : vector<2x32xf32>
    %cst_32 = arith.constant 1.000000e+00 : f32
    %44 = vector.broadcast %cst_32 : f32 to vector<2x32xf32>
    %45 = arith.addf %44, %43 : vector<2x32xf32>
    %46 = arith.divf %44, %45 : vector<2x32xf32>
    %47 = vector.extract_strided_slice %31 {offsets = [0, 64], sizes = [2, 32], strides = [1, 1]} : vector<2x128xf32> to vector<2x32xf32>
    %48 = math.tanh %47 : vector<2x32xf32>
    %49 = vector.extract_strided_slice %31 {offsets = [0, 96], sizes = [2, 32], strides = [1, 1]} : vector<2x128xf32> to vector<2x32xf32>
    %50 = arith.negf %49 : vector<2x32xf32>
    %51 = math.exp %50 : vector<2x32xf32>
    %cst_33 = arith.constant 1.000000e+00 : f32
    %52 = vector.broadcast %cst_33 : f32 to vector<2x32xf32>
    %53 = arith.addf %52, %51 : vector<2x32xf32>
    %54 = arith.divf %52, %53 : vector<2x32xf32>
    %55 = arith.mulf %46, %15 : vector<2x32xf32>
    %56 = arith.mulf %40, %48 : vector<2x32xf32>
    %57 = arith.addf %55, %56 : vector<2x32xf32>
    %58 = math.tanh %57 : vector<2x32xf32>
    %59 = arith.mulf %54, %58 : vector<2x32xf32>
    %60 = vector.extract_strided_slice %34 {offsets = [0, 0], sizes = [2, 32], strides = [1, 1]} : vector<2x128xf32> to vector<2x32xf32>
    %61 = arith.negf %60 : vector<2x32xf32>
    %62 = math.exp %61 : vector<2x32xf32>
    %cst_34 = arith.constant 1.000000e+00 : f32
    %63 = vector.broadcast %cst_34 : f32 to vector<2x32xf32>
    %64 = arith.addf %63, %62 : vector<2x32xf32>
    %65 = arith.divf %63, %64 : vector<2x32xf32>
    %66 = vector.extract_strided_slice %34 {offsets = [0, 32], sizes = [2, 32], strides = [1, 1]} : vector<2x128xf32> to vector<2x32xf32>
    %67 = arith.negf %66 : vector<2x32xf32>
    %68 = math.exp %67 : vector<2x32xf32>
    %cst_35 = arith.constant 1.000000e+00 : f32
    %69 = vector.broadcast %cst_35 : f32 to vector<2x32xf32>
    %70 = arith.addf %69, %68 : vector<2x32xf32>
    %71 = arith.divf %69, %70 : vector<2x32xf32>
    %72 = vector.extract_strided_slice %34 {offsets = [0, 64], sizes = [2, 32], strides = [1, 1]} : vector<2x128xf32> to vector<2x32xf32>
    %73 = math.tanh %72 : vector<2x32xf32>
    %74 = vector.extract_strided_slice %34 {offsets = [0, 96], sizes = [2, 32], strides = [1, 1]} : vector<2x128xf32> to vector<2x32xf32>
    %75 = arith.negf %74 : vector<2x32xf32>
    %76 = math.exp %75 : vector<2x32xf32>
    %cst_36 = arith.constant 1.000000e+00 : f32
    %77 = vector.broadcast %cst_36 : f32 to vector<2x32xf32>
    %78 = arith.addf %77, %76 : vector<2x32xf32>
    %79 = arith.divf %77, %78 : vector<2x32xf32>
    %80 = arith.mulf %71, %19 : vector<2x32xf32>
    %81 = arith.mulf %65, %73 : vector<2x32xf32>
    %82 = arith.addf %80, %81 : vector<2x32xf32>
    %83 = math.tanh %82 : vector<2x32xf32>
    %84 = arith.mulf %79, %83 : vector<2x32xf32>
    %85 = arith.truncf %59 : vector<2x32xf32> to vector<2x32xbf16>
    %86 = arith.index_cast %c0_i32 : i32 to index
    %c0_37 = arith.constant 0 : index
    %c0_38 = arith.constant 0 : index
    %87 = vector.load %arg8[%86, %c0_37, %c0_38] : memref<8x2x64xbf16, #tpu.memory_space<vmem>>, vector<1x2x32xbf16>
    %88 = vector.shape_cast %87 : vector<1x2x32xbf16> to vector<2x32xbf16>
    %89 = vector.shape_cast %85 : vector<2x32xbf16> to vector<1x2x32xbf16>
    tpu.vector_store %arg8[%86, %c0_37, %c0_38], %89 {strides = array<i32>} : memref<8x2x64xbf16, #tpu.memory_space<vmem>>, vector<1x2x32xbf16>,
    %90 = arith.truncf %84 : vector<2x32xf32> to vector<2x32xbf16>
    %91 = arith.index_cast %20 : i32 to index
    %c0_39 = arith.constant 0 : index
    %c32 = arith.constant 32 : index
    %92 = vector.load %arg8[%91, %c0_39, %c32] : memref<8x2x64xbf16, #tpu.memory_space<vmem>>, vector<1x2x32xbf16>
    %93 = vector.shape_cast %92 : vector<1x2x32xbf16> to vector<2x32xbf16>
    %94 = vector.shape_cast %90 : vector<2x32xbf16> to vector<1x2x32xbf16>
    tpu.vector_store %arg8[%91, %c0_39, %c32], %94 {strides = array<i32>} : memref<8x2x64xbf16, #tpu.memory_space<vmem>>, vector<1x2x32xbf16>,
    %c1_i32 = arith.constant 1 : i32
    %c7_i32_40 = arith.constant 7 : i32
    %95 = arith.subi %c7_i32_40, %c1_i32 : i32
    %96 = arith.index_cast %c1_i32 : i32 to index
    %c0_41 = arith.constant 0 : index
    %c0_42 = arith.constant 0 : index
    %97 = vector.load %arg11[%96, %c0_41, %c0_42] : memref<8x2x256xf32, #tpu.memory_space<vmem>>, vector<1x2x256xf32>
    %98 = vector.shape_cast %97 : vector<1x2x256xf32> to vector<2x256xf32>
    %99 = vector.extract_strided_slice %98 {offsets = [0, 0], sizes = [2, 128], strides = [1, 1]} : vector<2x256xf32> to vector<2x128xf32>
    %100 = arith.index_cast %95 : i32 to index
    %c0_43 = arith.constant 0 : index
    %c0_44 = arith.constant 0 : index
    %101 = vector.load %arg11[%100, %c0_43, %c0_44] : memref<8x2x256xf32, #tpu.memory_space<vmem>>, vector<1x2x256xf32>
    %102 = vector.shape_cast %101 : vector<1x2x256xf32> to vector<2x256xf32>
    %103 = vector.extract_strided_slice %102 {offsets = [0, 128], sizes = [2, 128], strides = [1, 1]} : vector<2x256xf32> to vector<2x128xf32>
    %104 = arith.truncf %59 : vector<2x32xf32> to vector<2x32xbf16>
    %cst_45 = arith.constant dense<0.000000e+00> : vector<2x128xf32>
    %105 = tpu.matmul %104, %9, %cst_45 {dimension_numbers = #tpu.dot_dimension_numbers<[1], [0], [0], [1], [0, 0, 1, 1], [], []>} : vector<2x32xbf16>, vector<32x128xbf16>, vector<2x128xf32> -> vector<2x128xf32>
    %106 = arith.addf %99, %105 : vector<2x128xf32>
    %107 = arith.truncf %84 : vector<2x32xf32> to vector<2x32xbf16>
    %cst_46 = arith.constant dense<0.000000e+00> : vector<2x128xf32>
    %108 = tpu.matmul %107, %11, %cst_46 {dimension_numbers = #tpu.dot_dimension_numbers<[1], [0], [0], [1], [0, 0, 1, 1], [], []>} : vector<2x32xbf16>, vector<32x128xbf16>, vector<2x128xf32> -> vector<2x128xf32>
    %109 = arith.addf %103, %108 : vector<2x128xf32>
    %110 = vector.extract_strided_slice %106 {offsets = [0, 0], sizes = [2, 32], strides = [1, 1]} : vector<2x128xf32> to vector<2x32xf32>
    %111 = arith.negf %110 : vector<2x32xf32>
    %112 = math.exp %111 : vector<2x32xf32>
    %cst_47 = arith.constant 1.000000e+00 : f32
    %113 = vector.broadcast %cst_47 : f32 to vector<2x32xf32>
    %114 = arith.addf %113, %112 : vector<2x32xf32>
    %115 = arith.divf %113, %114 : vector<2x32xf32>
    %116 = vector.extract_strided_slice %106 {offsets = [0, 32], sizes = [2, 32], strides = [1, 1]} : vector<2x128xf32> to vector<2x32xf32>
    %117 = arith.negf %116 : vector<2x32xf32>
    %118 = math.exp %117 : vector<2x32xf32>
    %cst_48 = arith.constant 1.000000e+00 : f32
    %119 = vector.broadcast %cst_48 : f32 to vector<2x32xf32>
    %120 = arith.addf %119, %118 : vector<2x32xf32>
    %121 = arith.divf %119, %120 : vector<2x32xf32>
    %122 = vector.extract_strided_slice %106 {offsets = [0, 64], sizes = [2, 32], strides = [1, 1]} : vector<2x128xf32> to vector<2x32xf32>
    %123 = math.tanh %122 : vector<2x32xf32>
    %124 = vector.extract_strided_slice %106 {offsets = [0, 96], sizes = [2, 32], strides = [1, 1]} : vector<2x128xf32> to vector<2x32xf32>
    %125 = arith.negf %124 : vector<2x32xf32>
    %126 = math.exp %125 : vector<2x32xf32>
    %cst_49 = arith.constant 1.000000e+00 : f32
    %127 = vector.broadcast %cst_49 : f32 to vector<2x32xf32>
    %128 = arith.addf %127, %126 : vector<2x32xf32>
    %129 = arith.divf %127, %128 : vector<2x32xf32>
    %130 = arith.mulf %121, %57 : vector<2x32xf32>
    %131 = arith.mulf %115, %123 : vector<2x32xf32>
    %132 = arith.addf %130, %131 : vector<2x32xf32>
    %133 = math.tanh %132 : vector<2x32xf32>
    %134 = arith.mulf %129, %133 : vector<2x32xf32>
    %135 = vector.extract_strided_slice %109 {offsets = [0, 0], sizes = [2, 32], strides = [1, 1]} : vector<2x128xf32> to vector<2x32xf32>
    %136 = arith.negf %135 : vector<2x32xf32>
    %137 = math.exp %136 : vector<2x32xf32>
    %cst_50 = arith.constant 1.000000e+00 : f32
    %138 = vector.broadcast %cst_50 : f32 to vector<2x32xf32>
    %139 = arith.addf %138, %137 : vector<2x32xf32>
    %140 = arith.divf %138, %139 : vector<2x32xf32>
    %141 = vector.extract_strided_slice %109 {offsets = [0, 32], sizes = [2, 32], strides = [1, 1]} : vector<2x128xf32> to vector<2x32xf32>
    %142 = arith.negf %141 : vector<2x32xf32>
    %143 = math.exp %142 : vector<2x32xf32>
    %cst_51 = arith.constant 1.000000e+00 : f32
    %144 = vector.broadcast %cst_51 : f32 to vector<2x32xf32>
    %145 = arith.addf %144, %143 : vector<2x32xf32>
    %146 = arith.divf %144, %145 : vector<2x32xf32>
    %147 = vector.extract_strided_slice %109 {offsets = [0, 64], sizes = [2, 32], strides = [1, 1]} : vector<2x128xf32> to vector<2x32xf32>
    %148 = math.tanh %147 : vector<2x32xf32>
    %149 = vector.extract_strided_slice %109 {offsets = [0, 96], sizes = [2, 32], strides = [1, 1]} : vector<2x128xf32> to vector<2x32xf32>
    %150 = arith.negf %149 : vector<2x32xf32>
    %151 = math.exp %150 : vector<2x32xf32>
    %cst_52 = arith.constant 1.000000e+00 : f32
    %152 = vector.broadcast %cst_52 : f32 to vector<2x32xf32>
    %153 = arith.addf %152, %151 : vector<2x32xf32>
    %154 = arith.divf %152, %153 : vector<2x32xf32>
    %155 = arith.mulf %146, %82 : vector<2x32xf32>
    %156 = arith.mulf %140, %148 : vector<2x32xf32>
    %157 = arith.addf %155, %156 : vector<2x32xf32>
    %158 = math.tanh %157 : vector<2x32xf32>
    %159 = arith.mulf %154, %158 : vector<2x32xf32>
    %160 = arith.truncf %134 : vector<2x32xf32> to vector<2x32xbf16>
    %161 = arith.index_cast %c1_i32 : i32 to index
    %c0_53 = arith.constant 0 : index
    %c0_54 = arith.constant 0 : index
    %162 = vector.load %arg8[%161, %c0_53, %c0_54] : memref<8x2x64xbf16, #tpu.memory_space<vmem>>, vector<1x2x32xbf16>
    %163 = vector.shape_cast %162 : vector<1x2x32xbf16> to vector<2x32xbf16>
    %164 = vector.shape_cast %160 : vector<2x32xbf16> to vector<1x2x32xbf16>
    tpu.vector_store %arg8[%161, %c0_53, %c0_54], %164 {strides = array<i32>} : memref<8x2x64xbf16, #tpu.memory_space<vmem>>, vector<1x2x32xbf16>,
    %165 = arith.truncf %159 : vector<2x32xf32> to vector<2x32xbf16>
    %166 = arith.index_cast %95 : i32 to index
    %c0_55 = arith.constant 0 : index
    %c32_56 = arith.constant 32 : index
    %167 = vector.load %arg8[%166, %c0_55, %c32_56] : memref<8x2x64xbf16, #tpu.memory_space<vmem>>, vector<1x2x32xbf16>
    %168 = vector.shape_cast %167 : vector<1x2x32xbf16> to vector<2x32xbf16>
    %169 = vector.shape_cast %165 : vector<2x32xbf16> to vector<1x2x32xbf16>
    tpu.vector_store %arg8[%166, %c0_55, %c32_56], %169 {strides = array<i32>} : memref<8x2x64xbf16, #tpu.memory_space<vmem>>, vector<1x2x32xbf16>,
    %c2_i32 = arith.constant 2 : i32
    %c7_i32_57 = arith.constant 7 : i32
    %170 = arith.subi %c7_i32_57, %c2_i32 : i32
    %171 = arith.index_cast %c2_i32 : i32 to index
    %c0_58 = arith.constant 0 : index
    %c0_59 = arith.constant 0 : index
    %172 = vector.load %arg11[%171, %c0_58, %c0_59] : memref<8x2x256xf32, #tpu.memory_space<vmem>>, vector<1x2x256xf32>
    %173 = vector.shape_cast %172 : vector<1x2x256xf32> to vector<2x256xf32>
    %174 = vector.extract_strided_slice %173 {offsets = [0, 0], sizes = [2, 128], strides = [1, 1]} : vector<2x256xf32> to vector<2x128xf32>
    %175 = arith.index_cast %170 : i32 to index
    %c0_60 = arith.constant 0 : index
    %c0_61 = arith.constant 0 : index
    %176 = vector.load %arg11[%175, %c0_60, %c0_61] : memref<8x2x256xf32, #tpu.memory_space<vmem>>, vector<1x2x256xf32>
    %177 = vector.shape_cast %176 : vector<1x2x256xf32> to vector<2x256xf32>
    %178 = vector.extract_strided_slice %177 {offsets = [0, 128], sizes = [2, 128], strides = [1, 1]} : vector<2x256xf32> to vector<2x128xf32>
    %179 = arith.truncf %134 : vector<2x32xf32> to vector<2x32xbf16>
    %cst_62 = arith.constant dense<0.000000e+00> : vector<2x128xf32>
    %180 = tpu.matmul %179, %9, %cst_62 {dimension_numbers = #tpu.dot_dimension_numbers<[1], [0], [0], [1], [0, 0, 1, 1], [], []>} : vector<2x32xbf16>, vector<32x128xbf16>, vector<2x128xf32> -> vector<2x128xf32>
    %181 = arith.addf %174, %180 : vector<2x128xf32>
    %182 = arith.truncf %159 : vector<2x32xf32> to vector<2x32xbf16>
    %cst_63 = arith.constant dense<0.000000e+00> : vector<2x128xf32>
    %183 = tpu.matmul %182, %11, %cst_63 {dimension_numbers = #tpu.dot_dimension_numbers<[1], [0], [0], [1], [0, 0, 1, 1], [], []>} : vector<2x32xbf16>, vector<32x128xbf16>, vector<2x128xf32> -> vector<2x128xf32>
    %184 = arith.addf %178, %183 : vector<2x128xf32>
    %185 = vector.extract_strided_slice %181 {offsets = [0, 0], sizes = [2, 32], strides = [1, 1]} : vector<2x128xf32> to vector<2x32xf32>
    %186 = arith.negf %185 : vector<2x32xf32>
    %187 = math.exp %186 : vector<2x32xf32>
    %cst_64 = arith.constant 1.000000e+00 : f32
    %188 = vector.broadcast %cst_64 : f32 to vector<2x32xf32>
    %189 = arith.addf %188, %187 : vector<2x32xf32>
    %190 = arith.divf %188, %189 : vector<2x32xf32>
    %191 = vector.extract_strided_slice %181 {offsets = [0, 32], sizes = [2, 32], strides = [1, 1]} : vector<2x128xf32> to vector<2x32xf32>
    %192 = arith.negf %191 : vector<2x32xf32>
    %193 = math.exp %192 : vector<2x32xf32>
    %cst_65 = arith.constant 1.000000e+00 : f32
    %194 = vector.broadcast %cst_65 : f32 to vector<2x32xf32>
    %195 = arith.addf %194, %193 : vector<2x32xf32>
    %196 = arith.divf %194, %195 : vector<2x32xf32>
    %197 = vector.extract_strided_slice %181 {offsets = [0, 64], sizes = [2, 32], strides = [1, 1]} : vector<2x128xf32> to vector<2x32xf32>
    %198 = math.tanh %197 : vector<2x32xf32>
    %199 = vector.extract_strided_slice %181 {offsets = [0, 96], sizes = [2, 32], strides = [1, 1]} : vector<2x128xf32> to vector<2x32xf32>
    %200 = arith.negf %199 : vector<2x32xf32>
    %201 = math.exp %200 : vector<2x32xf32>
    %cst_66 = arith.constant 1.000000e+00 : f32
    %202 = vector.broadcast %cst_66 : f32 to vector<2x32xf32>
    %203 = arith.addf %202, %201 : vector<2x32xf32>
    %204 = arith.divf %202, %203 : vector<2x32xf32>
    %205 = arith.mulf %196, %132 : vector<2x32xf32>
    %206 = arith.mulf %190, %198 : vector<2x32xf32>
    %207 = arith.addf %205, %206 : vector<2x32xf32>
    %208 = math.tanh %207 : vector<2x32xf32>
    %209 = arith.mulf %204, %208 : vector<2x32xf32>
    %210 = vector.extract_strided_slice %184 {offsets = [0, 0], sizes = [2, 32], strides = [1, 1]} : vector<2x128xf32> to vector<2x32xf32>
    %211 = arith.negf %210 : vector<2x32xf32>
    %212 = math.exp %211 : vector<2x32xf32>
    %cst_67 = arith.constant 1.000000e+00 : f32
    %213 = vector.broadcast %cst_67 : f32 to vector<2x32xf32>
    %214 = arith.addf %213, %212 : vector<2x32xf32>
    %215 = arith.divf %213, %214 : vector<2x32xf32>
    %216 = vector.extract_strided_slice %184 {offsets = [0, 32], sizes = [2, 32], strides = [1, 1]} : vector<2x128xf32> to vector<2x32xf32>
    %217 = arith.negf %216 : vector<2x32xf32>
    %218 = math.exp %217 : vector<2x32xf32>
    %cst_68 = arith.constant 1.000000e+00 : f32
    %219 = vector.broadcast %cst_68 : f32 to vector<2x32xf32>
    %220 = arith.addf %219, %218 : vector<2x32xf32>
    %221 = arith.divf %219, %220 : vector<2x32xf32>
    %222 = vector.extract_strided_slice %184 {offsets = [0, 64], sizes = [2, 32], strides = [1, 1]} : vector<2x128xf32> to vector<2x32xf32>
    %223 = math.tanh %222 : vector<2x32xf32>
    %224 = vector.extract_strided_slice %184 {offsets = [0, 96], sizes = [2, 32], strides = [1, 1]} : vector<2x128xf32> to vector<2x32xf32>
    %225 = arith.negf %224 : vector<2x32xf32>
    %226 = math.exp %225 : vector<2x32xf32>
    %cst_69 = arith.constant 1.000000e+00 : f32
    %227 = vector.broadcast %cst_69 : f32 to vector<2x32xf32>
    %228 = arith.addf %227, %226 : vector<2x32xf32>
    %229 = arith.divf %227, %228 : vector<2x32xf32>
    %230 = arith.mulf %221, %157 : vector<2x32xf32>
    %231 = arith.mulf %215, %223 : vector<2x32xf32>
    %232 = arith.addf %230, %231 : vector<2x32xf32>
    %233 = math.tanh %232 : vector<2x32xf32>
    %234 = arith.mulf %229, %233 : vector<2x32xf32>
    %235 = arith.truncf %209 : vector<2x32xf32> to vector<2x32xbf16>
    %236 = arith.index_cast %c2_i32 : i32 to index
    %c0_70 = arith.constant 0 : index
    %c0_71 = arith.constant 0 : index
    %237 = vector.load %arg8[%236, %c0_70, %c0_71] : memref<8x2x64xbf16, #tpu.memory_space<vmem>>, vector<1x2x32xbf16>
    %238 = vector.shape_cast %237 : vector<1x2x32xbf16> to vector<2x32xbf16>
    %239 = vector.shape_cast %235 : vector<2x32xbf16> to vector<1x2x32xbf16>
    tpu.vector_store %arg8[%236, %c0_70, %c0_71], %239 {strides = array<i32>} : memref<8x2x64xbf16, #tpu.memory_space<vmem>>, vector<1x2x32xbf16>,
    %240 = arith.truncf %234 : vector<2x32xf32> to vector<2x32xbf16>
    %241 = arith.index_cast %170 : i32 to index
    %c0_72 = arith.constant 0 : index
    %c32_73 = arith.constant 32 : index
    %242 = vector.load %arg8[%241, %c0_72, %c32_73] : memref<8x2x64xbf16, #tpu.memory_space<vmem>>, vector<1x2x32xbf16>
    %243 = vector.shape_cast %242 : vector<1x2x32xbf16> to vector<2x32xbf16>
    %244 = vector.shape_cast %240 : vector<2x32xbf16> to vector<1x2x32xbf16>
    tpu.vector_store %arg8[%241, %c0_72, %c32_73], %244 {strides = array<i32>} : memref<8x2x64xbf16, #tpu.memory_space<vmem>>, vector<1x2x32xbf16>,
    %c3_i32 = arith.constant 3 : i32
    %c7_i32_74 = arith.constant 7 : i32
    %245 = arith.subi %c7_i32_74, %c3_i32 : i32
    %246 = arith.index_cast %c3_i32 : i32 to index
    %c0_75 = arith.constant 0 : index
    %c0_76 = arith.constant 0 : index
    %247 = vector.load %arg11[%246, %c0_75, %c0_76] : memref<8x2x256xf32, #tpu.memory_space<vmem>>, vector<1x2x256xf32>
    %248 = vector.shape_cast %247 : vector<1x2x256xf32> to vector<2x256xf32>
    %249 = vector.extract_strided_slice %248 {offsets = [0, 0], sizes = [2, 128], strides = [1, 1]} : vector<2x256xf32> to vector<2x128xf32>
    %250 = arith.index_cast %245 : i32 to index
    %c0_77 = arith.constant 0 : index
    %c0_78 = arith.constant 0 : index
    %251 = vector.load %arg11[%250, %c0_77, %c0_78] : memref<8x2x256xf32, #tpu.memory_space<vmem>>, vector<1x2x256xf32>
    %252 = vector.shape_cast %251 : vector<1x2x256xf32> to vector<2x256xf32>
    %253 = vector.extract_strided_slice %252 {offsets = [0, 128], sizes = [2, 128], strides = [1, 1]} : vector<2x256xf32> to vector<2x128xf32>
    %254 = arith.truncf %209 : vector<2x32xf32> to vector<2x32xbf16>
    %cst_79 = arith.constant dense<0.000000e+00> : vector<2x128xf32>
    %255 = tpu.matmul %254, %9, %cst_79 {dimension_numbers = #tpu.dot_dimension_numbers<[1], [0], [0], [1], [0, 0, 1, 1], [], []>} : vector<2x32xbf16>, vector<32x128xbf16>, vector<2x128xf32> -> vector<2x128xf32>
    %256 = arith.addf %249, %255 : vector<2x128xf32>
    %257 = arith.truncf %234 : vector<2x32xf32> to vector<2x32xbf16>
    %cst_80 = arith.constant dense<0.000000e+00> : vector<2x128xf32>
    %258 = tpu.matmul %257, %11, %cst_80 {dimension_numbers = #tpu.dot_dimension_numbers<[1], [0], [0], [1], [0, 0, 1, 1], [], []>} : vector<2x32xbf16>, vector<32x128xbf16>, vector<2x128xf32> -> vector<2x128xf32>
    %259 = arith.addf %253, %258 : vector<2x128xf32>
    %260 = vector.extract_strided_slice %256 {offsets = [0, 0], sizes = [2, 32], strides = [1, 1]} : vector<2x128xf32> to vector<2x32xf32>
    %261 = arith.negf %260 : vector<2x32xf32>
    %262 = math.exp %261 : vector<2x32xf32>
    %cst_81 = arith.constant 1.000000e+00 : f32
    %263 = vector.broadcast %cst_81 : f32 to vector<2x32xf32>
    %264 = arith.addf %263, %262 : vector<2x32xf32>
    %265 = arith.divf %263, %264 : vector<2x32xf32>
    %266 = vector.extract_strided_slice %256 {offsets = [0, 32], sizes = [2, 32], strides = [1, 1]} : vector<2x128xf32> to vector<2x32xf32>
    %267 = arith.negf %266 : vector<2x32xf32>
    %268 = math.exp %267 : vector<2x32xf32>
    %cst_82 = arith.constant 1.000000e+00 : f32
    %269 = vector.broadcast %cst_82 : f32 to vector<2x32xf32>
    %270 = arith.addf %269, %268 : vector<2x32xf32>
    %271 = arith.divf %269, %270 : vector<2x32xf32>
    %272 = vector.extract_strided_slice %256 {offsets = [0, 64], sizes = [2, 32], strides = [1, 1]} : vector<2x128xf32> to vector<2x32xf32>
    %273 = math.tanh %272 : vector<2x32xf32>
    %274 = vector.extract_strided_slice %256 {offsets = [0, 96], sizes = [2, 32], strides = [1, 1]} : vector<2x128xf32> to vector<2x32xf32>
    %275 = arith.negf %274 : vector<2x32xf32>
    %276 = math.exp %275 : vector<2x32xf32>
    %cst_83 = arith.constant 1.000000e+00 : f32
    %277 = vector.broadcast %cst_83 : f32 to vector<2x32xf32>
    %278 = arith.addf %277, %276 : vector<2x32xf32>
    %279 = arith.divf %277, %278 : vector<2x32xf32>
    %280 = arith.mulf %271, %207 : vector<2x32xf32>
    %281 = arith.mulf %265, %273 : vector<2x32xf32>
    %282 = arith.addf %280, %281 : vector<2x32xf32>
    %283 = math.tanh %282 : vector<2x32xf32>
    %284 = arith.mulf %279, %283 : vector<2x32xf32>
    %285 = vector.extract_strided_slice %259 {offsets = [0, 0], sizes = [2, 32], strides = [1, 1]} : vector<2x128xf32> to vector<2x32xf32>
    %286 = arith.negf %285 : vector<2x32xf32>
    %287 = math.exp %286 : vector<2x32xf32>
    %cst_84 = arith.constant 1.000000e+00 : f32
    %288 = vector.broadcast %cst_84 : f32 to vector<2x32xf32>
    %289 = arith.addf %288, %287 : vector<2x32xf32>
    %290 = arith.divf %288, %289 : vector<2x32xf32>
    %291 = vector.extract_strided_slice %259 {offsets = [0, 32], sizes = [2, 32], strides = [1, 1]} : vector<2x128xf32> to vector<2x32xf32>
    %292 = arith.negf %291 : vector<2x32xf32>
    %293 = math.exp %292 : vector<2x32xf32>
    %cst_85 = arith.constant 1.000000e+00 : f32
    %294 = vector.broadcast %cst_85 : f32 to vector<2x32xf32>
    %295 = arith.addf %294, %293 : vector<2x32xf32>
    %296 = arith.divf %294, %295 : vector<2x32xf32>
    %297 = vector.extract_strided_slice %259 {offsets = [0, 64], sizes = [2, 32], strides = [1, 1]} : vector<2x128xf32> to vector<2x32xf32>
    %298 = math.tanh %297 : vector<2x32xf32>
    %299 = vector.extract_strided_slice %259 {offsets = [0, 96], sizes = [2, 32], strides = [1, 1]} : vector<2x128xf32> to vector<2x32xf32>
    %300 = arith.negf %299 : vector<2x32xf32>
    %301 = math.exp %300 : vector<2x32xf32>
    %cst_86 = arith.constant 1.000000e+00 : f32
    %302 = vector.broadcast %cst_86 : f32 to vector<2x32xf32>
    %303 = arith.addf %302, %301 : vector<2x32xf32>
    %304 = arith.divf %302, %303 : vector<2x32xf32>
    %305 = arith.mulf %296, %232 : vector<2x32xf32>
    %306 = arith.mulf %290, %298 : vector<2x32xf32>
    %307 = arith.addf %305, %306 : vector<2x32xf32>
    %308 = math.tanh %307 : vector<2x32xf32>
    %309 = arith.mulf %304, %308 : vector<2x32xf32>
    %310 = arith.truncf %284 : vector<2x32xf32> to vector<2x32xbf16>
    %311 = arith.index_cast %c3_i32 : i32 to index
    %c0_87 = arith.constant 0 : index
    %c0_88 = arith.constant 0 : index
    %312 = vector.load %arg8[%311, %c0_87, %c0_88] : memref<8x2x64xbf16, #tpu.memory_space<vmem>>, vector<1x2x32xbf16>
    %313 = vector.shape_cast %312 : vector<1x2x32xbf16> to vector<2x32xbf16>
    %314 = vector.shape_cast %310 : vector<2x32xbf16> to vector<1x2x32xbf16>
    tpu.vector_store %arg8[%311, %c0_87, %c0_88], %314 {strides = array<i32>} : memref<8x2x64xbf16, #tpu.memory_space<vmem>>, vector<1x2x32xbf16>,
    %315 = arith.truncf %309 : vector<2x32xf32> to vector<2x32xbf16>
    %316 = arith.index_cast %245 : i32 to index
    %c0_89 = arith.constant 0 : index
    %c32_90 = arith.constant 32 : index
    %317 = vector.load %arg8[%316, %c0_89, %c32_90] : memref<8x2x64xbf16, #tpu.memory_space<vmem>>, vector<1x2x32xbf16>
    %318 = vector.shape_cast %317 : vector<1x2x32xbf16> to vector<2x32xbf16>
    %319 = vector.shape_cast %315 : vector<2x32xbf16> to vector<1x2x32xbf16>
    tpu.vector_store %arg8[%316, %c0_89, %c32_90], %319 {strides = array<i32>} : memref<8x2x64xbf16, #tpu.memory_space<vmem>>, vector<1x2x32xbf16>,
    %c4_i32 = arith.constant 4 : i32
    %c7_i32_91 = arith.constant 7 : i32
    %320 = arith.subi %c7_i32_91, %c4_i32 : i32
    %321 = arith.index_cast %c4_i32 : i32 to index
    %c0_92 = arith.constant 0 : index
    %c0_93 = arith.constant 0 : index
    %322 = vector.load %arg11[%321, %c0_92, %c0_93] : memref<8x2x256xf32, #tpu.memory_space<vmem>>, vector<1x2x256xf32>
    %323 = vector.shape_cast %322 : vector<1x2x256xf32> to vector<2x256xf32>
    %324 = vector.extract_strided_slice %323 {offsets = [0, 0], sizes = [2, 128], strides = [1, 1]} : vector<2x256xf32> to vector<2x128xf32>
    %325 = arith.index_cast %320 : i32 to index
    %c0_94 = arith.constant 0 : index
    %c0_95 = arith.constant 0 : index
    %326 = vector.load %arg11[%325, %c0_94, %c0_95] : memref<8x2x256xf32, #tpu.memory_space<vmem>>, vector<1x2x256xf32>
    %327 = vector.shape_cast %326 : vector<1x2x256xf32> to vector<2x256xf32>
    %328 = vector.extract_strided_slice %327 {offsets = [0, 128], sizes = [2, 128], strides = [1, 1]} : vector<2x256xf32> to vector<2x128xf32>
    %329 = arith.truncf %284 : vector<2x32xf32> to vector<2x32xbf16>
    %cst_96 = arith.constant dense<0.000000e+00> : vector<2x128xf32>
    %330 = tpu.matmul %329, %9, %cst_96 {dimension_numbers = #tpu.dot_dimension_numbers<[1], [0], [0], [1], [0, 0, 1, 1], [], []>} : vector<2x32xbf16>, vector<32x128xbf16>, vector<2x128xf32> -> vector<2x128xf32>
    %331 = arith.addf %324, %330 : vector<2x128xf32>
    %332 = arith.truncf %309 : vector<2x32xf32> to vector<2x32xbf16>
    %cst_97 = arith.constant dense<0.000000e+00> : vector<2x128xf32>
    %333 = tpu.matmul %332, %11, %cst_97 {dimension_numbers = #tpu.dot_dimension_numbers<[1], [0], [0], [1], [0, 0, 1, 1], [], []>} : vector<2x32xbf16>, vector<32x128xbf16>, vector<2x128xf32> -> vector<2x128xf32>
    %334 = arith.addf %328, %333 : vector<2x128xf32>
    %335 = vector.extract_strided_slice %331 {offsets = [0, 0], sizes = [2, 32], strides = [1, 1]} : vector<2x128xf32> to vector<2x32xf32>
    %336 = arith.negf %335 : vector<2x32xf32>
    %337 = math.exp %336 : vector<2x32xf32>
    %cst_98 = arith.constant 1.000000e+00 : f32
    %338 = vector.broadcast %cst_98 : f32 to vector<2x32xf32>
    %339 = arith.addf %338, %337 : vector<2x32xf32>
    %340 = arith.divf %338, %339 : vector<2x32xf32>
    %341 = vector.extract_strided_slice %331 {offsets = [0, 32], sizes = [2, 32], strides = [1, 1]} : vector<2x128xf32> to vector<2x32xf32>
    %342 = arith.negf %341 : vector<2x32xf32>
    %343 = math.exp %342 : vector<2x32xf32>
    %cst_99 = arith.constant 1.000000e+00 : f32
    %344 = vector.broadcast %cst_99 : f32 to vector<2x32xf32>
    %345 = arith.addf %344, %343 : vector<2x32xf32>
    %346 = arith.divf %344, %345 : vector<2x32xf32>
    %347 = vector.extract_strided_slice %331 {offsets = [0, 64], sizes = [2, 32], strides = [1, 1]} : vector<2x128xf32> to vector<2x32xf32>
    %348 = math.tanh %347 : vector<2x32xf32>
    %349 = vector.extract_strided_slice %331 {offsets = [0, 96], sizes = [2, 32], strides = [1, 1]} : vector<2x128xf32> to vector<2x32xf32>
    %350 = arith.negf %349 : vector<2x32xf32>
    %351 = math.exp %350 : vector<2x32xf32>
    %cst_100 = arith.constant 1.000000e+00 : f32
    %352 = vector.broadcast %cst_100 : f32 to vector<2x32xf32>
    %353 = arith.addf %352, %351 : vector<2x32xf32>
    %354 = arith.divf %352, %353 : vector<2x32xf32>
    %355 = arith.mulf %346, %282 : vector<2x32xf32>
    %356 = arith.mulf %340, %348 : vector<2x32xf32>
    %357 = arith.addf %355, %356 : vector<2x32xf32>
    %358 = math.tanh %357 : vector<2x32xf32>
    %359 = arith.mulf %354, %358 : vector<2x32xf32>
    %360 = vector.extract_strided_slice %334 {offsets = [0, 0], sizes = [2, 32], strides = [1, 1]} : vector<2x128xf32> to vector<2x32xf32>
    %361 = arith.negf %360 : vector<2x32xf32>
    %362 = math.exp %361 : vector<2x32xf32>
    %cst_101 = arith.constant 1.000000e+00 : f32
    %363 = vector.broadcast %cst_101 : f32 to vector<2x32xf32>
    %364 = arith.addf %363, %362 : vector<2x32xf32>
    %365 = arith.divf %363, %364 : vector<2x32xf32>
    %366 = vector.extract_strided_slice %334 {offsets = [0, 32], sizes = [2, 32], strides = [1, 1]} : vector<2x128xf32> to vector<2x32xf32>
    %367 = arith.negf %366 : vector<2x32xf32>
    %368 = math.exp %367 : vector<2x32xf32>
    %cst_102 = arith.constant 1.000000e+00 : f32
    %369 = vector.broadcast %cst_102 : f32 to vector<2x32xf32>
    %370 = arith.addf %369, %368 : vector<2x32xf32>
    %371 = arith.divf %369, %370 : vector<2x32xf32>
    %372 = vector.extract_strided_slice %334 {offsets = [0, 64], sizes = [2, 32], strides = [1, 1]} : vector<2x128xf32> to vector<2x32xf32>
    %373 = math.tanh %372 : vector<2x32xf32>
    %374 = vector.extract_strided_slice %334 {offsets = [0, 96], sizes = [2, 32], strides = [1, 1]} : vector<2x128xf32> to vector<2x32xf32>
    %375 = arith.negf %374 : vector<2x32xf32>
    %376 = math.exp %375 : vector<2x32xf32>
    %cst_103 = arith.constant 1.000000e+00 : f32
    %377 = vector.broadcast %cst_103 : f32 to vector<2x32xf32>
    %378 = arith.addf %377, %376 : vector<2x32xf32>
    %379 = arith.divf %377, %378 : vector<2x32xf32>
    %380 = arith.mulf %371, %307 : vector<2x32xf32>
    %381 = arith.mulf %365, %373 : vector<2x32xf32>
    %382 = arith.addf %380, %381 : vector<2x32xf32>
    %383 = math.tanh %382 : vector<2x32xf32>
    %384 = arith.mulf %379, %383 : vector<2x32xf32>
    %385 = arith.truncf %359 : vector<2x32xf32> to vector<2x32xbf16>
    %386 = arith.index_cast %c4_i32 : i32 to index
    %c0_104 = arith.constant 0 : index
    %c0_105 = arith.constant 0 : index
    %387 = vector.load %arg8[%386, %c0_104, %c0_105] : memref<8x2x64xbf16, #tpu.memory_space<vmem>>, vector<1x2x32xbf16>
    %388 = vector.shape_cast %387 : vector<1x2x32xbf16> to vector<2x32xbf16>
    %389 = vector.shape_cast %385 : vector<2x32xbf16> to vector<1x2x32xbf16>
    tpu.vector_store %arg8[%386, %c0_104, %c0_105], %389 {strides = array<i32>} : memref<8x2x64xbf16, #tpu.memory_space<vmem>>, vector<1x2x32xbf16>,
    %390 = arith.truncf %384 : vector<2x32xf32> to vector<2x32xbf16>
    %391 = arith.index_cast %320 : i32 to index
    %c0_106 = arith.constant 0 : index
    %c32_107 = arith.constant 32 : index
    %392 = vector.load %arg8[%391, %c0_106, %c32_107] : memref<8x2x64xbf16, #tpu.memory_space<vmem>>, vector<1x2x32xbf16>
    %393 = vector.shape_cast %392 : vector<1x2x32xbf16> to vector<2x32xbf16>
    %394 = vector.shape_cast %390 : vector<2x32xbf16> to vector<1x2x32xbf16>
    tpu.vector_store %arg8[%391, %c0_106, %c32_107], %394 {strides = array<i32>} : memref<8x2x64xbf16, #tpu.memory_space<vmem>>, vector<1x2x32xbf16>,
    %c5_i32 = arith.constant 5 : i32
    %c7_i32_108 = arith.constant 7 : i32
    %395 = arith.subi %c7_i32_108, %c5_i32 : i32
    %396 = arith.index_cast %c5_i32 : i32 to index
    %c0_109 = arith.constant 0 : index
    %c0_110 = arith.constant 0 : index
    %397 = vector.load %arg11[%396, %c0_109, %c0_110] : memref<8x2x256xf32, #tpu.memory_space<vmem>>, vector<1x2x256xf32>
    %398 = vector.shape_cast %397 : vector<1x2x256xf32> to vector<2x256xf32>
    %399 = vector.extract_strided_slice %398 {offsets = [0, 0], sizes = [2, 128], strides = [1, 1]} : vector<2x256xf32> to vector<2x128xf32>
    %400 = arith.index_cast %395 : i32 to index
    %c0_111 = arith.constant 0 : index
    %c0_112 = arith.constant 0 : index
    %401 = vector.load %arg11[%400, %c0_111, %c0_112] : memref<8x2x256xf32, #tpu.memory_space<vmem>>, vector<1x2x256xf32>
    %402 = vector.shape_cast %401 : vector<1x2x256xf32> to vector<2x256xf32>
    %403 = vector.extract_strided_slice %402 {offsets = [0, 128], sizes = [2, 128], strides = [1, 1]} : vector<2x256xf32> to vector<2x128xf32>
    %404 = arith.truncf %359 : vector<2x32xf32> to vector<2x32xbf16>
    %cst_113 = arith.constant dense<0.000000e+00> : vector<2x128xf32>
    %405 = tpu.matmul %404, %9, %cst_113 {dimension_numbers = #tpu.dot_dimension_numbers<[1], [0], [0], [1], [0, 0, 1, 1], [], []>} : vector<2x32xbf16>, vector<32x128xbf16>, vector<2x128xf32> -> vector<2x128xf32>
    %406 = arith.addf %399, %405 : vector<2x128xf32>
    %407 = arith.truncf %384 : vector<2x32xf32> to vector<2x32xbf16>
    %cst_114 = arith.constant dense<0.000000e+00> : vector<2x128xf32>
    %408 = tpu.matmul %407, %11, %cst_114 {dimension_numbers = #tpu.dot_dimension_numbers<[1], [0], [0], [1], [0, 0, 1, 1], [], []>} : vector<2x32xbf16>, vector<32x128xbf16>, vector<2x128xf32> -> vector<2x128xf32>
    %409 = arith.addf %403, %408 : vector<2x128xf32>
    %410 = vector.extract_strided_slice %406 {offsets = [0, 0], sizes = [2, 32], strides = [1, 1]} : vector<2x128xf32> to vector<2x32xf32>
    %411 = arith.negf %410 : vector<2x32xf32>
    %412 = math.exp %411 : vector<2x32xf32>
    %cst_115 = arith.constant 1.000000e+00 : f32
    %413 = vector.broadcast %cst_115 : f32 to vector<2x32xf32>
    %414 = arith.addf %413, %412 : vector<2x32xf32>
    %415 = arith.divf %413, %414 : vector<2x32xf32>
    %416 = vector.extract_strided_slice %406 {offsets = [0, 32], sizes = [2, 32], strides = [1, 1]} : vector<2x128xf32> to vector<2x32xf32>
    %417 = arith.negf %416 : vector<2x32xf32>
    %418 = math.exp %417 : vector<2x32xf32>
    %cst_116 = arith.constant 1.000000e+00 : f32
    %419 = vector.broadcast %cst_116 : f32 to vector<2x32xf32>
    %420 = arith.addf %419, %418 : vector<2x32xf32>
    %421 = arith.divf %419, %420 : vector<2x32xf32>
    %422 = vector.extract_strided_slice %406 {offsets = [0, 64], sizes = [2, 32], strides = [1, 1]} : vector<2x128xf32> to vector<2x32xf32>
    %423 = math.tanh %422 : vector<2x32xf32>
    %424 = vector.extract_strided_slice %406 {offsets = [0, 96], sizes = [2, 32], strides = [1, 1]} : vector<2x128xf32> to vector<2x32xf32>
    %425 = arith.negf %424 : vector<2x32xf32>
    %426 = math.exp %425 : vector<2x32xf32>
    %cst_117 = arith.constant 1.000000e+00 : f32
    %427 = vector.broadcast %cst_117 : f32 to vector<2x32xf32>
    %428 = arith.addf %427, %426 : vector<2x32xf32>
    %429 = arith.divf %427, %428 : vector<2x32xf32>
    %430 = arith.mulf %421, %357 : vector<2x32xf32>
    %431 = arith.mulf %415, %423 : vector<2x32xf32>
    %432 = arith.addf %430, %431 : vector<2x32xf32>
    %433 = math.tanh %432 : vector<2x32xf32>
    %434 = arith.mulf %429, %433 : vector<2x32xf32>
    %435 = vector.extract_strided_slice %409 {offsets = [0, 0], sizes = [2, 32], strides = [1, 1]} : vector<2x128xf32> to vector<2x32xf32>
    %436 = arith.negf %435 : vector<2x32xf32>
    %437 = math.exp %436 : vector<2x32xf32>
    %cst_118 = arith.constant 1.000000e+00 : f32
    %438 = vector.broadcast %cst_118 : f32 to vector<2x32xf32>
    %439 = arith.addf %438, %437 : vector<2x32xf32>
    %440 = arith.divf %438, %439 : vector<2x32xf32>
    %441 = vector.extract_strided_slice %409 {offsets = [0, 32], sizes = [2, 32], strides = [1, 1]} : vector<2x128xf32> to vector<2x32xf32>
    %442 = arith.negf %441 : vector<2x32xf32>
    %443 = math.exp %442 : vector<2x32xf32>
    %cst_119 = arith.constant 1.000000e+00 : f32
    %444 = vector.broadcast %cst_119 : f32 to vector<2x32xf32>
    %445 = arith.addf %444, %443 : vector<2x32xf32>
    %446 = arith.divf %444, %445 : vector<2x32xf32>
    %447 = vector.extract_strided_slice %409 {offsets = [0, 64], sizes = [2, 32], strides = [1, 1]} : vector<2x128xf32> to vector<2x32xf32>
    %448 = math.tanh %447 : vector<2x32xf32>
    %449 = vector.extract_strided_slice %409 {offsets = [0, 96], sizes = [2, 32], strides = [1, 1]} : vector<2x128xf32> to vector<2x32xf32>
    %450 = arith.negf %449 : vector<2x32xf32>
    %451 = math.exp %450 : vector<2x32xf32>
    %cst_120 = arith.constant 1.000000e+00 : f32
    %452 = vector.broadcast %cst_120 : f32 to vector<2x32xf32>
    %453 = arith.addf %452, %451 : vector<2x32xf32>
    %454 = arith.divf %452, %453 : vector<2x32xf32>
    %455 = arith.mulf %446, %382 : vector<2x32xf32>
    %456 = arith.mulf %440, %448 : vector<2x32xf32>
    %457 = arith.addf %455, %456 : vector<2x32xf32>
    %458 = math.tanh %457 : vector<2x32xf32>
    %459 = arith.mulf %454, %458 : vector<2x32xf32>
    %460 = arith.truncf %434 : vector<2x32xf32> to vector<2x32xbf16>
    %461 = arith.index_cast %c5_i32 : i32 to index
    %c0_121 = arith.constant 0 : index
    %c0_122 = arith.constant 0 : index
    %462 = vector.load %arg8[%461, %c0_121, %c0_122] : memref<8x2x64xbf16, #tpu.memory_space<vmem>>, vector<1x2x32xbf16>
    %463 = vector.shape_cast %462 : vector<1x2x32xbf16> to vector<2x32xbf16>
    %464 = vector.shape_cast %460 : vector<2x32xbf16> to vector<1x2x32xbf16>
    tpu.vector_store %arg8[%461, %c0_121, %c0_122], %464 {strides = array<i32>} : memref<8x2x64xbf16, #tpu.memory_space<vmem>>, vector<1x2x32xbf16>,
    %465 = arith.truncf %459 : vector<2x32xf32> to vector<2x32xbf16>
    %466 = arith.index_cast %395 : i32 to index
    %c0_123 = arith.constant 0 : index
    %c32_124 = arith.constant 32 : index
    %467 = vector.load %arg8[%466, %c0_123, %c32_124] : memref<8x2x64xbf16, #tpu.memory_space<vmem>>, vector<1x2x32xbf16>
    %468 = vector.shape_cast %467 : vector<1x2x32xbf16> to vector<2x32xbf16>
    %469 = vector.shape_cast %465 : vector<2x32xbf16> to vector<1x2x32xbf16>
    tpu.vector_store %arg8[%466, %c0_123, %c32_124], %469 {strides = array<i32>} : memref<8x2x64xbf16, #tpu.memory_space<vmem>>, vector<1x2x32xbf16>,
    %c6_i32 = arith.constant 6 : i32
    %c7_i32_125 = arith.constant 7 : i32
    %470 = arith.subi %c7_i32_125, %c6_i32 : i32
    %471 = arith.index_cast %c6_i32 : i32 to index
    %c0_126 = arith.constant 0 : index
    %c0_127 = arith.constant 0 : index
    %472 = vector.load %arg11[%471, %c0_126, %c0_127] : memref<8x2x256xf32, #tpu.memory_space<vmem>>, vector<1x2x256xf32>
    %473 = vector.shape_cast %472 : vector<1x2x256xf32> to vector<2x256xf32>
    %474 = vector.extract_strided_slice %473 {offsets = [0, 0], sizes = [2, 128], strides = [1, 1]} : vector<2x256xf32> to vector<2x128xf32>
    %475 = arith.index_cast %470 : i32 to index
    %c0_128 = arith.constant 0 : index
    %c0_129 = arith.constant 0 : index
    %476 = vector.load %arg11[%475, %c0_128, %c0_129] : memref<8x2x256xf32, #tpu.memory_space<vmem>>, vector<1x2x256xf32>
    %477 = vector.shape_cast %476 : vector<1x2x256xf32> to vector<2x256xf32>
    %478 = vector.extract_strided_slice %477 {offsets = [0, 128], sizes = [2, 128], strides = [1, 1]} : vector<2x256xf32> to vector<2x128xf32>
    %479 = arith.truncf %434 : vector<2x32xf32> to vector<2x32xbf16>
    %cst_130 = arith.constant dense<0.000000e+00> : vector<2x128xf32>
    %480 = tpu.matmul %479, %9, %cst_130 {dimension_numbers = #tpu.dot_dimension_numbers<[1], [0], [0], [1], [0, 0, 1, 1], [], []>} : vector<2x32xbf16>, vector<32x128xbf16>, vector<2x128xf32> -> vector<2x128xf32>
    %481 = arith.addf %474, %480 : vector<2x128xf32>
    %482 = arith.truncf %459 : vector<2x32xf32> to vector<2x32xbf16>
    %cst_131 = arith.constant dense<0.000000e+00> : vector<2x128xf32>
    %483 = tpu.matmul %482, %11, %cst_131 {dimension_numbers = #tpu.dot_dimension_numbers<[1], [0], [0], [1], [0, 0, 1, 1], [], []>} : vector<2x32xbf16>, vector<32x128xbf16>, vector<2x128xf32> -> vector<2x128xf32>
    %484 = arith.addf %478, %483 : vector<2x128xf32>
    %485 = vector.extract_strided_slice %481 {offsets = [0, 0], sizes = [2, 32], strides = [1, 1]} : vector<2x128xf32> to vector<2x32xf32>
    %486 = arith.negf %485 : vector<2x32xf32>
    %487 = math.exp %486 : vector<2x32xf32>
    %cst_132 = arith.constant 1.000000e+00 : f32
    %488 = vector.broadcast %cst_132 : f32 to vector<2x32xf32>
    %489 = arith.addf %488, %487 : vector<2x32xf32>
    %490 = arith.divf %488, %489 : vector<2x32xf32>
    %491 = vector.extract_strided_slice %481 {offsets = [0, 32], sizes = [2, 32], strides = [1, 1]} : vector<2x128xf32> to vector<2x32xf32>
    %492 = arith.negf %491 : vector<2x32xf32>
    %493 = math.exp %492 : vector<2x32xf32>
    %cst_133 = arith.constant 1.000000e+00 : f32
    %494 = vector.broadcast %cst_133 : f32 to vector<2x32xf32>
    %495 = arith.addf %494, %493 : vector<2x32xf32>
    %496 = arith.divf %494, %495 : vector<2x32xf32>
    %497 = vector.extract_strided_slice %481 {offsets = [0, 64], sizes = [2, 32], strides = [1, 1]} : vector<2x128xf32> to vector<2x32xf32>
    %498 = math.tanh %497 : vector<2x32xf32>
    %499 = vector.extract_strided_slice %481 {offsets = [0, 96], sizes = [2, 32], strides = [1, 1]} : vector<2x128xf32> to vector<2x32xf32>
    %500 = arith.negf %499 : vector<2x32xf32>
    %501 = math.exp %500 : vector<2x32xf32>
    %cst_134 = arith.constant 1.000000e+00 : f32
    %502 = vector.broadcast %cst_134 : f32 to vector<2x32xf32>
    %503 = arith.addf %502, %501 : vector<2x32xf32>
    %504 = arith.divf %502, %503 : vector<2x32xf32>
    %505 = arith.mulf %496, %432 : vector<2x32xf32>
    %506 = arith.mulf %490, %498 : vector<2x32xf32>
    %507 = arith.addf %505, %506 : vector<2x32xf32>
    %508 = math.tanh %507 : vector<2x32xf32>
    %509 = arith.mulf %504, %508 : vector<2x32xf32>
    %510 = vector.extract_strided_slice %484 {offsets = [0, 0], sizes = [2, 32], strides = [1, 1]} : vector<2x128xf32> to vector<2x32xf32>
    %511 = arith.negf %510 : vector<2x32xf32>
    %512 = math.exp %511 : vector<2x32xf32>
    %cst_135 = arith.constant 1.000000e+00 : f32
    %513 = vector.broadcast %cst_135 : f32 to vector<2x32xf32>
    %514 = arith.addf %513, %512 : vector<2x32xf32>
    %515 = arith.divf %513, %514 : vector<2x32xf32>
    %516 = vector.extract_strided_slice %484 {offsets = [0, 32], sizes = [2, 32], strides = [1, 1]} : vector<2x128xf32> to vector<2x32xf32>
    %517 = arith.negf %516 : vector<2x32xf32>
    %518 = math.exp %517 : vector<2x32xf32>
    %cst_136 = arith.constant 1.000000e+00 : f32
    %519 = vector.broadcast %cst_136 : f32 to vector<2x32xf32>
    %520 = arith.addf %519, %518 : vector<2x32xf32>
    %521 = arith.divf %519, %520 : vector<2x32xf32>
    %522 = vector.extract_strided_slice %484 {offsets = [0, 64], sizes = [2, 32], strides = [1, 1]} : vector<2x128xf32> to vector<2x32xf32>
    %523 = math.tanh %522 : vector<2x32xf32>
    %524 = vector.extract_strided_slice %484 {offsets = [0, 96], sizes = [2, 32], strides = [1, 1]} : vector<2x128xf32> to vector<2x32xf32>
    %525 = arith.negf %524 : vector<2x32xf32>
    %526 = math.exp %525 : vector<2x32xf32>
    %cst_137 = arith.constant 1.000000e+00 : f32
    %527 = vector.broadcast %cst_137 : f32 to vector<2x32xf32>
    %528 = arith.addf %527, %526 : vector<2x32xf32>
    %529 = arith.divf %527, %528 : vector<2x32xf32>
    %530 = arith.mulf %521, %457 : vector<2x32xf32>
    %531 = arith.mulf %515, %523 : vector<2x32xf32>
    %532 = arith.addf %530, %531 : vector<2x32xf32>
    %533 = math.tanh %532 : vector<2x32xf32>
    %534 = arith.mulf %529, %533 : vector<2x32xf32>
    %535 = arith.truncf %509 : vector<2x32xf32> to vector<2x32xbf16>
    %536 = arith.index_cast %c6_i32 : i32 to index
    %c0_138 = arith.constant 0 : index
    %c0_139 = arith.constant 0 : index
    %537 = vector.load %arg8[%536, %c0_138, %c0_139] : memref<8x2x64xbf16, #tpu.memory_space<vmem>>, vector<1x2x32xbf16>
    %538 = vector.shape_cast %537 : vector<1x2x32xbf16> to vector<2x32xbf16>
    %539 = vector.shape_cast %535 : vector<2x32xbf16> to vector<1x2x32xbf16>
    tpu.vector_store %arg8[%536, %c0_138, %c0_139], %539 {strides = array<i32>} : memref<8x2x64xbf16, #tpu.memory_space<vmem>>, vector<1x2x32xbf16>,
    %540 = arith.truncf %534 : vector<2x32xf32> to vector<2x32xbf16>
    %541 = arith.index_cast %470 : i32 to index
    %c0_140 = arith.constant 0 : index
    %c32_141 = arith.constant 32 : index
    %542 = vector.load %arg8[%541, %c0_140, %c32_141] : memref<8x2x64xbf16, #tpu.memory_space<vmem>>, vector<1x2x32xbf16>
    %543 = vector.shape_cast %542 : vector<1x2x32xbf16> to vector<2x32xbf16>
    %544 = vector.shape_cast %540 : vector<2x32xbf16> to vector<1x2x32xbf16>
    tpu.vector_store %arg8[%541, %c0_140, %c32_141], %544 {strides = array<i32>} : memref<8x2x64xbf16, #tpu.memory_space<vmem>>, vector<1x2x32xbf16>,
    %c7_i32_142 = arith.constant 7 : i32
    %c7_i32_143 = arith.constant 7 : i32
    %545 = arith.subi %c7_i32_143, %c7_i32_142 : i32
    %546 = arith.index_cast %c7_i32_142 : i32 to index
    %c0_144 = arith.constant 0 : index
    %c0_145 = arith.constant 0 : index
    %547 = vector.load %arg11[%546, %c0_144, %c0_145] : memref<8x2x256xf32, #tpu.memory_space<vmem>>, vector<1x2x256xf32>
    %548 = vector.shape_cast %547 : vector<1x2x256xf32> to vector<2x256xf32>
    %549 = vector.extract_strided_slice %548 {offsets = [0, 0], sizes = [2, 128], strides = [1, 1]} : vector<2x256xf32> to vector<2x128xf32>
    %550 = arith.index_cast %545 : i32 to index
    %c0_146 = arith.constant 0 : index
    %c0_147 = arith.constant 0 : index
    %551 = vector.load %arg11[%550, %c0_146, %c0_147] : memref<8x2x256xf32, #tpu.memory_space<vmem>>, vector<1x2x256xf32>
    %552 = vector.shape_cast %551 : vector<1x2x256xf32> to vector<2x256xf32>
    %553 = vector.extract_strided_slice %552 {offsets = [0, 128], sizes = [2, 128], strides = [1, 1]} : vector<2x256xf32> to vector<2x128xf32>
    %554 = arith.truncf %509 : vector<2x32xf32> to vector<2x32xbf16>
    %cst_148 = arith.constant dense<0.000000e+00> : vector<2x128xf32>
    %555 = tpu.matmul %554, %9, %cst_148 {dimension_numbers = #tpu.dot_dimension_numbers<[1], [0], [0], [1], [0, 0, 1, 1], [], []>} : vector<2x32xbf16>, vector<32x128xbf16>, vector<2x128xf32> -> vector<2x128xf32>
    %556 = arith.addf %549, %555 : vector<2x128xf32>
    %557 = arith.truncf %534 : vector<2x32xf32> to vector<2x32xbf16>
    %cst_149 = arith.constant dense<0.000000e+00> : vector<2x128xf32>
    %558 = tpu.matmul %557, %11, %cst_149 {dimension_numbers = #tpu.dot_dimension_numbers<[1], [0], [0], [1], [0, 0, 1, 1], [], []>} : vector<2x32xbf16>, vector<32x128xbf16>, vector<2x128xf32> -> vector<2x128xf32>
    %559 = arith.addf %553, %558 : vector<2x128xf32>
    %560 = vector.extract_strided_slice %556 {offsets = [0, 0], sizes = [2, 32], strides = [1, 1]} : vector<2x128xf32> to vector<2x32xf32>
    %561 = arith.negf %560 : vector<2x32xf32>
    %562 = math.exp %561 : vector<2x32xf32>
    %cst_150 = arith.constant 1.000000e+00 : f32
    %563 = vector.broadcast %cst_150 : f32 to vector<2x32xf32>
    %564 = arith.addf %563, %562 : vector<2x32xf32>
    %565 = arith.divf %563, %564 : vector<2x32xf32>
    %566 = vector.extract_strided_slice %556 {offsets = [0, 32], sizes = [2, 32], strides = [1, 1]} : vector<2x128xf32> to vector<2x32xf32>
    %567 = arith.negf %566 : vector<2x32xf32>
    %568 = math.exp %567 : vector<2x32xf32>
    %cst_151 = arith.constant 1.000000e+00 : f32
    %569 = vector.broadcast %cst_151 : f32 to vector<2x32xf32>
    %570 = arith.addf %569, %568 : vector<2x32xf32>
    %571 = arith.divf %569, %570 : vector<2x32xf32>
    %572 = vector.extract_strided_slice %556 {offsets = [0, 64], sizes = [2, 32], strides = [1, 1]} : vector<2x128xf32> to vector<2x32xf32>
    %573 = math.tanh %572 : vector<2x32xf32>
    %574 = vector.extract_strided_slice %556 {offsets = [0, 96], sizes = [2, 32], strides = [1, 1]} : vector<2x128xf32> to vector<2x32xf32>
    %575 = arith.negf %574 : vector<2x32xf32>
    %576 = math.exp %575 : vector<2x32xf32>
    %cst_152 = arith.constant 1.000000e+00 : f32
    %577 = vector.broadcast %cst_152 : f32 to vector<2x32xf32>
    %578 = arith.addf %577, %576 : vector<2x32xf32>
    %579 = arith.divf %577, %578 : vector<2x32xf32>
    %580 = arith.mulf %571, %507 : vector<2x32xf32>
    %581 = arith.mulf %565, %573 : vector<2x32xf32>
    %582 = arith.addf %580, %581 : vector<2x32xf32>
    %583 = math.tanh %582 : vector<2x32xf32>
    %584 = arith.mulf %579, %583 : vector<2x32xf32>
    %585 = vector.extract_strided_slice %559 {offsets = [0, 0], sizes = [2, 32], strides = [1, 1]} : vector<2x128xf32> to vector<2x32xf32>
    %586 = arith.negf %585 : vector<2x32xf32>
    %587 = math.exp %586 : vector<2x32xf32>
    %cst_153 = arith.constant 1.000000e+00 : f32
    %588 = vector.broadcast %cst_153 : f32 to vector<2x32xf32>
    %589 = arith.addf %588, %587 : vector<2x32xf32>
    %590 = arith.divf %588, %589 : vector<2x32xf32>
    %591 = vector.extract_strided_slice %559 {offsets = [0, 32], sizes = [2, 32], strides = [1, 1]} : vector<2x128xf32> to vector<2x32xf32>
    %592 = arith.negf %591 : vector<2x32xf32>
    %593 = math.exp %592 : vector<2x32xf32>
    %cst_154 = arith.constant 1.000000e+00 : f32
    %594 = vector.broadcast %cst_154 : f32 to vector<2x32xf32>
    %595 = arith.addf %594, %593 : vector<2x32xf32>
    %596 = arith.divf %594, %595 : vector<2x32xf32>
    %597 = vector.extract_strided_slice %559 {offsets = [0, 64], sizes = [2, 32], strides = [1, 1]} : vector<2x128xf32> to vector<2x32xf32>
    %598 = math.tanh %597 : vector<2x32xf32>
    %599 = vector.extract_strided_slice %559 {offsets = [0, 96], sizes = [2, 32], strides = [1, 1]} : vector<2x128xf32> to vector<2x32xf32>
    %600 = arith.negf %599 : vector<2x32xf32>
    %601 = math.exp %600 : vector<2x32xf32>
    %cst_155 = arith.constant 1.000000e+00 : f32
    %602 = vector.broadcast %cst_155 : f32 to vector<2x32xf32>
    %603 = arith.addf %602, %601 : vector<2x32xf32>
    %604 = arith.divf %602, %603 : vector<2x32xf32>
    %605 = arith.mulf %596, %532 : vector<2x32xf32>
    %606 = arith.mulf %590, %598 : vector<2x32xf32>
    %607 = arith.addf %605, %606 : vector<2x32xf32>
    %608 = math.tanh %607 : vector<2x32xf32>
    %609 = arith.mulf %604, %608 : vector<2x32xf32>
    %610 = arith.truncf %584 : vector<2x32xf32> to vector<2x32xbf16>
    %611 = arith.index_cast %c7_i32_142 : i32 to index
    %c0_156 = arith.constant 0 : index
    %c0_157 = arith.constant 0 : index
    %612 = vector.load %arg8[%611, %c0_156, %c0_157] : memref<8x2x64xbf16, #tpu.memory_space<vmem>>, vector<1x2x32xbf16>
    %613 = vector.shape_cast %612 : vector<1x2x32xbf16> to vector<2x32xbf16>
    %614 = vector.shape_cast %610 : vector<2x32xbf16> to vector<1x2x32xbf16>
    tpu.vector_store %arg8[%611, %c0_156, %c0_157], %614 {strides = array<i32>} : memref<8x2x64xbf16, #tpu.memory_space<vmem>>, vector<1x2x32xbf16>,
    %615 = arith.truncf %609 : vector<2x32xf32> to vector<2x32xbf16>
    %616 = arith.index_cast %545 : i32 to index
    %c0_158 = arith.constant 0 : index
    %c32_159 = arith.constant 32 : index
    %617 = vector.load %arg8[%616, %c0_158, %c32_159] : memref<8x2x64xbf16, #tpu.memory_space<vmem>>, vector<1x2x32xbf16>
    %618 = vector.shape_cast %617 : vector<1x2x32xbf16> to vector<2x32xbf16>
    %619 = vector.shape_cast %615 : vector<2x32xbf16> to vector<1x2x32xbf16>
    tpu.vector_store %arg8[%616, %c0_158, %c32_159], %619 {strides = array<i32>} : memref<8x2x64xbf16, #tpu.memory_space<vmem>>, vector<1x2x32xbf16>,
    %c8_i32 = arith.constant 8 : i32
    %c0_160 = arith.constant 0 : index
    %c0_161 = arith.constant 0 : index
    %620 = vector.load %arg9[%c0_160, %c0_161] : memref<2x64xf32, #tpu.memory_space<vmem>>, vector<2x32xf32>
    tpu.vector_store %arg9[%c0_160, %c0_161], %584 {strides = array<i32>} : memref<2x64xf32, #tpu.memory_space<vmem>>, vector<2x32xf32>,
    %c0_162 = arith.constant 0 : index
    %c32_163 = arith.constant 32 : index
    %621 = vector.load %arg9[%c0_162, %c32_163] : memref<2x64xf32, #tpu.memory_space<vmem>>, vector<2x32xf32>
    tpu.vector_store %arg9[%c0_162, %c32_163], %609 {strides = array<i32>} : memref<2x64xf32, #tpu.memory_space<vmem>>, vector<2x32xf32>,
    %c0_164 = arith.constant 0 : index
    %c0_165 = arith.constant 0 : index
    %622 = vector.load %arg9[%c0_164, %c0_165] : memref<2x64xf32, #tpu.memory_space<vmem>>, vector<2x64xf32>
    %c0_166 = arith.constant 0 : index
    %c0_167 = arith.constant 0 : index
    %623 = vector.load %arg6[%c0_166, %c0_167] : memref<64x4xf32, #tpu.memory_space<vmem>>, vector<64x4xf32>
    %cst_168 = arith.constant dense<0.000000e+00> : vector<2x4xf32>
    %624 = tpu.matmul %622, %623, %cst_168 {dimension_numbers = #tpu.dot_dimension_numbers<[1], [0], [0], [1], [0, 0, 1, 1], [], []>} : vector<2x64xf32>, vector<64x4xf32>, vector<2x4xf32> -> vector<2x4xf32>
    %c0_169 = arith.constant 0 : index
    %c0_170 = arith.constant 0 : index
    %625 = vector.load %arg7[%c0_169, %c0_170] : memref<1x4xf32, #tpu.memory_space<vmem>>, vector<1x4xf32>
    %626 = vector.broadcast %625 : vector<1x4xf32> to vector<2x4xf32>
    %627 = arith.addf %624, %626 : vector<2x4xf32>
    %c0_171 = arith.constant 0 : index
    %c0_172 = arith.constant 0 : index
    %628 = vector.load %arg10[%c0_171, %c0_172] : memref<2x4xf32, #tpu.memory_space<vmem>>, vector<2x4xf32>
    tpu.vector_store %arg10[%c0_171, %c0_172], %627 {strides = array<i32>} : memref<2x4xf32, #tpu.memory_space<vmem>>, vector<2x4xf32>,
    return
  }
}

module attributes {stable_mosaic.version = 11 : i64} {
  func.func @_bilstm_kernel(%arg0: memref<16x768xbf16, #tpu.memory_space<vmem>>, %arg1: memref<768x256xbf16, #tpu.memory_space<vmem>>, %arg2: memref<2x32x128xbf16, #tpu.memory_space<vmem>>, %arg3: memref<1x256xf32, #tpu.memory_space<vmem>>, %arg4: memref<2x2x32xf32, #tpu.memory_space<vmem>>, %arg5: memref<2x2x32xf32, #tpu.memory_space<vmem>>, %arg6: memref<8x2x64xbf16, #tpu.memory_space<vmem>>, %arg7: memref<2x64xf32, #tpu.memory_space<vmem>>, %arg8: memref<8x2x256xf32, #tpu.memory_space<vmem>>) attributes {dimension_semantics = [], scalar_prefetch = 0 : i64, scratch_operands = 1 : i64, tpu.core_type = #tpu.core_type<tc>} {
    %c0 = arith.constant 0 : index
    %c0_0 = arith.constant 0 : index
    %0 = vector.load %arg0[%c0, %c0_0] : memref<16x768xbf16, #tpu.memory_space<vmem>>, vector<16x768xbf16>
    %c0_1 = arith.constant 0 : index
    %c0_2 = arith.constant 0 : index
    %1 = vector.load %arg1[%c0_1, %c0_2] : memref<768x256xbf16, #tpu.memory_space<vmem>>, vector<768x256xbf16>
    %cst = arith.constant dense<0.000000e+00> : vector<16x256xf32>
    %2 = tpu.matmul %0, %1, %cst {dimension_numbers = #tpu.dot_dimension_numbers<[1], [0], [0], [1], [0, 0, 1, 1], [], []>} : vector<16x768xbf16>, vector<768x256xbf16>, vector<16x256xf32> -> vector<16x256xf32>
    %c0_3 = arith.constant 0 : index
    %c0_4 = arith.constant 0 : index
    %3 = vector.load %arg3[%c0_3, %c0_4] : memref<1x256xf32, #tpu.memory_space<vmem>>, vector<1x256xf32>
    %4 = vector.broadcast %3 : vector<1x256xf32> to vector<16x256xf32>
    %5 = arith.addf %2, %4 : vector<16x256xf32>
    %6 = vector.shape_cast %5 : vector<16x256xf32> to vector<8x2x256xf32>
    %c0_5 = arith.constant 0 : index
    %c0_6 = arith.constant 0 : index
    %c0_7 = arith.constant 0 : index
    %7 = vector.load %arg8[%c0_5, %c0_6, %c0_7] : memref<8x2x256xf32, #tpu.memory_space<vmem>>, vector<8x2x256xf32>
    tpu.vector_store %arg8[%c0_5, %c0_6, %c0_7], %6 {strides = array<i32>} : memref<8x2x256xf32, #tpu.memory_space<vmem>>, vector<8x2x256xf32>,
    %c0_8 = arith.constant 0 : index
    %c0_9 = arith.constant 0 : index
    %c0_10 = arith.constant 0 : index
    %8 = vector.load %arg2[%c0_8, %c0_9, %c0_10] : memref<2x32x128xbf16, #tpu.memory_space<vmem>>, vector<1x32x128xbf16>
    %9 = vector.shape_cast %8 : vector<1x32x128xbf16> to vector<32x128xbf16>
    %c1 = arith.constant 1 : index
    %c0_11 = arith.constant 0 : index
    %c0_12 = arith.constant 0 : index
    %10 = vector.load %arg2[%c1, %c0_11, %c0_12] : memref<2x32x128xbf16, #tpu.memory_space<vmem>>, vector<1x32x128xbf16>
    %11 = vector.shape_cast %10 : vector<1x32x128xbf16> to vector<32x128xbf16>
    %c0_13 = arith.constant 0 : index
    %c0_14 = arith.constant 0 : index
    %c0_15 = arith.constant 0 : index
    %12 = vector.load %arg4[%c0_13, %c0_14, %c0_15] : memref<2x2x32xf32, #tpu.memory_space<vmem>>, vector<1x2x32xf32>
    %13 = vector.shape_cast %12 : vector<1x2x32xf32> to vector<2x32xf32>
    %c0_16 = arith.constant 0 : index
    %c0_17 = arith.constant 0 : index
    %c0_18 = arith.constant 0 : index
    %14 = vector.load %arg5[%c0_16, %c0_17, %c0_18] : memref<2x2x32xf32, #tpu.memory_space<vmem>>, vector<1x2x32xf32>
    %15 = vector.shape_cast %14 : vector<1x2x32xf32> to vector<2x32xf32>
    %c1_19 = arith.constant 1 : index
    %c0_20 = arith.constant 0 : index
    %c0_21 = arith.constant 0 : index
    %16 = vector.load %arg4[%c1_19, %c0_20, %c0_21] : memref<2x2x32xf32, #tpu.memory_space<vmem>>, vector<1x2x32xf32>
    %17 = vector.shape_cast %16 : vector<1x2x32xf32> to vector<2x32xf32>
    %c1_22 = arith.constant 1 : index
    %c0_23 = arith.constant 0 : index
    %c0_24 = arith.constant 0 : index
    %18 = vector.load %arg5[%c1_22, %c0_23, %c0_24] : memref<2x2x32xf32, #tpu.memory_space<vmem>>, vector<1x2x32xf32>
    %19 = vector.shape_cast %18 : vector<1x2x32xf32> to vector<2x32xf32>
    %c0_i32 = arith.constant 0 : i32
    %c7_i32 = arith.constant 7 : i32
    %20 = arith.subi %c7_i32, %c0_i32 : i32
    %21 = arith.index_cast %c0_i32 : i32 to index
    %c0_25 = arith.constant 0 : index
    %c0_26 = arith.constant 0 : index
    %22 = vector.load %arg8[%21, %c0_25, %c0_26] : memref<8x2x256xf32, #tpu.memory_space<vmem>>, vector<1x2x256xf32>
    %23 = vector.shape_cast %22 : vector<1x2x256xf32> to vector<2x256xf32>
    %24 = vector.extract_strided_slice %23 {offsets = [0, 0], sizes = [2, 128], strides = [1, 1]} : vector<2x256xf32> to vector<2x128xf32>
    %25 = arith.index_cast %20 : i32 to index
    %c0_27 = arith.constant 0 : index
    %c0_28 = arith.constant 0 : index
    %26 = vector.load %arg8[%25, %c0_27, %c0_28] : memref<8x2x256xf32, #tpu.memory_space<vmem>>, vector<1x2x256xf32>
    %27 = vector.shape_cast %26 : vector<1x2x256xf32> to vector<2x256xf32>
    %28 = vector.extract_strided_slice %27 {offsets = [0, 128], sizes = [2, 128], strides = [1, 1]} : vector<2x256xf32> to vector<2x128xf32>
    %29 = arith.truncf %13 : vector<2x32xf32> to vector<2x32xbf16>
    %cst_29 = arith.constant dense<0.000000e+00> : vector<2x128xf32>
    %30 = tpu.matmul %29, %9, %cst_29 {dimension_numbers = #tpu.dot_dimension_numbers<[1], [0], [0], [1], [0, 0, 1, 1], [], []>} : vector<2x32xbf16>, vector<32x128xbf16>, vector<2x128xf32> -> vector<2x128xf32>
    %31 = arith.addf %24, %30 : vector<2x128xf32>
    %32 = arith.truncf %17 : vector<2x32xf32> to vector<2x32xbf16>
    %cst_30 = arith.constant dense<0.000000e+00> : vector<2x128xf32>
    %33 = tpu.matmul %32, %11, %cst_30 {dimension_numbers = #tpu.dot_dimension_numbers<[1], [0], [0], [1], [0, 0, 1, 1], [], []>} : vector<2x32xbf16>, vector<32x128xbf16>, vector<2x128xf32> -> vector<2x128xf32>
    %34 = arith.addf %28, %33 : vector<2x128xf32>
    %35 = vector.extract_strided_slice %31 {offsets = [0, 0], sizes = [2, 32], strides = [1, 1]} : vector<2x128xf32> to vector<2x32xf32>
    %36 = arith.negf %35 : vector<2x32xf32>
    %37 = math.exp %36 : vector<2x32xf32>
    %cst_31 = arith.constant 1.000000e+00 : f32
    %38 = vector.broadcast %cst_31 : f32 to vector<2x32xf32>
    %39 = arith.addf %38, %37 : vector<2x32xf32>
    %40 = arith.divf %38, %39 : vector<2x32xf32>
    %41 = vector.extract_strided_slice %31 {offsets = [0, 32], sizes = [2, 32], strides = [1, 1]} : vector<2x128xf32> to vector<2x32xf32>
    %42 = arith.negf %41 : vector<2x32xf32>
    %43 = math.exp %42 : vector<2x32xf32>
    %cst_32 = arith.constant 1.000000e+00 : f32
    %44 = vector.broadcast %cst_32 : f32 to vector<2x32xf32>
    %45 = arith.addf %44, %43 : vector<2x32xf32>
    %46 = arith.divf %44, %45 : vector<2x32xf32>
    %47 = vector.extract_strided_slice %31 {offsets = [0, 64], sizes = [2, 32], strides = [1, 1]} : vector<2x128xf32> to vector<2x32xf32>
    %48 = math.tanh %47 : vector<2x32xf32>
    %49 = vector.extract_strided_slice %31 {offsets = [0, 96], sizes = [2, 32], strides = [1, 1]} : vector<2x128xf32> to vector<2x32xf32>
    %50 = arith.negf %49 : vector<2x32xf32>
    %51 = math.exp %50 : vector<2x32xf32>
    %cst_33 = arith.constant 1.000000e+00 : f32
    %52 = vector.broadcast %cst_33 : f32 to vector<2x32xf32>
    %53 = arith.addf %52, %51 : vector<2x32xf32>
    %54 = arith.divf %52, %53 : vector<2x32xf32>
    %55 = arith.mulf %46, %15 : vector<2x32xf32>
    %56 = arith.mulf %40, %48 : vector<2x32xf32>
    %57 = arith.addf %55, %56 : vector<2x32xf32>
    %58 = math.tanh %57 : vector<2x32xf32>
    %59 = arith.mulf %54, %58 : vector<2x32xf32>
    %60 = vector.extract_strided_slice %34 {offsets = [0, 0], sizes = [2, 32], strides = [1, 1]} : vector<2x128xf32> to vector<2x32xf32>
    %61 = arith.negf %60 : vector<2x32xf32>
    %62 = math.exp %61 : vector<2x32xf32>
    %cst_34 = arith.constant 1.000000e+00 : f32
    %63 = vector.broadcast %cst_34 : f32 to vector<2x32xf32>
    %64 = arith.addf %63, %62 : vector<2x32xf32>
    %65 = arith.divf %63, %64 : vector<2x32xf32>
    %66 = vector.extract_strided_slice %34 {offsets = [0, 32], sizes = [2, 32], strides = [1, 1]} : vector<2x128xf32> to vector<2x32xf32>
    %67 = arith.negf %66 : vector<2x32xf32>
    %68 = math.exp %67 : vector<2x32xf32>
    %cst_35 = arith.constant 1.000000e+00 : f32
    %69 = vector.broadcast %cst_35 : f32 to vector<2x32xf32>
    %70 = arith.addf %69, %68 : vector<2x32xf32>
    %71 = arith.divf %69, %70 : vector<2x32xf32>
    %72 = vector.extract_strided_slice %34 {offsets = [0, 64], sizes = [2, 32], strides = [1, 1]} : vector<2x128xf32> to vector<2x32xf32>
    %73 = math.tanh %72 : vector<2x32xf32>
    %74 = vector.extract_strided_slice %34 {offsets = [0, 96], sizes = [2, 32], strides = [1, 1]} : vector<2x128xf32> to vector<2x32xf32>
    %75 = arith.negf %74 : vector<2x32xf32>
    %76 = math.exp %75 : vector<2x32xf32>
    %cst_36 = arith.constant 1.000000e+00 : f32
    %77 = vector.broadcast %cst_36 : f32 to vector<2x32xf32>
    %78 = arith.addf %77, %76 : vector<2x32xf32>
    %79 = arith.divf %77, %78 : vector<2x32xf32>
    %80 = arith.mulf %71, %19 : vector<2x32xf32>
    %81 = arith.mulf %65, %73 : vector<2x32xf32>
    %82 = arith.addf %80, %81 : vector<2x32xf32>
    %83 = math.tanh %82 : vector<2x32xf32>
    %84 = arith.mulf %79, %83 : vector<2x32xf32>
    %85 = arith.truncf %59 : vector<2x32xf32> to vector<2x32xbf16>
    %86 = arith.index_cast %c0_i32 : i32 to index
    %c0_37 = arith.constant 0 : index
    %c0_38 = arith.constant 0 : index
    %87 = vector.load %arg6[%86, %c0_37, %c0_38] : memref<8x2x64xbf16, #tpu.memory_space<vmem>>, vector<1x2x32xbf16>
    %88 = vector.shape_cast %87 : vector<1x2x32xbf16> to vector<2x32xbf16>
    %89 = vector.shape_cast %85 : vector<2x32xbf16> to vector<1x2x32xbf16>
    tpu.vector_store %arg6[%86, %c0_37, %c0_38], %89 {strides = array<i32>} : memref<8x2x64xbf16, #tpu.memory_space<vmem>>, vector<1x2x32xbf16>,
    %90 = arith.truncf %84 : vector<2x32xf32> to vector<2x32xbf16>
    %91 = arith.index_cast %20 : i32 to index
    %c0_39 = arith.constant 0 : index
    %c32 = arith.constant 32 : index
    %92 = vector.load %arg6[%91, %c0_39, %c32] : memref<8x2x64xbf16, #tpu.memory_space<vmem>>, vector<1x2x32xbf16>
    %93 = vector.shape_cast %92 : vector<1x2x32xbf16> to vector<2x32xbf16>
    %94 = vector.shape_cast %90 : vector<2x32xbf16> to vector<1x2x32xbf16>
    tpu.vector_store %arg6[%91, %c0_39, %c32], %94 {strides = array<i32>} : memref<8x2x64xbf16, #tpu.memory_space<vmem>>, vector<1x2x32xbf16>,
    %c1_i32 = arith.constant 1 : i32
    %c7_i32_40 = arith.constant 7 : i32
    %95 = arith.subi %c7_i32_40, %c1_i32 : i32
    %96 = arith.index_cast %c1_i32 : i32 to index
    %c0_41 = arith.constant 0 : index
    %c0_42 = arith.constant 0 : index
    %97 = vector.load %arg8[%96, %c0_41, %c0_42] : memref<8x2x256xf32, #tpu.memory_space<vmem>>, vector<1x2x256xf32>
    %98 = vector.shape_cast %97 : vector<1x2x256xf32> to vector<2x256xf32>
    %99 = vector.extract_strided_slice %98 {offsets = [0, 0], sizes = [2, 128], strides = [1, 1]} : vector<2x256xf32> to vector<2x128xf32>
    %100 = arith.index_cast %95 : i32 to index
    %c0_43 = arith.constant 0 : index
    %c0_44 = arith.constant 0 : index
    %101 = vector.load %arg8[%100, %c0_43, %c0_44] : memref<8x2x256xf32, #tpu.memory_space<vmem>>, vector<1x2x256xf32>
    %102 = vector.shape_cast %101 : vector<1x2x256xf32> to vector<2x256xf32>
    %103 = vector.extract_strided_slice %102 {offsets = [0, 128], sizes = [2, 128], strides = [1, 1]} : vector<2x256xf32> to vector<2x128xf32>
    %104 = arith.truncf %59 : vector<2x32xf32> to vector<2x32xbf16>
    %cst_45 = arith.constant dense<0.000000e+00> : vector<2x128xf32>
    %105 = tpu.matmul %104, %9, %cst_45 {dimension_numbers = #tpu.dot_dimension_numbers<[1], [0], [0], [1], [0, 0, 1, 1], [], []>} : vector<2x32xbf16>, vector<32x128xbf16>, vector<2x128xf32> -> vector<2x128xf32>
    %106 = arith.addf %99, %105 : vector<2x128xf32>
    %107 = arith.truncf %84 : vector<2x32xf32> to vector<2x32xbf16>
    %cst_46 = arith.constant dense<0.000000e+00> : vector<2x128xf32>
    %108 = tpu.matmul %107, %11, %cst_46 {dimension_numbers = #tpu.dot_dimension_numbers<[1], [0], [0], [1], [0, 0, 1, 1], [], []>} : vector<2x32xbf16>, vector<32x128xbf16>, vector<2x128xf32> -> vector<2x128xf32>
    %109 = arith.addf %103, %108 : vector<2x128xf32>
    %110 = vector.extract_strided_slice %106 {offsets = [0, 0], sizes = [2, 32], strides = [1, 1]} : vector<2x128xf32> to vector<2x32xf32>
    %111 = arith.negf %110 : vector<2x32xf32>
    %112 = math.exp %111 : vector<2x32xf32>
    %cst_47 = arith.constant 1.000000e+00 : f32
    %113 = vector.broadcast %cst_47 : f32 to vector<2x32xf32>
    %114 = arith.addf %113, %112 : vector<2x32xf32>
    %115 = arith.divf %113, %114 : vector<2x32xf32>
    %116 = vector.extract_strided_slice %106 {offsets = [0, 32], sizes = [2, 32], strides = [1, 1]} : vector<2x128xf32> to vector<2x32xf32>
    %117 = arith.negf %116 : vector<2x32xf32>
    %118 = math.exp %117 : vector<2x32xf32>
    %cst_48 = arith.constant 1.000000e+00 : f32
    %119 = vector.broadcast %cst_48 : f32 to vector<2x32xf32>
    %120 = arith.addf %119, %118 : vector<2x32xf32>
    %121 = arith.divf %119, %120 : vector<2x32xf32>
    %122 = vector.extract_strided_slice %106 {offsets = [0, 64], sizes = [2, 32], strides = [1, 1]} : vector<2x128xf32> to vector<2x32xf32>
    %123 = math.tanh %122 : vector<2x32xf32>
    %124 = vector.extract_strided_slice %106 {offsets = [0, 96], sizes = [2, 32], strides = [1, 1]} : vector<2x128xf32> to vector<2x32xf32>
    %125 = arith.negf %124 : vector<2x32xf32>
    %126 = math.exp %125 : vector<2x32xf32>
    %cst_49 = arith.constant 1.000000e+00 : f32
    %127 = vector.broadcast %cst_49 : f32 to vector<2x32xf32>
    %128 = arith.addf %127, %126 : vector<2x32xf32>
    %129 = arith.divf %127, %128 : vector<2x32xf32>
    %130 = arith.mulf %121, %57 : vector<2x32xf32>
    %131 = arith.mulf %115, %123 : vector<2x32xf32>
    %132 = arith.addf %130, %131 : vector<2x32xf32>
    %133 = math.tanh %132 : vector<2x32xf32>
    %134 = arith.mulf %129, %133 : vector<2x32xf32>
    %135 = vector.extract_strided_slice %109 {offsets = [0, 0], sizes = [2, 32], strides = [1, 1]} : vector<2x128xf32> to vector<2x32xf32>
    %136 = arith.negf %135 : vector<2x32xf32>
    %137 = math.exp %136 : vector<2x32xf32>
    %cst_50 = arith.constant 1.000000e+00 : f32
    %138 = vector.broadcast %cst_50 : f32 to vector<2x32xf32>
    %139 = arith.addf %138, %137 : vector<2x32xf32>
    %140 = arith.divf %138, %139 : vector<2x32xf32>
    %141 = vector.extract_strided_slice %109 {offsets = [0, 32], sizes = [2, 32], strides = [1, 1]} : vector<2x128xf32> to vector<2x32xf32>
    %142 = arith.negf %141 : vector<2x32xf32>
    %143 = math.exp %142 : vector<2x32xf32>
    %cst_51 = arith.constant 1.000000e+00 : f32
    %144 = vector.broadcast %cst_51 : f32 to vector<2x32xf32>
    %145 = arith.addf %144, %143 : vector<2x32xf32>
    %146 = arith.divf %144, %145 : vector<2x32xf32>
    %147 = vector.extract_strided_slice %109 {offsets = [0, 64], sizes = [2, 32], strides = [1, 1]} : vector<2x128xf32> to vector<2x32xf32>
    %148 = math.tanh %147 : vector<2x32xf32>
    %149 = vector.extract_strided_slice %109 {offsets = [0, 96], sizes = [2, 32], strides = [1, 1]} : vector<2x128xf32> to vector<2x32xf32>
    %150 = arith.negf %149 : vector<2x32xf32>
    %151 = math.exp %150 : vector<2x32xf32>
    %cst_52 = arith.constant 1.000000e+00 : f32
    %152 = vector.broadcast %cst_52 : f32 to vector<2x32xf32>
    %153 = arith.addf %152, %151 : vector<2x32xf32>
    %154 = arith.divf %152, %153 : vector<2x32xf32>
    %155 = arith.mulf %146, %82 : vector<2x32xf32>
    %156 = arith.mulf %140, %148 : vector<2x32xf32>
    %157 = arith.addf %155, %156 : vector<2x32xf32>
    %158 = math.tanh %157 : vector<2x32xf32>
    %159 = arith.mulf %154, %158 : vector<2x32xf32>
    %160 = arith.truncf %134 : vector<2x32xf32> to vector<2x32xbf16>
    %161 = arith.index_cast %c1_i32 : i32 to index
    %c0_53 = arith.constant 0 : index
    %c0_54 = arith.constant 0 : index
    %162 = vector.load %arg6[%161, %c0_53, %c0_54] : memref<8x2x64xbf16, #tpu.memory_space<vmem>>, vector<1x2x32xbf16>
    %163 = vector.shape_cast %162 : vector<1x2x32xbf16> to vector<2x32xbf16>
    %164 = vector.shape_cast %160 : vector<2x32xbf16> to vector<1x2x32xbf16>
    tpu.vector_store %arg6[%161, %c0_53, %c0_54], %164 {strides = array<i32>} : memref<8x2x64xbf16, #tpu.memory_space<vmem>>, vector<1x2x32xbf16>,
    %165 = arith.truncf %159 : vector<2x32xf32> to vector<2x32xbf16>
    %166 = arith.index_cast %95 : i32 to index
    %c0_55 = arith.constant 0 : index
    %c32_56 = arith.constant 32 : index
    %167 = vector.load %arg6[%166, %c0_55, %c32_56] : memref<8x2x64xbf16, #tpu.memory_space<vmem>>, vector<1x2x32xbf16>
    %168 = vector.shape_cast %167 : vector<1x2x32xbf16> to vector<2x32xbf16>
    %169 = vector.shape_cast %165 : vector<2x32xbf16> to vector<1x2x32xbf16>
    tpu.vector_store %arg6[%166, %c0_55, %c32_56], %169 {strides = array<i32>} : memref<8x2x64xbf16, #tpu.memory_space<vmem>>, vector<1x2x32xbf16>,
    %c2_i32 = arith.constant 2 : i32
    %c7_i32_57 = arith.constant 7 : i32
    %170 = arith.subi %c7_i32_57, %c2_i32 : i32
    %171 = arith.index_cast %c2_i32 : i32 to index
    %c0_58 = arith.constant 0 : index
    %c0_59 = arith.constant 0 : index
    %172 = vector.load %arg8[%171, %c0_58, %c0_59] : memref<8x2x256xf32, #tpu.memory_space<vmem>>, vector<1x2x256xf32>
    %173 = vector.shape_cast %172 : vector<1x2x256xf32> to vector<2x256xf32>
    %174 = vector.extract_strided_slice %173 {offsets = [0, 0], sizes = [2, 128], strides = [1, 1]} : vector<2x256xf32> to vector<2x128xf32>
    %175 = arith.index_cast %170 : i32 to index
    %c0_60 = arith.constant 0 : index
    %c0_61 = arith.constant 0 : index
    %176 = vector.load %arg8[%175, %c0_60, %c0_61] : memref<8x2x256xf32, #tpu.memory_space<vmem>>, vector<1x2x256xf32>
    %177 = vector.shape_cast %176 : vector<1x2x256xf32> to vector<2x256xf32>
    %178 = vector.extract_strided_slice %177 {offsets = [0, 128], sizes = [2, 128], strides = [1, 1]} : vector<2x256xf32> to vector<2x128xf32>
    %179 = arith.truncf %134 : vector<2x32xf32> to vector<2x32xbf16>
    %cst_62 = arith.constant dense<0.000000e+00> : vector<2x128xf32>
    %180 = tpu.matmul %179, %9, %cst_62 {dimension_numbers = #tpu.dot_dimension_numbers<[1], [0], [0], [1], [0, 0, 1, 1], [], []>} : vector<2x32xbf16>, vector<32x128xbf16>, vector<2x128xf32> -> vector<2x128xf32>
    %181 = arith.addf %174, %180 : vector<2x128xf32>
    %182 = arith.truncf %159 : vector<2x32xf32> to vector<2x32xbf16>
    %cst_63 = arith.constant dense<0.000000e+00> : vector<2x128xf32>
    %183 = tpu.matmul %182, %11, %cst_63 {dimension_numbers = #tpu.dot_dimension_numbers<[1], [0], [0], [1], [0, 0, 1, 1], [], []>} : vector<2x32xbf16>, vector<32x128xbf16>, vector<2x128xf32> -> vector<2x128xf32>
    %184 = arith.addf %178, %183 : vector<2x128xf32>
    %185 = vector.extract_strided_slice %181 {offsets = [0, 0], sizes = [2, 32], strides = [1, 1]} : vector<2x128xf32> to vector<2x32xf32>
    %186 = arith.negf %185 : vector<2x32xf32>
    %187 = math.exp %186 : vector<2x32xf32>
    %cst_64 = arith.constant 1.000000e+00 : f32
    %188 = vector.broadcast %cst_64 : f32 to vector<2x32xf32>
    %189 = arith.addf %188, %187 : vector<2x32xf32>
    %190 = arith.divf %188, %189 : vector<2x32xf32>
    %191 = vector.extract_strided_slice %181 {offsets = [0, 32], sizes = [2, 32], strides = [1, 1]} : vector<2x128xf32> to vector<2x32xf32>
    %192 = arith.negf %191 : vector<2x32xf32>
    %193 = math.exp %192 : vector<2x32xf32>
    %cst_65 = arith.constant 1.000000e+00 : f32
    %194 = vector.broadcast %cst_65 : f32 to vector<2x32xf32>
    %195 = arith.addf %194, %193 : vector<2x32xf32>
    %196 = arith.divf %194, %195 : vector<2x32xf32>
    %197 = vector.extract_strided_slice %181 {offsets = [0, 64], sizes = [2, 32], strides = [1, 1]} : vector<2x128xf32> to vector<2x32xf32>
    %198 = math.tanh %197 : vector<2x32xf32>
    %199 = vector.extract_strided_slice %181 {offsets = [0, 96], sizes = [2, 32], strides = [1, 1]} : vector<2x128xf32> to vector<2x32xf32>
    %200 = arith.negf %199 : vector<2x32xf32>
    %201 = math.exp %200 : vector<2x32xf32>
    %cst_66 = arith.constant 1.000000e+00 : f32
    %202 = vector.broadcast %cst_66 : f32 to vector<2x32xf32>
    %203 = arith.addf %202, %201 : vector<2x32xf32>
    %204 = arith.divf %202, %203 : vector<2x32xf32>
    %205 = arith.mulf %196, %132 : vector<2x32xf32>
    %206 = arith.mulf %190, %198 : vector<2x32xf32>
    %207 = arith.addf %205, %206 : vector<2x32xf32>
    %208 = math.tanh %207 : vector<2x32xf32>
    %209 = arith.mulf %204, %208 : vector<2x32xf32>
    %210 = vector.extract_strided_slice %184 {offsets = [0, 0], sizes = [2, 32], strides = [1, 1]} : vector<2x128xf32> to vector<2x32xf32>
    %211 = arith.negf %210 : vector<2x32xf32>
    %212 = math.exp %211 : vector<2x32xf32>
    %cst_67 = arith.constant 1.000000e+00 : f32
    %213 = vector.broadcast %cst_67 : f32 to vector<2x32xf32>
    %214 = arith.addf %213, %212 : vector<2x32xf32>
    %215 = arith.divf %213, %214 : vector<2x32xf32>
    %216 = vector.extract_strided_slice %184 {offsets = [0, 32], sizes = [2, 32], strides = [1, 1]} : vector<2x128xf32> to vector<2x32xf32>
    %217 = arith.negf %216 : vector<2x32xf32>
    %218 = math.exp %217 : vector<2x32xf32>
    %cst_68 = arith.constant 1.000000e+00 : f32
    %219 = vector.broadcast %cst_68 : f32 to vector<2x32xf32>
    %220 = arith.addf %219, %218 : vector<2x32xf32>
    %221 = arith.divf %219, %220 : vector<2x32xf32>
    %222 = vector.extract_strided_slice %184 {offsets = [0, 64], sizes = [2, 32], strides = [1, 1]} : vector<2x128xf32> to vector<2x32xf32>
    %223 = math.tanh %222 : vector<2x32xf32>
    %224 = vector.extract_strided_slice %184 {offsets = [0, 96], sizes = [2, 32], strides = [1, 1]} : vector<2x128xf32> to vector<2x32xf32>
    %225 = arith.negf %224 : vector<2x32xf32>
    %226 = math.exp %225 : vector<2x32xf32>
    %cst_69 = arith.constant 1.000000e+00 : f32
    %227 = vector.broadcast %cst_69 : f32 to vector<2x32xf32>
    %228 = arith.addf %227, %226 : vector<2x32xf32>
    %229 = arith.divf %227, %228 : vector<2x32xf32>
    %230 = arith.mulf %221, %157 : vector<2x32xf32>
    %231 = arith.mulf %215, %223 : vector<2x32xf32>
    %232 = arith.addf %230, %231 : vector<2x32xf32>
    %233 = math.tanh %232 : vector<2x32xf32>
    %234 = arith.mulf %229, %233 : vector<2x32xf32>
    %235 = arith.truncf %209 : vector<2x32xf32> to vector<2x32xbf16>
    %236 = arith.index_cast %c2_i32 : i32 to index
    %c0_70 = arith.constant 0 : index
    %c0_71 = arith.constant 0 : index
    %237 = vector.load %arg6[%236, %c0_70, %c0_71] : memref<8x2x64xbf16, #tpu.memory_space<vmem>>, vector<1x2x32xbf16>
    %238 = vector.shape_cast %237 : vector<1x2x32xbf16> to vector<2x32xbf16>
    %239 = vector.shape_cast %235 : vector<2x32xbf16> to vector<1x2x32xbf16>
    tpu.vector_store %arg6[%236, %c0_70, %c0_71], %239 {strides = array<i32>} : memref<8x2x64xbf16, #tpu.memory_space<vmem>>, vector<1x2x32xbf16>,
    %240 = arith.truncf %234 : vector<2x32xf32> to vector<2x32xbf16>
    %241 = arith.index_cast %170 : i32 to index
    %c0_72 = arith.constant 0 : index
    %c32_73 = arith.constant 32 : index
    %242 = vector.load %arg6[%241, %c0_72, %c32_73] : memref<8x2x64xbf16, #tpu.memory_space<vmem>>, vector<1x2x32xbf16>
    %243 = vector.shape_cast %242 : vector<1x2x32xbf16> to vector<2x32xbf16>
    %244 = vector.shape_cast %240 : vector<2x32xbf16> to vector<1x2x32xbf16>
    tpu.vector_store %arg6[%241, %c0_72, %c32_73], %244 {strides = array<i32>} : memref<8x2x64xbf16, #tpu.memory_space<vmem>>, vector<1x2x32xbf16>,
    %c3_i32 = arith.constant 3 : i32
    %c7_i32_74 = arith.constant 7 : i32
    %245 = arith.subi %c7_i32_74, %c3_i32 : i32
    %246 = arith.index_cast %c3_i32 : i32 to index
    %c0_75 = arith.constant 0 : index
    %c0_76 = arith.constant 0 : index
    %247 = vector.load %arg8[%246, %c0_75, %c0_76] : memref<8x2x256xf32, #tpu.memory_space<vmem>>, vector<1x2x256xf32>
    %248 = vector.shape_cast %247 : vector<1x2x256xf32> to vector<2x256xf32>
    %249 = vector.extract_strided_slice %248 {offsets = [0, 0], sizes = [2, 128], strides = [1, 1]} : vector<2x256xf32> to vector<2x128xf32>
    %250 = arith.index_cast %245 : i32 to index
    %c0_77 = arith.constant 0 : index
    %c0_78 = arith.constant 0 : index
    %251 = vector.load %arg8[%250, %c0_77, %c0_78] : memref<8x2x256xf32, #tpu.memory_space<vmem>>, vector<1x2x256xf32>
    %252 = vector.shape_cast %251 : vector<1x2x256xf32> to vector<2x256xf32>
    %253 = vector.extract_strided_slice %252 {offsets = [0, 128], sizes = [2, 128], strides = [1, 1]} : vector<2x256xf32> to vector<2x128xf32>
    %254 = arith.truncf %209 : vector<2x32xf32> to vector<2x32xbf16>
    %cst_79 = arith.constant dense<0.000000e+00> : vector<2x128xf32>
    %255 = tpu.matmul %254, %9, %cst_79 {dimension_numbers = #tpu.dot_dimension_numbers<[1], [0], [0], [1], [0, 0, 1, 1], [], []>} : vector<2x32xbf16>, vector<32x128xbf16>, vector<2x128xf32> -> vector<2x128xf32>
    %256 = arith.addf %249, %255 : vector<2x128xf32>
    %257 = arith.truncf %234 : vector<2x32xf32> to vector<2x32xbf16>
    %cst_80 = arith.constant dense<0.000000e+00> : vector<2x128xf32>
    %258 = tpu.matmul %257, %11, %cst_80 {dimension_numbers = #tpu.dot_dimension_numbers<[1], [0], [0], [1], [0, 0, 1, 1], [], []>} : vector<2x32xbf16>, vector<32x128xbf16>, vector<2x128xf32> -> vector<2x128xf32>
    %259 = arith.addf %253, %258 : vector<2x128xf32>
    %260 = vector.extract_strided_slice %256 {offsets = [0, 0], sizes = [2, 32], strides = [1, 1]} : vector<2x128xf32> to vector<2x32xf32>
    %261 = arith.negf %260 : vector<2x32xf32>
    %262 = math.exp %261 : vector<2x32xf32>
    %cst_81 = arith.constant 1.000000e+00 : f32
    %263 = vector.broadcast %cst_81 : f32 to vector<2x32xf32>
    %264 = arith.addf %263, %262 : vector<2x32xf32>
    %265 = arith.divf %263, %264 : vector<2x32xf32>
    %266 = vector.extract_strided_slice %256 {offsets = [0, 32], sizes = [2, 32], strides = [1, 1]} : vector<2x128xf32> to vector<2x32xf32>
    %267 = arith.negf %266 : vector<2x32xf32>
    %268 = math.exp %267 : vector<2x32xf32>
    %cst_82 = arith.constant 1.000000e+00 : f32
    %269 = vector.broadcast %cst_82 : f32 to vector<2x32xf32>
    %270 = arith.addf %269, %268 : vector<2x32xf32>
    %271 = arith.divf %269, %270 : vector<2x32xf32>
    %272 = vector.extract_strided_slice %256 {offsets = [0, 64], sizes = [2, 32], strides = [1, 1]} : vector<2x128xf32> to vector<2x32xf32>
    %273 = math.tanh %272 : vector<2x32xf32>
    %274 = vector.extract_strided_slice %256 {offsets = [0, 96], sizes = [2, 32], strides = [1, 1]} : vector<2x128xf32> to vector<2x32xf32>
    %275 = arith.negf %274 : vector<2x32xf32>
    %276 = math.exp %275 : vector<2x32xf32>
    %cst_83 = arith.constant 1.000000e+00 : f32
    %277 = vector.broadcast %cst_83 : f32 to vector<2x32xf32>
    %278 = arith.addf %277, %276 : vector<2x32xf32>
    %279 = arith.divf %277, %278 : vector<2x32xf32>
    %280 = arith.mulf %271, %207 : vector<2x32xf32>
    %281 = arith.mulf %265, %273 : vector<2x32xf32>
    %282 = arith.addf %280, %281 : vector<2x32xf32>
    %283 = math.tanh %282 : vector<2x32xf32>
    %284 = arith.mulf %279, %283 : vector<2x32xf32>
    %285 = vector.extract_strided_slice %259 {offsets = [0, 0], sizes = [2, 32], strides = [1, 1]} : vector<2x128xf32> to vector<2x32xf32>
    %286 = arith.negf %285 : vector<2x32xf32>
    %287 = math.exp %286 : vector<2x32xf32>
    %cst_84 = arith.constant 1.000000e+00 : f32
    %288 = vector.broadcast %cst_84 : f32 to vector<2x32xf32>
    %289 = arith.addf %288, %287 : vector<2x32xf32>
    %290 = arith.divf %288, %289 : vector<2x32xf32>
    %291 = vector.extract_strided_slice %259 {offsets = [0, 32], sizes = [2, 32], strides = [1, 1]} : vector<2x128xf32> to vector<2x32xf32>
    %292 = arith.negf %291 : vector<2x32xf32>
    %293 = math.exp %292 : vector<2x32xf32>
    %cst_85 = arith.constant 1.000000e+00 : f32
    %294 = vector.broadcast %cst_85 : f32 to vector<2x32xf32>
    %295 = arith.addf %294, %293 : vector<2x32xf32>
    %296 = arith.divf %294, %295 : vector<2x32xf32>
    %297 = vector.extract_strided_slice %259 {offsets = [0, 64], sizes = [2, 32], strides = [1, 1]} : vector<2x128xf32> to vector<2x32xf32>
    %298 = math.tanh %297 : vector<2x32xf32>
    %299 = vector.extract_strided_slice %259 {offsets = [0, 96], sizes = [2, 32], strides = [1, 1]} : vector<2x128xf32> to vector<2x32xf32>
    %300 = arith.negf %299 : vector<2x32xf32>
    %301 = math.exp %300 : vector<2x32xf32>
    %cst_86 = arith.constant 1.000000e+00 : f32
    %302 = vector.broadcast %cst_86 : f32 to vector<2x32xf32>
    %303 = arith.addf %302, %301 : vector<2x32xf32>
    %304 = arith.divf %302, %303 : vector<2x32xf32>
    %305 = arith.mulf %296, %232 : vector<2x32xf32>
    %306 = arith.mulf %290, %298 : vector<2x32xf32>
    %307 = arith.addf %305, %306 : vector<2x32xf32>
    %308 = math.tanh %307 : vector<2x32xf32>
    %309 = arith.mulf %304, %308 : vector<2x32xf32>
    %310 = arith.truncf %284 : vector<2x32xf32> to vector<2x32xbf16>
    %311 = arith.index_cast %c3_i32 : i32 to index
    %c0_87 = arith.constant 0 : index
    %c0_88 = arith.constant 0 : index
    %312 = vector.load %arg6[%311, %c0_87, %c0_88] : memref<8x2x64xbf16, #tpu.memory_space<vmem>>, vector<1x2x32xbf16>
    %313 = vector.shape_cast %312 : vector<1x2x32xbf16> to vector<2x32xbf16>
    %314 = vector.shape_cast %310 : vector<2x32xbf16> to vector<1x2x32xbf16>
    tpu.vector_store %arg6[%311, %c0_87, %c0_88], %314 {strides = array<i32>} : memref<8x2x64xbf16, #tpu.memory_space<vmem>>, vector<1x2x32xbf16>,
    %315 = arith.truncf %309 : vector<2x32xf32> to vector<2x32xbf16>
    %316 = arith.index_cast %245 : i32 to index
    %c0_89 = arith.constant 0 : index
    %c32_90 = arith.constant 32 : index
    %317 = vector.load %arg6[%316, %c0_89, %c32_90] : memref<8x2x64xbf16, #tpu.memory_space<vmem>>, vector<1x2x32xbf16>
    %318 = vector.shape_cast %317 : vector<1x2x32xbf16> to vector<2x32xbf16>
    %319 = vector.shape_cast %315 : vector<2x32xbf16> to vector<1x2x32xbf16>
    tpu.vector_store %arg6[%316, %c0_89, %c32_90], %319 {strides = array<i32>} : memref<8x2x64xbf16, #tpu.memory_space<vmem>>, vector<1x2x32xbf16>,
    %c4_i32 = arith.constant 4 : i32
    %c7_i32_91 = arith.constant 7 : i32
    %320 = arith.subi %c7_i32_91, %c4_i32 : i32
    %321 = arith.index_cast %c4_i32 : i32 to index
    %c0_92 = arith.constant 0 : index
    %c0_93 = arith.constant 0 : index
    %322 = vector.load %arg8[%321, %c0_92, %c0_93] : memref<8x2x256xf32, #tpu.memory_space<vmem>>, vector<1x2x256xf32>
    %323 = vector.shape_cast %322 : vector<1x2x256xf32> to vector<2x256xf32>
    %324 = vector.extract_strided_slice %323 {offsets = [0, 0], sizes = [2, 128], strides = [1, 1]} : vector<2x256xf32> to vector<2x128xf32>
    %325 = arith.index_cast %320 : i32 to index
    %c0_94 = arith.constant 0 : index
    %c0_95 = arith.constant 0 : index
    %326 = vector.load %arg8[%325, %c0_94, %c0_95] : memref<8x2x256xf32, #tpu.memory_space<vmem>>, vector<1x2x256xf32>
    %327 = vector.shape_cast %326 : vector<1x2x256xf32> to vector<2x256xf32>
    %328 = vector.extract_strided_slice %327 {offsets = [0, 128], sizes = [2, 128], strides = [1, 1]} : vector<2x256xf32> to vector<2x128xf32>
    %329 = arith.truncf %284 : vector<2x32xf32> to vector<2x32xbf16>
    %cst_96 = arith.constant dense<0.000000e+00> : vector<2x128xf32>
    %330 = tpu.matmul %329, %9, %cst_96 {dimension_numbers = #tpu.dot_dimension_numbers<[1], [0], [0], [1], [0, 0, 1, 1], [], []>} : vector<2x32xbf16>, vector<32x128xbf16>, vector<2x128xf32> -> vector<2x128xf32>
    %331 = arith.addf %324, %330 : vector<2x128xf32>
    %332 = arith.truncf %309 : vector<2x32xf32> to vector<2x32xbf16>
    %cst_97 = arith.constant dense<0.000000e+00> : vector<2x128xf32>
    %333 = tpu.matmul %332, %11, %cst_97 {dimension_numbers = #tpu.dot_dimension_numbers<[1], [0], [0], [1], [0, 0, 1, 1], [], []>} : vector<2x32xbf16>, vector<32x128xbf16>, vector<2x128xf32> -> vector<2x128xf32>
    %334 = arith.addf %328, %333 : vector<2x128xf32>
    %335 = vector.extract_strided_slice %331 {offsets = [0, 0], sizes = [2, 32], strides = [1, 1]} : vector<2x128xf32> to vector<2x32xf32>
    %336 = arith.negf %335 : vector<2x32xf32>
    %337 = math.exp %336 : vector<2x32xf32>
    %cst_98 = arith.constant 1.000000e+00 : f32
    %338 = vector.broadcast %cst_98 : f32 to vector<2x32xf32>
    %339 = arith.addf %338, %337 : vector<2x32xf32>
    %340 = arith.divf %338, %339 : vector<2x32xf32>
    %341 = vector.extract_strided_slice %331 {offsets = [0, 32], sizes = [2, 32], strides = [1, 1]} : vector<2x128xf32> to vector<2x32xf32>
    %342 = arith.negf %341 : vector<2x32xf32>
    %343 = math.exp %342 : vector<2x32xf32>
    %cst_99 = arith.constant 1.000000e+00 : f32
    %344 = vector.broadcast %cst_99 : f32 to vector<2x32xf32>
    %345 = arith.addf %344, %343 : vector<2x32xf32>
    %346 = arith.divf %344, %345 : vector<2x32xf32>
    %347 = vector.extract_strided_slice %331 {offsets = [0, 64], sizes = [2, 32], strides = [1, 1]} : vector<2x128xf32> to vector<2x32xf32>
    %348 = math.tanh %347 : vector<2x32xf32>
    %349 = vector.extract_strided_slice %331 {offsets = [0, 96], sizes = [2, 32], strides = [1, 1]} : vector<2x128xf32> to vector<2x32xf32>
    %350 = arith.negf %349 : vector<2x32xf32>
    %351 = math.exp %350 : vector<2x32xf32>
    %cst_100 = arith.constant 1.000000e+00 : f32
    %352 = vector.broadcast %cst_100 : f32 to vector<2x32xf32>
    %353 = arith.addf %352, %351 : vector<2x32xf32>
    %354 = arith.divf %352, %353 : vector<2x32xf32>
    %355 = arith.mulf %346, %282 : vector<2x32xf32>
    %356 = arith.mulf %340, %348 : vector<2x32xf32>
    %357 = arith.addf %355, %356 : vector<2x32xf32>
    %358 = math.tanh %357 : vector<2x32xf32>
    %359 = arith.mulf %354, %358 : vector<2x32xf32>
    %360 = vector.extract_strided_slice %334 {offsets = [0, 0], sizes = [2, 32], strides = [1, 1]} : vector<2x128xf32> to vector<2x32xf32>
    %361 = arith.negf %360 : vector<2x32xf32>
    %362 = math.exp %361 : vector<2x32xf32>
    %cst_101 = arith.constant 1.000000e+00 : f32
    %363 = vector.broadcast %cst_101 : f32 to vector<2x32xf32>
    %364 = arith.addf %363, %362 : vector<2x32xf32>
    %365 = arith.divf %363, %364 : vector<2x32xf32>
    %366 = vector.extract_strided_slice %334 {offsets = [0, 32], sizes = [2, 32], strides = [1, 1]} : vector<2x128xf32> to vector<2x32xf32>
    %367 = arith.negf %366 : vector<2x32xf32>
    %368 = math.exp %367 : vector<2x32xf32>
    %cst_102 = arith.constant 1.000000e+00 : f32
    %369 = vector.broadcast %cst_102 : f32 to vector<2x32xf32>
    %370 = arith.addf %369, %368 : vector<2x32xf32>
    %371 = arith.divf %369, %370 : vector<2x32xf32>
    %372 = vector.extract_strided_slice %334 {offsets = [0, 64], sizes = [2, 32], strides = [1, 1]} : vector<2x128xf32> to vector<2x32xf32>
    %373 = math.tanh %372 : vector<2x32xf32>
    %374 = vector.extract_strided_slice %334 {offsets = [0, 96], sizes = [2, 32], strides = [1, 1]} : vector<2x128xf32> to vector<2x32xf32>
    %375 = arith.negf %374 : vector<2x32xf32>
    %376 = math.exp %375 : vector<2x32xf32>
    %cst_103 = arith.constant 1.000000e+00 : f32
    %377 = vector.broadcast %cst_103 : f32 to vector<2x32xf32>
    %378 = arith.addf %377, %376 : vector<2x32xf32>
    %379 = arith.divf %377, %378 : vector<2x32xf32>
    %380 = arith.mulf %371, %307 : vector<2x32xf32>
    %381 = arith.mulf %365, %373 : vector<2x32xf32>
    %382 = arith.addf %380, %381 : vector<2x32xf32>
    %383 = math.tanh %382 : vector<2x32xf32>
    %384 = arith.mulf %379, %383 : vector<2x32xf32>
    %385 = arith.truncf %359 : vector<2x32xf32> to vector<2x32xbf16>
    %386 = arith.index_cast %c4_i32 : i32 to index
    %c0_104 = arith.constant 0 : index
    %c0_105 = arith.constant 0 : index
    %387 = vector.load %arg6[%386, %c0_104, %c0_105] : memref<8x2x64xbf16, #tpu.memory_space<vmem>>, vector<1x2x32xbf16>
    %388 = vector.shape_cast %387 : vector<1x2x32xbf16> to vector<2x32xbf16>
    %389 = vector.shape_cast %385 : vector<2x32xbf16> to vector<1x2x32xbf16>
    tpu.vector_store %arg6[%386, %c0_104, %c0_105], %389 {strides = array<i32>} : memref<8x2x64xbf16, #tpu.memory_space<vmem>>, vector<1x2x32xbf16>,
    %390 = arith.truncf %384 : vector<2x32xf32> to vector<2x32xbf16>
    %391 = arith.index_cast %320 : i32 to index
    %c0_106 = arith.constant 0 : index
    %c32_107 = arith.constant 32 : index
    %392 = vector.load %arg6[%391, %c0_106, %c32_107] : memref<8x2x64xbf16, #tpu.memory_space<vmem>>, vector<1x2x32xbf16>
    %393 = vector.shape_cast %392 : vector<1x2x32xbf16> to vector<2x32xbf16>
    %394 = vector.shape_cast %390 : vector<2x32xbf16> to vector<1x2x32xbf16>
    tpu.vector_store %arg6[%391, %c0_106, %c32_107], %394 {strides = array<i32>} : memref<8x2x64xbf16, #tpu.memory_space<vmem>>, vector<1x2x32xbf16>,
    %c5_i32 = arith.constant 5 : i32
    %c7_i32_108 = arith.constant 7 : i32
    %395 = arith.subi %c7_i32_108, %c5_i32 : i32
    %396 = arith.index_cast %c5_i32 : i32 to index
    %c0_109 = arith.constant 0 : index
    %c0_110 = arith.constant 0 : index
    %397 = vector.load %arg8[%396, %c0_109, %c0_110] : memref<8x2x256xf32, #tpu.memory_space<vmem>>, vector<1x2x256xf32>
    %398 = vector.shape_cast %397 : vector<1x2x256xf32> to vector<2x256xf32>
    %399 = vector.extract_strided_slice %398 {offsets = [0, 0], sizes = [2, 128], strides = [1, 1]} : vector<2x256xf32> to vector<2x128xf32>
    %400 = arith.index_cast %395 : i32 to index
    %c0_111 = arith.constant 0 : index
    %c0_112 = arith.constant 0 : index
    %401 = vector.load %arg8[%400, %c0_111, %c0_112] : memref<8x2x256xf32, #tpu.memory_space<vmem>>, vector<1x2x256xf32>
    %402 = vector.shape_cast %401 : vector<1x2x256xf32> to vector<2x256xf32>
    %403 = vector.extract_strided_slice %402 {offsets = [0, 128], sizes = [2, 128], strides = [1, 1]} : vector<2x256xf32> to vector<2x128xf32>
    %404 = arith.truncf %359 : vector<2x32xf32> to vector<2x32xbf16>
    %cst_113 = arith.constant dense<0.000000e+00> : vector<2x128xf32>
    %405 = tpu.matmul %404, %9, %cst_113 {dimension_numbers = #tpu.dot_dimension_numbers<[1], [0], [0], [1], [0, 0, 1, 1], [], []>} : vector<2x32xbf16>, vector<32x128xbf16>, vector<2x128xf32> -> vector<2x128xf32>
    %406 = arith.addf %399, %405 : vector<2x128xf32>
    %407 = arith.truncf %384 : vector<2x32xf32> to vector<2x32xbf16>
    %cst_114 = arith.constant dense<0.000000e+00> : vector<2x128xf32>
    %408 = tpu.matmul %407, %11, %cst_114 {dimension_numbers = #tpu.dot_dimension_numbers<[1], [0], [0], [1], [0, 0, 1, 1], [], []>} : vector<2x32xbf16>, vector<32x128xbf16>, vector<2x128xf32> -> vector<2x128xf32>
    %409 = arith.addf %403, %408 : vector<2x128xf32>
    %410 = vector.extract_strided_slice %406 {offsets = [0, 0], sizes = [2, 32], strides = [1, 1]} : vector<2x128xf32> to vector<2x32xf32>
    %411 = arith.negf %410 : vector<2x32xf32>
    %412 = math.exp %411 : vector<2x32xf32>
    %cst_115 = arith.constant 1.000000e+00 : f32
    %413 = vector.broadcast %cst_115 : f32 to vector<2x32xf32>
    %414 = arith.addf %413, %412 : vector<2x32xf32>
    %415 = arith.divf %413, %414 : vector<2x32xf32>
    %416 = vector.extract_strided_slice %406 {offsets = [0, 32], sizes = [2, 32], strides = [1, 1]} : vector<2x128xf32> to vector<2x32xf32>
    %417 = arith.negf %416 : vector<2x32xf32>
    %418 = math.exp %417 : vector<2x32xf32>
    %cst_116 = arith.constant 1.000000e+00 : f32
    %419 = vector.broadcast %cst_116 : f32 to vector<2x32xf32>
    %420 = arith.addf %419, %418 : vector<2x32xf32>
    %421 = arith.divf %419, %420 : vector<2x32xf32>
    %422 = vector.extract_strided_slice %406 {offsets = [0, 64], sizes = [2, 32], strides = [1, 1]} : vector<2x128xf32> to vector<2x32xf32>
    %423 = math.tanh %422 : vector<2x32xf32>
    %424 = vector.extract_strided_slice %406 {offsets = [0, 96], sizes = [2, 32], strides = [1, 1]} : vector<2x128xf32> to vector<2x32xf32>
    %425 = arith.negf %424 : vector<2x32xf32>
    %426 = math.exp %425 : vector<2x32xf32>
    %cst_117 = arith.constant 1.000000e+00 : f32
    %427 = vector.broadcast %cst_117 : f32 to vector<2x32xf32>
    %428 = arith.addf %427, %426 : vector<2x32xf32>
    %429 = arith.divf %427, %428 : vector<2x32xf32>
    %430 = arith.mulf %421, %357 : vector<2x32xf32>
    %431 = arith.mulf %415, %423 : vector<2x32xf32>
    %432 = arith.addf %430, %431 : vector<2x32xf32>
    %433 = math.tanh %432 : vector<2x32xf32>
    %434 = arith.mulf %429, %433 : vector<2x32xf32>
    %435 = vector.extract_strided_slice %409 {offsets = [0, 0], sizes = [2, 32], strides = [1, 1]} : vector<2x128xf32> to vector<2x32xf32>
    %436 = arith.negf %435 : vector<2x32xf32>
    %437 = math.exp %436 : vector<2x32xf32>
    %cst_118 = arith.constant 1.000000e+00 : f32
    %438 = vector.broadcast %cst_118 : f32 to vector<2x32xf32>
    %439 = arith.addf %438, %437 : vector<2x32xf32>
    %440 = arith.divf %438, %439 : vector<2x32xf32>
    %441 = vector.extract_strided_slice %409 {offsets = [0, 32], sizes = [2, 32], strides = [1, 1]} : vector<2x128xf32> to vector<2x32xf32>
    %442 = arith.negf %441 : vector<2x32xf32>
    %443 = math.exp %442 : vector<2x32xf32>
    %cst_119 = arith.constant 1.000000e+00 : f32
    %444 = vector.broadcast %cst_119 : f32 to vector<2x32xf32>
    %445 = arith.addf %444, %443 : vector<2x32xf32>
    %446 = arith.divf %444, %445 : vector<2x32xf32>
    %447 = vector.extract_strided_slice %409 {offsets = [0, 64], sizes = [2, 32], strides = [1, 1]} : vector<2x128xf32> to vector<2x32xf32>
    %448 = math.tanh %447 : vector<2x32xf32>
    %449 = vector.extract_strided_slice %409 {offsets = [0, 96], sizes = [2, 32], strides = [1, 1]} : vector<2x128xf32> to vector<2x32xf32>
    %450 = arith.negf %449 : vector<2x32xf32>
    %451 = math.exp %450 : vector<2x32xf32>
    %cst_120 = arith.constant 1.000000e+00 : f32
    %452 = vector.broadcast %cst_120 : f32 to vector<2x32xf32>
    %453 = arith.addf %452, %451 : vector<2x32xf32>
    %454 = arith.divf %452, %453 : vector<2x32xf32>
    %455 = arith.mulf %446, %382 : vector<2x32xf32>
    %456 = arith.mulf %440, %448 : vector<2x32xf32>
    %457 = arith.addf %455, %456 : vector<2x32xf32>
    %458 = math.tanh %457 : vector<2x32xf32>
    %459 = arith.mulf %454, %458 : vector<2x32xf32>
    %460 = arith.truncf %434 : vector<2x32xf32> to vector<2x32xbf16>
    %461 = arith.index_cast %c5_i32 : i32 to index
    %c0_121 = arith.constant 0 : index
    %c0_122 = arith.constant 0 : index
    %462 = vector.load %arg6[%461, %c0_121, %c0_122] : memref<8x2x64xbf16, #tpu.memory_space<vmem>>, vector<1x2x32xbf16>
    %463 = vector.shape_cast %462 : vector<1x2x32xbf16> to vector<2x32xbf16>
    %464 = vector.shape_cast %460 : vector<2x32xbf16> to vector<1x2x32xbf16>
    tpu.vector_store %arg6[%461, %c0_121, %c0_122], %464 {strides = array<i32>} : memref<8x2x64xbf16, #tpu.memory_space<vmem>>, vector<1x2x32xbf16>,
    %465 = arith.truncf %459 : vector<2x32xf32> to vector<2x32xbf16>
    %466 = arith.index_cast %395 : i32 to index
    %c0_123 = arith.constant 0 : index
    %c32_124 = arith.constant 32 : index
    %467 = vector.load %arg6[%466, %c0_123, %c32_124] : memref<8x2x64xbf16, #tpu.memory_space<vmem>>, vector<1x2x32xbf16>
    %468 = vector.shape_cast %467 : vector<1x2x32xbf16> to vector<2x32xbf16>
    %469 = vector.shape_cast %465 : vector<2x32xbf16> to vector<1x2x32xbf16>
    tpu.vector_store %arg6[%466, %c0_123, %c32_124], %469 {strides = array<i32>} : memref<8x2x64xbf16, #tpu.memory_space<vmem>>, vector<1x2x32xbf16>,
    %c6_i32 = arith.constant 6 : i32
    %c7_i32_125 = arith.constant 7 : i32
    %470 = arith.subi %c7_i32_125, %c6_i32 : i32
    %471 = arith.index_cast %c6_i32 : i32 to index
    %c0_126 = arith.constant 0 : index
    %c0_127 = arith.constant 0 : index
    %472 = vector.load %arg8[%471, %c0_126, %c0_127] : memref<8x2x256xf32, #tpu.memory_space<vmem>>, vector<1x2x256xf32>
    %473 = vector.shape_cast %472 : vector<1x2x256xf32> to vector<2x256xf32>
    %474 = vector.extract_strided_slice %473 {offsets = [0, 0], sizes = [2, 128], strides = [1, 1]} : vector<2x256xf32> to vector<2x128xf32>
    %475 = arith.index_cast %470 : i32 to index
    %c0_128 = arith.constant 0 : index
    %c0_129 = arith.constant 0 : index
    %476 = vector.load %arg8[%475, %c0_128, %c0_129] : memref<8x2x256xf32, #tpu.memory_space<vmem>>, vector<1x2x256xf32>
    %477 = vector.shape_cast %476 : vector<1x2x256xf32> to vector<2x256xf32>
    %478 = vector.extract_strided_slice %477 {offsets = [0, 128], sizes = [2, 128], strides = [1, 1]} : vector<2x256xf32> to vector<2x128xf32>
    %479 = arith.truncf %434 : vector<2x32xf32> to vector<2x32xbf16>
    %cst_130 = arith.constant dense<0.000000e+00> : vector<2x128xf32>
    %480 = tpu.matmul %479, %9, %cst_130 {dimension_numbers = #tpu.dot_dimension_numbers<[1], [0], [0], [1], [0, 0, 1, 1], [], []>} : vector<2x32xbf16>, vector<32x128xbf16>, vector<2x128xf32> -> vector<2x128xf32>
    %481 = arith.addf %474, %480 : vector<2x128xf32>
    %482 = arith.truncf %459 : vector<2x32xf32> to vector<2x32xbf16>
    %cst_131 = arith.constant dense<0.000000e+00> : vector<2x128xf32>
    %483 = tpu.matmul %482, %11, %cst_131 {dimension_numbers = #tpu.dot_dimension_numbers<[1], [0], [0], [1], [0, 0, 1, 1], [], []>} : vector<2x32xbf16>, vector<32x128xbf16>, vector<2x128xf32> -> vector<2x128xf32>
    %484 = arith.addf %478, %483 : vector<2x128xf32>
    %485 = vector.extract_strided_slice %481 {offsets = [0, 0], sizes = [2, 32], strides = [1, 1]} : vector<2x128xf32> to vector<2x32xf32>
    %486 = arith.negf %485 : vector<2x32xf32>
    %487 = math.exp %486 : vector<2x32xf32>
    %cst_132 = arith.constant 1.000000e+00 : f32
    %488 = vector.broadcast %cst_132 : f32 to vector<2x32xf32>
    %489 = arith.addf %488, %487 : vector<2x32xf32>
    %490 = arith.divf %488, %489 : vector<2x32xf32>
    %491 = vector.extract_strided_slice %481 {offsets = [0, 32], sizes = [2, 32], strides = [1, 1]} : vector<2x128xf32> to vector<2x32xf32>
    %492 = arith.negf %491 : vector<2x32xf32>
    %493 = math.exp %492 : vector<2x32xf32>
    %cst_133 = arith.constant 1.000000e+00 : f32
    %494 = vector.broadcast %cst_133 : f32 to vector<2x32xf32>
    %495 = arith.addf %494, %493 : vector<2x32xf32>
    %496 = arith.divf %494, %495 : vector<2x32xf32>
    %497 = vector.extract_strided_slice %481 {offsets = [0, 64], sizes = [2, 32], strides = [1, 1]} : vector<2x128xf32> to vector<2x32xf32>
    %498 = math.tanh %497 : vector<2x32xf32>
    %499 = vector.extract_strided_slice %481 {offsets = [0, 96], sizes = [2, 32], strides = [1, 1]} : vector<2x128xf32> to vector<2x32xf32>
    %500 = arith.negf %499 : vector<2x32xf32>
    %501 = math.exp %500 : vector<2x32xf32>
    %cst_134 = arith.constant 1.000000e+00 : f32
    %502 = vector.broadcast %cst_134 : f32 to vector<2x32xf32>
    %503 = arith.addf %502, %501 : vector<2x32xf32>
    %504 = arith.divf %502, %503 : vector<2x32xf32>
    %505 = arith.mulf %496, %432 : vector<2x32xf32>
    %506 = arith.mulf %490, %498 : vector<2x32xf32>
    %507 = arith.addf %505, %506 : vector<2x32xf32>
    %508 = math.tanh %507 : vector<2x32xf32>
    %509 = arith.mulf %504, %508 : vector<2x32xf32>
    %510 = vector.extract_strided_slice %484 {offsets = [0, 0], sizes = [2, 32], strides = [1, 1]} : vector<2x128xf32> to vector<2x32xf32>
    %511 = arith.negf %510 : vector<2x32xf32>
    %512 = math.exp %511 : vector<2x32xf32>
    %cst_135 = arith.constant 1.000000e+00 : f32
    %513 = vector.broadcast %cst_135 : f32 to vector<2x32xf32>
    %514 = arith.addf %513, %512 : vector<2x32xf32>
    %515 = arith.divf %513, %514 : vector<2x32xf32>
    %516 = vector.extract_strided_slice %484 {offsets = [0, 32], sizes = [2, 32], strides = [1, 1]} : vector<2x128xf32> to vector<2x32xf32>
    %517 = arith.negf %516 : vector<2x32xf32>
    %518 = math.exp %517 : vector<2x32xf32>
    %cst_136 = arith.constant 1.000000e+00 : f32
    %519 = vector.broadcast %cst_136 : f32 to vector<2x32xf32>
    %520 = arith.addf %519, %518 : vector<2x32xf32>
    %521 = arith.divf %519, %520 : vector<2x32xf32>
    %522 = vector.extract_strided_slice %484 {offsets = [0, 64], sizes = [2, 32], strides = [1, 1]} : vector<2x128xf32> to vector<2x32xf32>
    %523 = math.tanh %522 : vector<2x32xf32>
    %524 = vector.extract_strided_slice %484 {offsets = [0, 96], sizes = [2, 32], strides = [1, 1]} : vector<2x128xf32> to vector<2x32xf32>
    %525 = arith.negf %524 : vector<2x32xf32>
    %526 = math.exp %525 : vector<2x32xf32>
    %cst_137 = arith.constant 1.000000e+00 : f32
    %527 = vector.broadcast %cst_137 : f32 to vector<2x32xf32>
    %528 = arith.addf %527, %526 : vector<2x32xf32>
    %529 = arith.divf %527, %528 : vector<2x32xf32>
    %530 = arith.mulf %521, %457 : vector<2x32xf32>
    %531 = arith.mulf %515, %523 : vector<2x32xf32>
    %532 = arith.addf %530, %531 : vector<2x32xf32>
    %533 = math.tanh %532 : vector<2x32xf32>
    %534 = arith.mulf %529, %533 : vector<2x32xf32>
    %535 = arith.truncf %509 : vector<2x32xf32> to vector<2x32xbf16>
    %536 = arith.index_cast %c6_i32 : i32 to index
    %c0_138 = arith.constant 0 : index
    %c0_139 = arith.constant 0 : index
    %537 = vector.load %arg6[%536, %c0_138, %c0_139] : memref<8x2x64xbf16, #tpu.memory_space<vmem>>, vector<1x2x32xbf16>
    %538 = vector.shape_cast %537 : vector<1x2x32xbf16> to vector<2x32xbf16>
    %539 = vector.shape_cast %535 : vector<2x32xbf16> to vector<1x2x32xbf16>
    tpu.vector_store %arg6[%536, %c0_138, %c0_139], %539 {strides = array<i32>} : memref<8x2x64xbf16, #tpu.memory_space<vmem>>, vector<1x2x32xbf16>,
    %540 = arith.truncf %534 : vector<2x32xf32> to vector<2x32xbf16>
    %541 = arith.index_cast %470 : i32 to index
    %c0_140 = arith.constant 0 : index
    %c32_141 = arith.constant 32 : index
    %542 = vector.load %arg6[%541, %c0_140, %c32_141] : memref<8x2x64xbf16, #tpu.memory_space<vmem>>, vector<1x2x32xbf16>
    %543 = vector.shape_cast %542 : vector<1x2x32xbf16> to vector<2x32xbf16>
    %544 = vector.shape_cast %540 : vector<2x32xbf16> to vector<1x2x32xbf16>
    tpu.vector_store %arg6[%541, %c0_140, %c32_141], %544 {strides = array<i32>} : memref<8x2x64xbf16, #tpu.memory_space<vmem>>, vector<1x2x32xbf16>,
    %c7_i32_142 = arith.constant 7 : i32
    %c7_i32_143 = arith.constant 7 : i32
    %545 = arith.subi %c7_i32_143, %c7_i32_142 : i32
    %546 = arith.index_cast %c7_i32_142 : i32 to index
    %c0_144 = arith.constant 0 : index
    %c0_145 = arith.constant 0 : index
    %547 = vector.load %arg8[%546, %c0_144, %c0_145] : memref<8x2x256xf32, #tpu.memory_space<vmem>>, vector<1x2x256xf32>
    %548 = vector.shape_cast %547 : vector<1x2x256xf32> to vector<2x256xf32>
    %549 = vector.extract_strided_slice %548 {offsets = [0, 0], sizes = [2, 128], strides = [1, 1]} : vector<2x256xf32> to vector<2x128xf32>
    %550 = arith.index_cast %545 : i32 to index
    %c0_146 = arith.constant 0 : index
    %c0_147 = arith.constant 0 : index
    %551 = vector.load %arg8[%550, %c0_146, %c0_147] : memref<8x2x256xf32, #tpu.memory_space<vmem>>, vector<1x2x256xf32>
    %552 = vector.shape_cast %551 : vector<1x2x256xf32> to vector<2x256xf32>
    %553 = vector.extract_strided_slice %552 {offsets = [0, 128], sizes = [2, 128], strides = [1, 1]} : vector<2x256xf32> to vector<2x128xf32>
    %554 = arith.truncf %509 : vector<2x32xf32> to vector<2x32xbf16>
    %cst_148 = arith.constant dense<0.000000e+00> : vector<2x128xf32>
    %555 = tpu.matmul %554, %9, %cst_148 {dimension_numbers = #tpu.dot_dimension_numbers<[1], [0], [0], [1], [0, 0, 1, 1], [], []>} : vector<2x32xbf16>, vector<32x128xbf16>, vector<2x128xf32> -> vector<2x128xf32>
    %556 = arith.addf %549, %555 : vector<2x128xf32>
    %557 = arith.truncf %534 : vector<2x32xf32> to vector<2x32xbf16>
    %cst_149 = arith.constant dense<0.000000e+00> : vector<2x128xf32>
    %558 = tpu.matmul %557, %11, %cst_149 {dimension_numbers = #tpu.dot_dimension_numbers<[1], [0], [0], [1], [0, 0, 1, 1], [], []>} : vector<2x32xbf16>, vector<32x128xbf16>, vector<2x128xf32> -> vector<2x128xf32>
    %559 = arith.addf %553, %558 : vector<2x128xf32>
    %560 = vector.extract_strided_slice %556 {offsets = [0, 0], sizes = [2, 32], strides = [1, 1]} : vector<2x128xf32> to vector<2x32xf32>
    %561 = arith.negf %560 : vector<2x32xf32>
    %562 = math.exp %561 : vector<2x32xf32>
    %cst_150 = arith.constant 1.000000e+00 : f32
    %563 = vector.broadcast %cst_150 : f32 to vector<2x32xf32>
    %564 = arith.addf %563, %562 : vector<2x32xf32>
    %565 = arith.divf %563, %564 : vector<2x32xf32>
    %566 = vector.extract_strided_slice %556 {offsets = [0, 32], sizes = [2, 32], strides = [1, 1]} : vector<2x128xf32> to vector<2x32xf32>
    %567 = arith.negf %566 : vector<2x32xf32>
    %568 = math.exp %567 : vector<2x32xf32>
    %cst_151 = arith.constant 1.000000e+00 : f32
    %569 = vector.broadcast %cst_151 : f32 to vector<2x32xf32>
    %570 = arith.addf %569, %568 : vector<2x32xf32>
    %571 = arith.divf %569, %570 : vector<2x32xf32>
    %572 = vector.extract_strided_slice %556 {offsets = [0, 64], sizes = [2, 32], strides = [1, 1]} : vector<2x128xf32> to vector<2x32xf32>
    %573 = math.tanh %572 : vector<2x32xf32>
    %574 = vector.extract_strided_slice %556 {offsets = [0, 96], sizes = [2, 32], strides = [1, 1]} : vector<2x128xf32> to vector<2x32xf32>
    %575 = arith.negf %574 : vector<2x32xf32>
    %576 = math.exp %575 : vector<2x32xf32>
    %cst_152 = arith.constant 1.000000e+00 : f32
    %577 = vector.broadcast %cst_152 : f32 to vector<2x32xf32>
    %578 = arith.addf %577, %576 : vector<2x32xf32>
    %579 = arith.divf %577, %578 : vector<2x32xf32>
    %580 = arith.mulf %571, %507 : vector<2x32xf32>
    %581 = arith.mulf %565, %573 : vector<2x32xf32>
    %582 = arith.addf %580, %581 : vector<2x32xf32>
    %583 = math.tanh %582 : vector<2x32xf32>
    %584 = arith.mulf %579, %583 : vector<2x32xf32>
    %585 = vector.extract_strided_slice %559 {offsets = [0, 0], sizes = [2, 32], strides = [1, 1]} : vector<2x128xf32> to vector<2x32xf32>
    %586 = arith.negf %585 : vector<2x32xf32>
    %587 = math.exp %586 : vector<2x32xf32>
    %cst_153 = arith.constant 1.000000e+00 : f32
    %588 = vector.broadcast %cst_153 : f32 to vector<2x32xf32>
    %589 = arith.addf %588, %587 : vector<2x32xf32>
    %590 = arith.divf %588, %589 : vector<2x32xf32>
    %591 = vector.extract_strided_slice %559 {offsets = [0, 32], sizes = [2, 32], strides = [1, 1]} : vector<2x128xf32> to vector<2x32xf32>
    %592 = arith.negf %591 : vector<2x32xf32>
    %593 = math.exp %592 : vector<2x32xf32>
    %cst_154 = arith.constant 1.000000e+00 : f32
    %594 = vector.broadcast %cst_154 : f32 to vector<2x32xf32>
    %595 = arith.addf %594, %593 : vector<2x32xf32>
    %596 = arith.divf %594, %595 : vector<2x32xf32>
    %597 = vector.extract_strided_slice %559 {offsets = [0, 64], sizes = [2, 32], strides = [1, 1]} : vector<2x128xf32> to vector<2x32xf32>
    %598 = math.tanh %597 : vector<2x32xf32>
    %599 = vector.extract_strided_slice %559 {offsets = [0, 96], sizes = [2, 32], strides = [1, 1]} : vector<2x128xf32> to vector<2x32xf32>
    %600 = arith.negf %599 : vector<2x32xf32>
    %601 = math.exp %600 : vector<2x32xf32>
    %cst_155 = arith.constant 1.000000e+00 : f32
    %602 = vector.broadcast %cst_155 : f32 to vector<2x32xf32>
    %603 = arith.addf %602, %601 : vector<2x32xf32>
    %604 = arith.divf %602, %603 : vector<2x32xf32>
    %605 = arith.mulf %596, %532 : vector<2x32xf32>
    %606 = arith.mulf %590, %598 : vector<2x32xf32>
    %607 = arith.addf %605, %606 : vector<2x32xf32>
    %608 = math.tanh %607 : vector<2x32xf32>
    %609 = arith.mulf %604, %608 : vector<2x32xf32>
    %610 = arith.truncf %584 : vector<2x32xf32> to vector<2x32xbf16>
    %611 = arith.index_cast %c7_i32_142 : i32 to index
    %c0_156 = arith.constant 0 : index
    %c0_157 = arith.constant 0 : index
    %612 = vector.load %arg6[%611, %c0_156, %c0_157] : memref<8x2x64xbf16, #tpu.memory_space<vmem>>, vector<1x2x32xbf16>
    %613 = vector.shape_cast %612 : vector<1x2x32xbf16> to vector<2x32xbf16>
    %614 = vector.shape_cast %610 : vector<2x32xbf16> to vector<1x2x32xbf16>
    tpu.vector_store %arg6[%611, %c0_156, %c0_157], %614 {strides = array<i32>} : memref<8x2x64xbf16, #tpu.memory_space<vmem>>, vector<1x2x32xbf16>,
    %615 = arith.truncf %609 : vector<2x32xf32> to vector<2x32xbf16>
    %616 = arith.index_cast %545 : i32 to index
    %c0_158 = arith.constant 0 : index
    %c32_159 = arith.constant 32 : index
    %617 = vector.load %arg6[%616, %c0_158, %c32_159] : memref<8x2x64xbf16, #tpu.memory_space<vmem>>, vector<1x2x32xbf16>
    %618 = vector.shape_cast %617 : vector<1x2x32xbf16> to vector<2x32xbf16>
    %619 = vector.shape_cast %615 : vector<2x32xbf16> to vector<1x2x32xbf16>
    tpu.vector_store %arg6[%616, %c0_158, %c32_159], %619 {strides = array<i32>} : memref<8x2x64xbf16, #tpu.memory_space<vmem>>, vector<1x2x32xbf16>,
    %c8_i32 = arith.constant 8 : i32
    %c0_160 = arith.constant 0 : index
    %c0_161 = arith.constant 0 : index
    %620 = vector.load %arg7[%c0_160, %c0_161] : memref<2x64xf32, #tpu.memory_space<vmem>>, vector<2x32xf32>
    tpu.vector_store %arg7[%c0_160, %c0_161], %584 {strides = array<i32>} : memref<2x64xf32, #tpu.memory_space<vmem>>, vector<2x32xf32>,
    %c0_162 = arith.constant 0 : index
    %c32_163 = arith.constant 32 : index
    %621 = vector.load %arg7[%c0_162, %c32_163] : memref<2x64xf32, #tpu.memory_space<vmem>>, vector<2x32xf32>
    tpu.vector_store %arg7[%c0_162, %c32_163], %609 {strides = array<i32>} : memref<2x64xf32, #tpu.memory_space<vmem>>, vector<2x32xf32>,
    return
  }
}

</mosaic_0001>

<bundles_post_ra>
// kernel: bert_lstm_forward.3
= control target key start
LH: loop header
LB: loop body
LE: loop exit
PB: predicated region body
PF: predicated region fallthrough
CT: control target
= control target key end

     0   :  { %16 = vsyncpa [#allocation4], 0  ;;  %v2406_v2 = vmov 0   ;;  %v2407_v4 = vmov 0.0   ;;  %vm2408_vm0 = vmmov 0   ;;  %s2409_s17 = smov 32   ;;  %s2945_s0 = inlined_call_operand.vmem [shape: bf16[16,64], index: 0, kind: input, shape index: {}]   ;;  %s2946_s1 = inlined_call_operand.vmem [shape: bf16[64,256], index: 1, kind: input, shape index: {}]   ;;  %s2947_s2 = inlined_call_operand.vmem [shape: bf16[2,32,128], index: 2, kind: input, shape index: {}]   ;;  %s2948_s3 = inlined_call_operand.vmem [shape: f32[1,256], index: 3, kind: input, shape index: {}]   ;;  %s2949_s4 = inlined_call_operand.vmem [shape: f32[2,2,32], index: 4, kind: input, shape index: {}]   ;;  %s2950_s5 = inlined_call_operand.vmem [shape: f32[2,2,32], index: 5, kind: input, shape index: {}]   ;;  %s2951_s6 = inlined_call_operand.vmem [shape: f32[64,4], index: 6, kind: input, shape index: {}]   ;;  %s2952_s7 = inlined_call_operand.vmem [shape: f32[1,4], index: 7, kind: input, shape index: {}]   ;;  %s2953_s8 = inlined_call_operand.hbm [shape: bf16[8,2,64], index: 8, kind: output, shape index: {0}]   ;;  %s2954_s9 = inlined_call_operand.hbm [shape: f32[2,64], index: 9, kind: output, shape index: {1}]   ;;  %s2955_s10 = inlined_call_operand.hbm [shape: f32[2,4], index: 10, kind: output, shape index: {2}]  }
   0x1   :  { %v2197_v0 = vld [vmem:[%s2946_s1 + $0x34] ss:$8 sps:$4 sm:$0xff]   ;;  %v2199_v1 = vld [vmem:[%s2946_s1 + $0x30] ss:$8 sps:$4 sm:$0xff]   ;;  %138 = vmatprep.mubr.bf16.mxu0 %v2406_v2  ;;  %v2200_v3 = vld [vmem:[%s2946_s1 + $0x24] ss:$8 sps:$4 sm:$0xff]   ;;  %2038 = vmatprep.subr.bf16.mxu1 %v2407_v4 }
   0x2   :  { %114 = vmatprep.subr.bf16.mxu0 %v2197_v0  ;;  %v2202_v5 = vld [vmem:[%s2946_s1 + $0x20] ss:$8 sps:$4 sm:$0xff]   ;;  %2042 = vmatprep.mubr.msk.bf16.mxu1 %vm2408_vm0, %v2407_v4  ;;  %v2203_v6 = vld [vmem:[%s2946_s1 + $0x14] ss:$8 sps:$4 sm:$0xff]   ;;  %v2205_v7 = vld [vmem:[%s2946_s1 + $0x10] ss:$8 sps:$4 sm:$0xff]  }
   0x3   :  { %115 = vmatpush1.bf16.msra.mxu0 %v2199_v1  ;;  %v2497_v8 = vld [vmem:[%s2947_s2 + $0x8] sm:$0xff]   ;;  %v2505_v10 = vld [vmem:[%s2947_s2] sm:$0xff]  }
   0x4   :  { %116 = vmatprep.subr.bf16.mxu0 %v2200_v3  ;;  %v2206_v9 = vld [vmem:[%s2946_s1 + $0x4] ss:$8 sps:$4 sm:$0xff]   ;;  %2039 = vmatpush3.bf16.msra.mxu1 %v2497_v8  ;;  %v214_v11 = vld [vmem:[%s2949_s4] sm:$0x3] }
   0x5   :  { %2040 = vmatprep.subr.bf16.mxu1 %v2407_v4  ;;  %v2208_v12 = vld [vmem:[%s2946_s1] ss:$8 sps:$4 sm:$0xff]   ;;  %v223_v14 = vpack.c.bf16 %v214_v11, %v214_v11 }
   0x6   :  { %v1948_v13 = vld.sshfl [vmem:[%s2950_s5] sm:$0x3 pattern:$0x76325410] }
   0x7   :  { %117 = vmatpush1.bf16.msra.mxu0 %v2202_v5  ;;  %356 = vrot.lane.b32.xlu1 %v1948_v13, %s2409_s17 }
   0x8   :  { %118 = vmatprep.subr.bf16.mxu0 %v2203_v6 }
   0xb   :  { %119 = vmatpush1.bf16.msra.mxu0 %v2205_v7 }
   0xc   :  { %120 = vmatprep.subr.bf16.mxu0 %v2206_v9 }
   0xd   :  { %17 = vsyncpa [#allocation6], 0  ;;  %2041 = vmatpush3.bf16.msra.mxu1 %v2505_v10  ;;  %vm236_vm1 = vcmask 261120   ;;  %v2523_v15 = vld [vmem:[%s2947_s2 + $0x18] sm:$0xff]   ;;  %v2209_v16 = vld [vmem:[%s2945_s0] sm:$0xff]   ;;  %vm102_vm2 = vcmask 523264   ;;  %v47_v20 = vlaneseq }
   0xe   :  { %2046 = vmatprep.subr.bf16.mxu1 %v2407_v4  ;;  %v2535_v17 = vld [vmem:[%s2947_s2 + $0x10] sm:$0xff]   ;;  %v1939_v18 = vld [vmem:[%s2949_s4 + $0x2] sm:$0x3]  ;;  %v2410_v23 = vmov 1983009808   ;;  %vm1772_vm3 = vcmask 254976  }
   0xf   :  { %121 = vmatpush1.bf16.msra.mxu0 %v2208_v12  ;;  %v281_v19 = vpack.c.bf16 %v1939_v18, %v1939_v18  ;;  %v2559_v21 = vshrl.u32 %v47_v20, 7  ;;  %v156_v24 = vunpack.c.l.s4 %v2410_v23  ;;  %v45_v26 = vld [vmem:[%s2948_s3] sm:$0x3]  ;;  %s2411_s3 = smov 64   ;;  %vm430_vm4 = vcmask 253952   ;;  %s2414_s21 = smov [#allocation3]  }
  0x10   :  { %2043 = vmatmul.mubr.msk.bf16.vlgmr.msra.gmra.mxu1 %vm236_vm1, %v223_v14  ;;  %2070 = vmatprep.subr.bf16.mxu0 %v2407_v4  ;;  %v1950_v2 = vld.sshfl [vmem:[%s2950_s5 + $0x2] sm:$0x3 pattern:$0x76325410]  ;;  %vm1785_vm5 = vcmask 517376   ;;  %vm452_vm6 = vcmask 516352  }
  0x11   :  { %2047 = vmatpush3.bf16.msra.mxu1 %v2523_v15  ;;  %2050 = vmatprep.mubr.msk.bf16.mxu1 %vm2408_vm0, %v2407_v4  ;;  %v49_v22 = vsub.s32 0, %v2559_v21  ;;  %v53_v25 = vsub.s32 1, %v2559_v21  ;;  %v157_v29 = vunpack.c.0.s8 %v156_v24  ;;  %s1883_s22 = sshll.u32 %s2414_s21, 4  ;;  %s1884_s22 = int_to_ptr.vmem [resolvable:$true] %s1883_s22 }
  0x12   :  { %1930 = vmatmul.mubr.msk.bf16.vlgmr.msra.gmra.mxu0 %vm102_vm2, %v2209_v16  ;;  %2048 = vmatprep.subr.bf16.mxu1 %v2407_v4 }
  0x13   :  { %2071 = vmatpush3.bf16.msra.mxu0 %v2497_v8  ;;  %2074 = vmatprep.mubr.msk.bf16.mxu0 %vm2408_vm0, %v2407_v4  ;;  %v50_v28 = vrot.slane %v45_v26, %v49_v22  ;;  %v54_v30 = vrot.slane %v45_v26, %v53_v25  ;;  %v2567_v36 = vsub.s32 %v157_v29, %v2559_v21 }
  0x14   :  { %2072 = vmatprep.subr.bf16.mxu0 %v2407_v4 }
  0x15   :  { %2049 = vmatpush3.bf16.msra.mxu1 %v2535_v17 }
  0x16   :  { %2054 = vmatprep.subr.bf16.mxu1 %v2407_v4 }
  0x17   :  { %2073 = vmatpush3.bf16.msra.mxu0 %v2505_v10 }
  0x18   :  { %2051 = vmatmul.mubr.msk.bf16.vlgmr.msra.gmra.mxu1 %vm236_vm1, %v281_v19  ;;  %2086 = vmatprep.subr.bf16.mxu0 %v2407_v4 }
  0x19   :  { %2055 = vmatpush3.bf16.msra.mxu1 %v2497_v8  ;;  %2058 = vmatprep.mubr.msk.bf16.mxu1 %vm2408_vm0, %v2407_v4 }
  0x1a   :  { %2056 = vmatprep.subr.bf16.mxu1 %v2407_v4 }
  0x1d   :  { %2057 = vmatpush3.bf16.msra.mxu1 %v2505_v10 }
  0x1e   :  { %2062 = vmatprep.subr.bf16.mxu1 %v2407_v4 }
  0x79   :  { %v357_v20 = vpop.permute.xlu1 %356 }
  0xd0   :  { %v274_v27 = vpop.f32.mrf.mxu1 }
  0xd2   :  { %v140_v31 = vpop.f32.mrf.mxu0  ;;  %v2044_v32 = vpop.f32.mrf.mxu1 }
  0xd3   :  { %v141_v35 = vadd.f32 %v140_v31, %v50_v28 }
  0xd4   :  { %v142_v33 = vpop.f32.mrf.mxu0  ;;  %v277_v34 = vpop.f32.mrf.mxu1 }
  0xd5   :  { %v143_v37 = vadd.f32 %v142_v33, %v54_v30 }
  0xd6   :  { %v144_v38 = vpop.f32.mrf.mxu0  ;;  %v2045_v39 = vpop.f32.mrf.mxu1 }
  0xd7   :  { %v153_v40 = vcombine.low %v141_v35, %v143_v37  ;;  %v154_v41 = vcombine.high %v141_v35, %v143_v37  ;;  %v145_v46 = vadd.f32 %v144_v38, %v50_v28 }
  0xd8   :  { %v146_v42 = vpop.f32.mrf.mxu0  ;;  %v331_v43 = vpop.f32.mrf.mxu1 }
  0xd9   :  { %v161_v44 = vrot.slane %v153_v40, %v2567_v36  ;;  %v168_v45 = vrot.slane %v154_v41, %v2567_v36  ;;  %1931 = vst.sshfl [vmem:[#allocation2] sm:$0x33 pattern:$0x76325410] %v153_v40  ;;  %v147_v47 = vadd.f32 %v146_v42, %v54_v30 }
  0xda   :  { %1932 = vst.sshfl [vmem:[#allocation2 + $0x8] sm:$0x33 pattern:$0x76325410] %v154_v41  ;;  %v2052_v48 = vpop.f32.mrf.mxu1 }
  0xdb   :  { %v169_v49 = vcombine.high %v161_v44, %v161_v44  ;;  %v170_v50 = vcombine.high %v168_v45, %v168_v45  ;;  %v171_v51 = vcombine.low %v145_v46, %v147_v47  ;;  %v172_v52 = vcombine.high %v145_v46, %v147_v47 }
  0xdc   :  { %v334_v53 = vpop.f32.mrf.mxu1 }
  0xdd   :  { %198 = vst [vmem:[#allocation2 + $0x4] sm:$0xf] %v169_v49  ;;  %200 = vst [vmem:[#allocation2 + $0xc] sm:$0xf] %v170_v50  ;;  %v179_v54 = vrot.slane %v171_v51, %v2567_v36  ;;  %v186_v55 = vrot.slane %v172_v52, %v2567_v36 }
  0xde   :  { %1933 = vst.sshfl [vmem:[#allocation2 + $0x10] sm:$0x33 pattern:$0x76325410] %v171_v51  ;;  %v2053_v56 = vpop.f32.mrf.mxu1 }
  0xdf   :  { %1934 = vst.sshfl [vmem:[#allocation2 + $0x18] sm:$0x33 pattern:$0x76325410] %v172_v52  ;;  %v187_v57 = vcombine.high %v179_v54, %v179_v54  ;;  %v188_v58 = vcombine.high %v186_v55, %v186_v55 }
  0xe0   :  { %v220_v59 = vld [vmem:[#allocation2] sm:$0xf] }
  0xe1   :  { %202 = vst [vmem:[#allocation2 + $0x14] sm:$0xf] %v187_v57  ;;  %204 = vst [vmem:[#allocation2 + $0x1c] sm:$0xf] %v188_v58  ;;  %v280_v60 = vadd.f32 %v274_v27, %v220_v59 }
  0xe3   :  { %2214 = vtanh.f32 %v280_v60  ;;  %v1947_v3 = vmul.f32 -1.442695, %v280_v60 }
  0xe4   :  { %v455_v40 = vld [vmem:[#allocation2 + $0x4] sm:$0xf] }
  0xe6   :  { %v457_v46 = vld [vmem:[#allocation2 + $0x18] sm:$0xf] }
  0xe7   :  { %v550_v47 = vrot.slane %v457_v46, 2 }
  0xe8   :  { %v222_v61 = vld [vmem:[#allocation2 + $0x1c] sm:$0xf] }
  0xe9   :  { %v338_v62 = vrot.slane %v222_v61, 2 }
  0xeb   :  { %v340_v63 = vadd.f32 %v338_v62, %v331_v43 }
  0xed   :  { %2216 = vtanh.f32 %v340_v63  ;;  %v1949_v5 = vmul.f32 -1.442695, %v340_v63 }
  0xee   :  { %2218 = vpow2.f32 %v1947_v3 }
  0xef   :  { %2220 = vpow2.f32 %v1949_v5 }
  0xf0   :  { %v2215_v0 = vpop.eup %2214 }
  0xf1   :  { %361 = vrot.lane.b32.xlu0 %v2215_v0, %s2411_s3 }
  0xfa   :  { %v2217_v1 = vpop.eup %2216 }
  0xfb   :  { %396 = vrot.lane.b32.xlu0 %v2217_v1, %s2411_s3  ;;  %v2219_v6 = vpop.eup %2218 }
  0xfc   :  { %v344_v7 = vadd.f32 1.0, %v2219_v6  ;;  %v2221_v9 = vpop.eup %2220 }
  0xfd   :  { %v379_v11 = vadd.f32 1.0, %v2221_v9 }
  0xfe   :  { %2222 = vrcp.f32 %v344_v7 }
  0xff   :  { %391 = vrot.lane.b32.xlu0 %v1950_v2, %s2409_s17  ;;  %2224 = vrcp.f32 %v379_v11 }
 0x10b   :  { %v2223_v12 = vpop.eup %2222 }
 0x10c   :  { %v2225_v16 = vpop.eup %2224  ;;  %v359_v22 = vmul.f32 %v2223_v12, %v357_v20 }
 0x163   :  { %v362_v13 = vpop.permute.xlu0 %361 }
 0x164   :  { %v364_v14 = vmul.f32 %v2223_v12, %v362_v13 }
 0x166   :  { %366 = vrot.lane.b32.xlu1 %v364_v14, %s2409_s17 }
 0x16d   :  { %v397_v18 = vpop.permute.xlu0 %396 }
 0x16e   :  { %v399_v19 = vmul.f32 %v2225_v16, %v397_v18 }
 0x170   :  { %401 = vrot.lane.b32.xlu1 %v399_v19, %s2409_s17 }
 0x171   :  { %v392_v25 = vpop.permute.xlu0 %391 }
 0x172   :  { %v394_v26 = vmul.f32 %v2225_v16, %v392_v25  ;;  %v644_v25 = vld [vmem:[#allocation2 + $0x8] sm:$0xf] }
 0x1d8   :  { %v367_v23 = vpop.permute.xlu1 %366 }
 0x1d9   :  { %v2581_v24 = vadd.f32 %v367_v23, %v359_v22 }
 0x1db   :  { %2226 = vtanh.f32 %v2581_v24 }
 0x1e2   :  { %v402_v27 = vpop.permute.xlu1 %401 }
 0x1e3   :  { %v2584_v28 = vadd.f32 %v402_v27, %v394_v26 }
 0x1e5   :  { %2228 = vtanh.f32 %v2584_v28 }
 0x1e8   :  { %v2227_v29 = vpop.eup %2226 }
 0x1e9   :  { %372 = vrot.lane.b32.xlu0 %v2227_v29, %s2411_s3 }
 0x1f2   :  { %v2229_v30 = vpop.eup %2228 }
 0x1f3   :  { %407 = vrot.lane.b32.xlu1 %v2229_v30, %s2411_s3 }
 0x25b   :  { %v373_v31 = vpop.permute.xlu0 %372 }
 0x25c   :  { %v375_v32 = vmul.f32 %v2223_v12, %v373_v31  ;;  %v646_v31 = vld [vmem:[#allocation2 + $0x14] sm:$0xf] }
 0x25e   :  { %v2589_v33 = vpack.c.bf16 %v375_v32, %v375_v32  ;;  %v739_v32 = vrot.slane %v646_v31, 2 }
 0x260   :  { %458 = vrot.lane.b32.xlu0 %v2589_v33, %s2409_s17 }
 0x265   :  { %v408_v34 = vpop.permute.xlu1 %407 }
 0x266   :  { %v410_v35 = vmul.f32 %v2225_v16, %v408_v34 }
 0x268   :  { %v2593_v37 = vpack.c.bf16 %v410_v35, %v410_v35 }
 0x26a   :  { %504 = vrot.lane.b32.xlu1 %v2593_v37, %s2409_s17 }
 0x2d2   :  { %v459_v38 = vpop.permute.xlu0 %458 }
 0x2d3   :  { %2059 = vmatmul.mubr.msk.bf16.vlgmr.msra.gmra.mxu1 %vm236_vm1, %v459_v38 }
 0x2d4   :  { %2063 = vmatpush3.bf16.msra.mxu1 %v2523_v15  ;;  %2066 = vmatprep.mubr.msk.bf16.mxu1 %vm2408_vm0, %v2407_v4 }
 0x2d5   :  { %2064 = vmatprep.subr.bf16.mxu1 %v2407_v4 }
 0x2d8   :  { %2065 = vmatpush3.bf16.msra.mxu1 %v2535_v17 }
 0x2d9   :  { %2078 = vmatprep.subr.bf16.mxu1 %v2407_v4 }
 0x2dc   :  { %v505_v39 = vpop.permute.xlu1 %504 }
 0x2dd   :  { %2067 = vmatmul.mubr.msk.bf16.vlgmr.msra.gmra.mxu1 %vm236_vm1, %v505_v39 }
 0x2de   :  { %2079 = vmatpush3.bf16.msra.mxu1 %v2523_v15  ;;  %2082 = vmatprep.mubr.msk.bf16.mxu1 %vm2408_vm0, %v2407_v4 }
 0x2df   :  { %2080 = vmatprep.subr.bf16.mxu1 %v2407_v4 }
 0x2e2   :  { %2081 = vmatpush3.bf16.msra.mxu1 %v2535_v17 }
 0x2e3   :  { %2094 = vmatprep.subr.bf16.mxu1 %v2407_v4 }
 0x393   :  { %v497_v41 = vpop.f32.mrf.mxu1 }
 0x394   :  { %v503_v42 = vadd.f32 %v497_v41, %v455_v40 }
 0x395   :  { %v2060_v43 = vpop.f32.mrf.mxu1 }
 0x396   :  { %2230 = vtanh.f32 %v503_v42  ;;  %v1953_v55 = vmul.f32 -1.442695, %v503_v42 }
 0x397   :  { %v500_v44 = vpop.f32.mrf.mxu1 }
 0x399   :  { %v2061_v45 = vpop.f32.mrf.mxu1 }
 0x39d   :  { %v543_v48 = vpop.f32.mrf.mxu1 }
 0x39e   :  { %v552_v49 = vadd.f32 %v550_v47, %v543_v48 }
 0x39f   :  { %v2068_v50 = vpop.f32.mrf.mxu1 }
 0x3a0   :  { %2232 = vtanh.f32 %v552_v49  ;;  %v1954_v56 = vmul.f32 -1.442695, %v552_v49 }
 0x3a1   :  { %v546_v51 = vpop.f32.mrf.mxu1  ;;  %2234 = vpow2.f32 %v1953_v55 }
 0x3a2   :  { %2236 = vpow2.f32 %v1954_v56 }
 0x3a3   :  { %v2231_v52 = vpop.eup %2230  ;;  %v2069_v53 = vpop.f32.mrf.mxu1 }
 0x3a4   :  { %562 = vrot.lane.b32.xlu0 %v2231_v52, %s2411_s3 }
 0x3ad   :  { %v2233_v54 = vpop.eup %2232 }
 0x3ae   :  { %586 = vrot.lane.b32.xlu1 %v2233_v54, %s2411_s3  ;;  %v2235_v57 = vpop.eup %2234 }
 0x3af   :  { %v556_v58 = vadd.f32 1.0, %v2235_v57  ;;  %v2237_v59 = vpop.eup %2236 }
 0x3b0   :  { %v580_v60 = vadd.f32 1.0, %v2237_v59 }
 0x3b1   :  { %2238 = vrcp.f32 %v556_v58 }
 0x3b2   :  { %2240 = vrcp.f32 %v580_v60 }
 0x3be   :  { %v2239_v61 = vpop.eup %2238 }
 0x3bf   :  { %v2241_v0 = vpop.eup %2240  ;;  %v560_v3 = vmul.f32 %v2239_v61, %v2581_v24 }
 0x3c0   :  { %v584_v7 = vmul.f32 %v2241_v0, %v2584_v28 }
 0x416   :  { %v563_v62 = vpop.permute.xlu0 %562 }
 0x417   :  { %v565_v63 = vmul.f32 %v2239_v61, %v563_v62 }
 0x419   :  { %567 = vrot.lane.b32.xlu0 %v565_v63, %s2409_s17 }
 0x420   :  { %v587_v1 = vpop.permute.xlu1 %586 }
 0x421   :  { %v589_v2 = vmul.f32 %v2241_v0, %v587_v1 }
 0x423   :  { %591 = vrot.lane.b32.xlu1 %v589_v2, %s2409_s17 }
 0x48b   :  { %v568_v5 = vpop.permute.xlu0 %567 }
 0x48c   :  { %v2616_v6 = vadd.f32 %v568_v5, %v560_v3 }
 0x48e   :  { %2242 = vtanh.f32 %v2616_v6 }
 0x495   :  { %v592_v9 = vpop.permute.xlu1 %591 }
 0x496   :  { %v2620_v11 = vadd.f32 %v592_v9, %v584_v7  ;;  %v833_v9 = vld [vmem:[#allocation2 + $0xc] sm:$0xf] }
 0x498   :  { %2244 = vtanh.f32 %v2620_v11 }
 0x49b   :  { %v2243_v12 = vpop.eup %2242 }
 0x49c   :  { %573 = vrot.lane.b32.xlu0 %v2243_v12, %s2411_s3 }
 0x4a5   :  { %v2245_v13 = vpop.eup %2244 }
 0x4a6   :  { %597 = vrot.lane.b32.xlu1 %v2245_v13, %s2411_s3 }
 0x50e   :  { %v574_v14 = vpop.permute.xlu0 %573 }
 0x50f   :  { %v576_v16 = vmul.f32 %v2239_v61, %v574_v14 }
 0x511   :  { %v2625_v18 = vpack.c.bf16 %v576_v16, %v576_v16 }
 0x513   :  { %647 = vrot.lane.b32.xlu0 %v2625_v18, %s2409_s17 }
 0x518   :  { %v598_v19 = vpop.permute.xlu1 %597 }
 0x519   :  { %v600_v20 = vmul.f32 %v2241_v0, %v598_v19  ;;  %v835_v19 = vld [vmem:[#allocation2 + $0x10] sm:$0xf] }
 0x51b   :  { %v2629_v22 = vpack.c.bf16 %v600_v20, %v600_v20  ;;  %v928_v20 = vrot.slane %v835_v19, 2 }
 0x51d   :  { %693 = vrot.lane.b32.xlu1 %v2629_v22, %s2409_s17 }
 0x585   :  { %v648_v23 = vpop.permute.xlu0 %647 }
 0x586   :  { %2075 = vmatmul.mubr.msk.bf16.vlgmr.msra.gmra.mxu0 %vm236_vm1, %v648_v23 }
 0x587   :  { %2087 = vmatpush3.bf16.msra.mxu0 %v2497_v8  ;;  %2090 = vmatprep.mubr.msk.bf16.mxu0 %vm2408_vm0, %v2407_v4 }
 0x588   :  { %2088 = vmatprep.subr.bf16.mxu0 %v2407_v4 }
 0x58b   :  { %2089 = vmatpush3.bf16.msra.mxu0 %v2505_v10 }
 0x58c   :  { %2102 = vmatprep.subr.bf16.mxu0 %v2407_v4 }
 0x58f   :  { %v694_v24 = vpop.permute.xlu1 %693 }
 0x590   :  { %2083 = vmatmul.mubr.msk.bf16.vlgmr.msra.gmra.mxu1 %vm236_vm1, %v694_v24 }
 0x591   :  { %2095 = vmatpush3.bf16.msra.mxu1 %v2523_v15  ;;  %2098 = vmatprep.mubr.msk.bf16.mxu1 %vm2408_vm0, %v2407_v4 }
 0x592   :  { %2096 = vmatprep.subr.bf16.mxu1 %v2407_v4 }
 0x595   :  { %2097 = vmatpush3.bf16.msra.mxu1 %v2535_v17 }
 0x596   :  { %2110 = vmatprep.subr.bf16.mxu1 %v2407_v4 }
 0x646   :  { %v686_v26 = vpop.f32.mrf.mxu0 }
 0x647   :  { %v692_v27 = vadd.f32 %v686_v26, %v644_v25 }
 0x648   :  { %v2076_v28 = vpop.f32.mrf.mxu0 }
 0x649   :  { %2246 = vtanh.f32 %v692_v27  ;;  %v1957_v43 = vmul.f32 -1.442695, %v692_v27 }
 0x64a   :  { %v689_v29 = vpop.f32.mrf.mxu0 }
 0x64c   :  { %v2077_v30 = vpop.f32.mrf.mxu0 }
 0x650   :  { %v732_v34 = vpop.f32.mrf.mxu1 }
 0x651   :  { %v741_v35 = vadd.f32 %v739_v32, %v732_v34 }
 0x652   :  { %v2084_v38 = vpop.f32.mrf.mxu1 }
 0x653   :  { %2248 = vtanh.f32 %v741_v35  ;;  %v1958_v44 = vmul.f32 -1.442695, %v741_v35 }
 0x654   :  { %v735_v39 = vpop.f32.mrf.mxu1  ;;  %2250 = vpow2.f32 %v1957_v43 }
 0x655   :  { %2252 = vpow2.f32 %v1958_v44 }
 0x656   :  { %v2247_v40 = vpop.eup %2246  ;;  %v2085_v41 = vpop.f32.mrf.mxu1 }
 0x657   :  { %751 = vrot.lane.b32.xlu0 %v2247_v40, %s2411_s3 }
 0x660   :  { %v2249_v42 = vpop.eup %2248 }
 0x661   :  { %775 = vrot.lane.b32.xlu1 %v2249_v42, %s2411_s3  ;;  %v2251_v45 = vpop.eup %2250 }
 0x662   :  { %v745_v46 = vadd.f32 1.0, %v2251_v45  ;;  %v2253_v47 = vpop.eup %2252 }
 0x663   :  { %v769_v48 = vadd.f32 1.0, %v2253_v47 }
 0x664   :  { %2254 = vrcp.f32 %v745_v46 }
 0x665   :  { %2256 = vrcp.f32 %v769_v48 }
 0x671   :  { %v2255_v49 = vpop.eup %2254 }
 0x672   :  { %v2257_v52 = vpop.eup %2256  ;;  %v749_v55 = vmul.f32 %v2255_v49, %v2616_v6 }
 0x673   :  { %v773_v58 = vmul.f32 %v2257_v52, %v2620_v11 }
 0x6c9   :  { %v752_v50 = vpop.permute.xlu0 %751 }
 0x6ca   :  { %v754_v51 = vmul.f32 %v2255_v49, %v752_v50 }
 0x6cc   :  { %756 = vrot.lane.b32.xlu0 %v754_v51, %s2409_s17 }
 0x6d3   :  { %v776_v53 = vpop.permute.xlu1 %775 }
 0x6d4   :  { %v778_v54 = vmul.f32 %v2257_v52, %v776_v53 }
 0x6d6   :  { %780 = vrot.lane.b32.xlu1 %v778_v54, %s2409_s17 }
 0x73e   :  { %v757_v56 = vpop.permute.xlu0 %756 }
 0x73f   :  { %v2652_v57 = vadd.f32 %v757_v56, %v749_v55 }
 0x741   :  { %2258 = vtanh.f32 %v2652_v57 }
 0x748   :  { %v781_v59 = vpop.permute.xlu1 %780 }
 0x749   :  { %v2656_v60 = vadd.f32 %v781_v59, %v773_v58 }
 0x74b   :  { %2260 = vtanh.f32 %v2656_v60 }
 0x74e   :  { %v2259_v61 = vpop.eup %2258 }
 0x74f   :  { %762 = vrot.lane.b32.xlu0 %v2259_v61, %s2411_s3  ;;  %v1021_v61 = vld [vmem:[#allocation2 + $0x10] sm:$0xf] }
 0x758   :  { %v2261_v62 = vpop.eup %2260 }
 0x759   :  { %786 = vrot.lane.b32.xlu1 %v2261_v62, %s2411_s3 }
 0x7c1   :  { %v763_v63 = vpop.permute.xlu0 %762 }
 0x7c2   :  { %v765_v0 = vmul.f32 %v2255_v49, %v763_v63 }
 0x7c4   :  { %v2661_v1 = vpack.c.bf16 %v765_v0, %v765_v0 }
 0x7c6   :  { %836 = vrot.lane.b32.xlu0 %v2661_v1, %s2409_s17 }
 0x7cb   :  { %v787_v2 = vpop.permute.xlu1 %786 }
 0x7cc   :  { %v789_v3 = vmul.f32 %v2257_v52, %v787_v2 }
 0x7ce   :  { %v2665_v5 = vpack.c.bf16 %v789_v3, %v789_v3 }
 0x7d0   :  { %882 = vrot.lane.b32.xlu1 %v2665_v5, %s2409_s17 }
 0x838   :  { %v837_v6 = vpop.permute.xlu0 %836 }
 0x839   :  { %2091 = vmatmul.mubr.msk.bf16.vlgmr.msra.gmra.mxu0 %vm236_vm1, %v837_v6  ;;  %v1022_v6 = vld [vmem:[#allocation2 + $0xc] sm:$0xf] }
 0x83a   :  { %2103 = vmatpush3.bf16.msra.mxu0 %v2497_v8  ;;  %2106 = vmatprep.mubr.msk.bf16.mxu0 %vm2408_vm0, %v2407_v4 }
 0x83b   :  { %2104 = vmatprep.subr.bf16.mxu0 %v2407_v4 }
 0x83e   :  { %2105 = vmatpush3.bf16.msra.mxu0 %v2505_v10 }
 0x83f   :  { %2118 = vmatprep.subr.bf16.mxu0 %v2407_v4 }
 0x842   :  { %v883_v7 = vpop.permute.xlu1 %882 }
 0x843   :  { %2099 = vmatmul.mubr.msk.bf16.vlgmr.msra.gmra.mxu1 %vm236_vm1, %v883_v7  ;;  %v1115_v7 = vrot.slane %v1022_v6, 2 }
 0x844   :  { %2111 = vmatpush3.bf16.msra.mxu1 %v2523_v15  ;;  %2114 = vmatprep.mubr.msk.bf16.mxu1 %vm2408_vm0, %v2407_v4 }
 0x845   :  { %2112 = vmatprep.subr.bf16.mxu1 %v2407_v4 }
 0x848   :  { %2113 = vmatpush3.bf16.msra.mxu1 %v2535_v17 }
 0x849   :  { %2126 = vmatprep.subr.bf16.mxu1 %v2407_v4 }
 0x8f9   :  { %v875_v11 = vpop.f32.mrf.mxu0 }
 0x8fa   :  { %v881_v12 = vadd.f32 %v875_v11, %v833_v9 }
 0x8fb   :  { %v2092_v13 = vpop.f32.mrf.mxu0 }
 0x8fc   :  { %2262 = vtanh.f32 %v881_v12  ;;  %v1961_v30 = vmul.f32 -1.442695, %v881_v12 }
 0x8fd   :  { %v878_v14 = vpop.f32.mrf.mxu0 }
 0x8ff   :  { %v2093_v16 = vpop.f32.mrf.mxu0 }
 0x903   :  { %v921_v23 = vpop.f32.mrf.mxu1 }
 0x904   :  { %v930_v24 = vadd.f32 %v928_v20, %v921_v23 }
 0x905   :  { %v2100_v25 = vpop.f32.mrf.mxu1 }
 0x906   :  { %2264 = vtanh.f32 %v930_v24  ;;  %v1962_v31 = vmul.f32 -1.442695, %v930_v24 }
 0x907   :  { %v924_v26 = vpop.f32.mrf.mxu1  ;;  %2266 = vpow2.f32 %v1961_v30 }
 0x908   :  { %2268 = vpow2.f32 %v1962_v31 }
 0x909   :  { %v2263_v27 = vpop.eup %2262  ;;  %v2101_v28 = vpop.f32.mrf.mxu1 }
 0x90a   :  { %940 = vrot.lane.b32.xlu0 %v2263_v27, %s2411_s3 }
 0x913   :  { %v2265_v29 = vpop.eup %2264 }
 0x914   :  { %964 = vrot.lane.b32.xlu1 %v2265_v29, %s2411_s3  ;;  %v2267_v32 = vpop.eup %2266 }
 0x915   :  { %v934_v34 = vadd.f32 1.0, %v2267_v32  ;;  %v2269_v35 = vpop.eup %2268 }
 0x916   :  { %v958_v38 = vadd.f32 1.0, %v2269_v35 }
 0x917   :  { %2270 = vrcp.f32 %v934_v34 }
 0x918   :  { %2272 = vrcp.f32 %v958_v38 }
 0x924   :  { %v2271_v39 = vpop.eup %2270 }
 0x925   :  { %v2273_v42 = vpop.eup %2272  ;;  %v938_v45 = vmul.f32 %v2271_v39, %v2652_v57 }
 0x926   :  { %v962_v48 = vmul.f32 %v2273_v42, %v2656_v60 }
 0x97c   :  { %v941_v40 = vpop.permute.xlu0 %940 }
 0x97d   :  { %v943_v41 = vmul.f32 %v2271_v39, %v941_v40 }
 0x97f   :  { %945 = vrot.lane.b32.xlu0 %v943_v41, %s2409_s17 }
 0x986   :  { %v965_v43 = vpop.permute.xlu1 %964 }
 0x987   :  { %v967_v44 = vmul.f32 %v2273_v42, %v965_v43 }
 0x989   :  { %969 = vrot.lane.b32.xlu1 %v967_v44, %s2409_s17 }
 0x9f1   :  { %v946_v46 = vpop.permute.xlu0 %945 }
 0x9f2   :  { %v2688_v47 = vadd.f32 %v946_v46, %v938_v45 }
 0x9f4   :  { %2274 = vtanh.f32 %v2688_v47 }
 0x9fb   :  { %v970_v49 = vpop.permute.xlu1 %969 }
 0x9fc   :  { %v2692_v50 = vadd.f32 %v970_v49, %v962_v48 }
 0x9fe   :  { %2276 = vtanh.f32 %v2692_v50 }
 0xa01   :  { %v2275_v51 = vpop.eup %2274 }
 0xa02   :  { %951 = vrot.lane.b32.xlu0 %v2275_v51, %s2411_s3 }
 0xa0b   :  { %v2277_v52 = vpop.eup %2276 }
 0xa0c   :  { %975 = vrot.lane.b32.xlu1 %v2277_v52, %s2411_s3 }
 0xa74   :  { %v952_v53 = vpop.permute.xlu0 %951 }
 0xa75   :  { %v954_v54 = vmul.f32 %v2271_v39, %v952_v53  ;;  %v1206_v53 = vld [vmem:[#allocation2 + $0x14] sm:$0xf] }
 0xa77   :  { %v2697_v55 = vpack.c.bf16 %v954_v54, %v954_v54 }
 0xa79   :  { %1023 = vrot.lane.b32.xlu0 %v2697_v55, %s2409_s17 }
 0xa7e   :  { %v976_v56 = vpop.permute.xlu1 %975 }
 0xa7f   :  { %v978_v57 = vmul.f32 %v2273_v42, %v976_v56 }
 0xa81   :  { %v2701_v58 = vpack.c.bf16 %v978_v57, %v978_v57 }
 0xa83   :  { %1069 = vrot.lane.b32.xlu1 %v2701_v58, %s2409_s17 }
 0xaeb   :  { %v1024_v59 = vpop.permute.xlu0 %1023 }
 0xaec   :  { %2107 = vmatmul.mubr.msk.bf16.vlgmr.msra.gmra.mxu0 %vm236_vm1, %v1024_v59 }
 0xaed   :  { %2119 = vmatpush3.bf16.msra.mxu0 %v2497_v8  ;;  %2122 = vmatprep.mubr.msk.bf16.mxu0 %vm2408_vm0, %v2407_v4 }
 0xaee   :  { %2120 = vmatprep.subr.bf16.mxu0 %v2407_v4 }
 0xaf1   :  { %2121 = vmatpush3.bf16.msra.mxu0 %v2505_v10 }
 0xaf2   :  { %2134 = vmatprep.subr.bf16.mxu0 %v2407_v4 }
 0xaf5   :  { %v1070_v60 = vpop.permute.xlu1 %1069 }
 0xaf6   :  { %2115 = vmatmul.mubr.msk.bf16.vlgmr.msra.gmra.mxu1 %vm236_vm1, %v1070_v60 }
 0xaf7   :  { %2127 = vmatpush3.bf16.msra.mxu1 %v2523_v15  ;;  %2130 = vmatprep.mubr.msk.bf16.mxu1 %vm2408_vm0, %v2407_v4 }
 0xaf8   :  { %2128 = vmatprep.subr.bf16.mxu1 %v2407_v4 }
 0xafb   :  { %2129 = vmatpush3.bf16.msra.mxu1 %v2535_v17 }
 0xafc   :  { %2142 = vmatprep.subr.bf16.mxu1 %v2407_v4 }
 0xbac   :  { %v1062_v62 = vpop.f32.mrf.mxu0 }
 0xbad   :  { %v1068_v63 = vadd.f32 %v1062_v62, %v1021_v61  ;;  %v1207_v61 = vld [vmem:[#allocation2 + $0x8] sm:$0xf] }
 0xbae   :  { %v2108_v0 = vpop.f32.mrf.mxu0  ;;  %v1300_v62 = vrot.slane %v1207_v61, 2 }
 0xbaf   :  { %2278 = vtanh.f32 %v1068_v63  ;;  %v1965_v20 = vmul.f32 -1.442695, %v1068_v63 }
 0xbb0   :  { %v1065_v2 = vpop.f32.mrf.mxu0 }
 0xbb2   :  { %v2109_v3 = vpop.f32.mrf.mxu0 }
 0xbb6   :  { %v1108_v9 = vpop.f32.mrf.mxu1 }
 0xbb7   :  { %v1117_v11 = vadd.f32 %v1115_v7, %v1108_v9 }
 0xbb8   :  { %v2116_v12 = vpop.f32.mrf.mxu1 }
 0xbb9   :  { %2280 = vtanh.f32 %v1117_v11  ;;  %v1966_v23 = vmul.f32 -1.442695, %v1117_v11 }
 0xbba   :  { %v1111_v13 = vpop.f32.mrf.mxu1  ;;  %2282 = vpow2.f32 %v1965_v20 }
 0xbbb   :  { %2284 = vpow2.f32 %v1966_v23 }
 0xbbc   :  { %v2279_v14 = vpop.eup %2278  ;;  %v2117_v16 = vpop.f32.mrf.mxu1 }
 0xbbd   :  { %1127 = vrot.lane.b32.xlu0 %v2279_v14, %s2411_s3 }
 0xbc6   :  { %v2281_v19 = vpop.eup %2280 }
 0xbc7   :  { %1151 = vrot.lane.b32.xlu1 %v2281_v19, %s2411_s3  ;;  %v2283_v24 = vpop.eup %2282 }
 0xbc8   :  { %v1121_v25 = vadd.f32 1.0, %v2283_v24  ;;  %v2285_v26 = vpop.eup %2284 }
 0xbc9   :  { %v1145_v27 = vadd.f32 1.0, %v2285_v26 }
 0xbca   :  { %2286 = vrcp.f32 %v1121_v25 }
 0xbcb   :  { %2288 = vrcp.f32 %v1145_v27 }
 0xbd7   :  { %v2287_v28 = vpop.eup %2286 }
 0xbd8   :  { %v2289_v31 = vpop.eup %2288  ;;  %v1125_v35 = vmul.f32 %v2287_v28, %v2688_v47 }
 0xbd9   :  { %v1149_v40 = vmul.f32 %v2289_v31, %v2692_v50 }
 0xc2f   :  { %v1128_v29 = vpop.permute.xlu0 %1127 }
 0xc30   :  { %v1130_v30 = vmul.f32 %v2287_v28, %v1128_v29 }
 0xc32   :  { %1132 = vrot.lane.b32.xlu0 %v1130_v30, %s2409_s17 }
 0xc39   :  { %v1152_v32 = vpop.permute.xlu1 %1151 }
 0xc3a   :  { %v1154_v34 = vmul.f32 %v2289_v31, %v1152_v32 }
 0xc3c   :  { %1156 = vrot.lane.b32.xlu1 %v1154_v34, %s2409_s17 }
 0xca4   :  { %v1133_v38 = vpop.permute.xlu0 %1132 }
 0xca5   :  { %v2724_v39 = vadd.f32 %v1133_v38, %v1125_v35 }
 0xca7   :  { %2290 = vtanh.f32 %v2724_v39 }
 0xcae   :  { %v1157_v41 = vpop.permute.xlu1 %1156 }
 0xcaf   :  { %v2728_v42 = vadd.f32 %v1157_v41, %v1149_v40 }
 0xcb1   :  { %2292 = vtanh.f32 %v2728_v42 }
 0xcb4   :  { %v2291_v43 = vpop.eup %2290 }
 0xcb5   :  { %1138 = vrot.lane.b32.xlu0 %v2291_v43, %s2411_s3 }
 0xcbe   :  { %v2293_v44 = vpop.eup %2292 }
 0xcbf   :  { %1162 = vrot.lane.b32.xlu1 %v2293_v44, %s2411_s3 }
 0xd27   :  { %v1139_v45 = vpop.permute.xlu0 %1138 }
 0xd28   :  { %v1141_v46 = vmul.f32 %v2287_v28, %v1139_v45 }
 0xd2a   :  { %v2733_v47 = vpack.c.bf16 %v1141_v46, %v1141_v46 }
 0xd2c   :  { %1208 = vrot.lane.b32.xlu0 %v2733_v47, %s2409_s17 }
 0xd31   :  { %v1163_v48 = vpop.permute.xlu1 %1162 }
 0xd32   :  { %v1165_v49 = vmul.f32 %v2289_v31, %v1163_v48 }
 0xd34   :  { %v2737_v50 = vpack.c.bf16 %v1165_v49, %v1165_v49 }
 0xd36   :  { %1254 = vrot.lane.b32.xlu1 %v2737_v50, %s2409_s17 }
 0xd9e   :  { %v1209_v51 = vpop.permute.xlu0 %1208 }
 0xd9f   :  { %2123 = vmatmul.mubr.msk.bf16.vlgmr.msra.gmra.mxu0 %vm236_vm1, %v1209_v51 }
 0xda0   :  { %2135 = vmatpush3.bf16.msra.mxu0 %v2497_v8  ;;  %2138 = vmatprep.mubr.msk.bf16.mxu0 %vm2408_vm0, %v2407_v4 }
 0xda1   :  { %2136 = vmatprep.subr.bf16.mxu0 %v2407_v4 }
 0xda4   :  { %2137 = vmatpush3.bf16.msra.mxu0 %v2505_v10 }
 0xda5   :  { %2150 = vmatprep.subr.bf16.mxu0 %v2407_v4 }
 0xda8   :  { %v1255_v52 = vpop.permute.xlu1 %1254 }
 0xda9   :  { %2131 = vmatmul.mubr.msk.bf16.vlgmr.msra.gmra.mxu1 %vm236_vm1, %v1255_v52 }
 0xdaa   :  { %2143 = vmatpush3.bf16.msra.mxu1 %v2523_v15  ;;  %2146 = vmatprep.mubr.msk.bf16.mxu1 %vm2408_vm0, %v2407_v4 }
 0xdab   :  { %2144 = vmatprep.subr.bf16.mxu1 %v2407_v4 }
 0xdae   :  { %2145 = vmatpush3.bf16.msra.mxu1 %v2535_v17 }
 0xdaf   :  { %2158 = vmatprep.subr.bf16.mxu1 %v2407_v4 }
 0xe5f   :  { %v1247_v54 = vpop.f32.mrf.mxu0 }
 0xe60   :  { %v1253_v56 = vadd.f32 %v1247_v54, %v1206_v53  ;;  %v1392_v53 = vld [vmem:[#allocation2 + $0x4] sm:$0xf] }
 0xe61   :  { %v2124_v57 = vpop.f32.mrf.mxu0  ;;  %v1485_v54 = vrot.slane %v1392_v53, 2 }
 0xe62   :  { %2294 = vtanh.f32 %v1253_v56  ;;  %v1969_v11 = vmul.f32 -1.442695, %v1253_v56 }
 0xe63   :  { %v1250_v59 = vpop.f32.mrf.mxu0 }
 0xe65   :  { %v2125_v60 = vpop.f32.mrf.mxu0 }
 0xe69   :  { %v1293_v63 = vpop.f32.mrf.mxu1 }
 0xe6a   :  { %v1302_v0 = vadd.f32 %v1300_v62, %v1293_v63 }
 0xe6b   :  { %v2132_v2 = vpop.f32.mrf.mxu1 }
 0xe6c   :  { %2296 = vtanh.f32 %v1302_v0  ;;  %v1970_v12 = vmul.f32 -1.442695, %v1302_v0 }
 0xe6d   :  { %v1296_v3 = vpop.f32.mrf.mxu1  ;;  %2298 = vpow2.f32 %v1969_v11 }
 0xe6e   :  { %2300 = vpow2.f32 %v1970_v12 }
 0xe6f   :  { %v2295_v6 = vpop.eup %2294  ;;  %v2133_v7 = vpop.f32.mrf.mxu1 }
 0xe70   :  { %1312 = vrot.lane.b32.xlu0 %v2295_v6, %s2411_s3 }
 0xe79   :  { %v2297_v9 = vpop.eup %2296 }
 0xe7a   :  { %1336 = vrot.lane.b32.xlu1 %v2297_v9, %s2411_s3  ;;  %v2299_v13 = vpop.eup %2298 }
 0xe7b   :  { %v1306_v14 = vadd.f32 1.0, %v2299_v13  ;;  %v2301_v16 = vpop.eup %2300 }
 0xe7c   :  { %v1330_v19 = vadd.f32 1.0, %v2301_v16 }
 0xe7d   :  { %2302 = vrcp.f32 %v1306_v14 }
 0xe7e   :  { %2304 = vrcp.f32 %v1330_v19 }
 0xe8a   :  { %v2303_v20 = vpop.eup %2302 }
 0xe8b   :  { %v2305_v25 = vpop.eup %2304  ;;  %v1310_v28 = vmul.f32 %v2303_v20, %v2724_v39 }
 0xe8c   :  { %v1334_v31 = vmul.f32 %v2305_v25, %v2728_v42 }
 0xee2   :  { %v1313_v23 = vpop.permute.xlu0 %1312 }
 0xee3   :  { %v1315_v24 = vmul.f32 %v2303_v20, %v1313_v23 }
 0xee5   :  { %1317 = vrot.lane.b32.xlu0 %v1315_v24, %s2409_s17 }
 0xeec   :  { %v1337_v26 = vpop.permute.xlu1 %1336 }
 0xeed   :  { %v1339_v27 = vmul.f32 %v2305_v25, %v1337_v26 }
 0xeef   :  { %1341 = vrot.lane.b32.xlu1 %v1339_v27, %s2409_s17 }
 0xf57   :  { %v1318_v29 = vpop.permute.xlu0 %1317 }
 0xf58   :  { %v2760_v30 = vadd.f32 %v1318_v29, %v1310_v28 }
 0xf5a   :  { %2306 = vtanh.f32 %v2760_v30 }
 0xf61   :  { %v1342_v32 = vpop.permute.xlu1 %1341 }
 0xf62   :  { %v2764_v34 = vadd.f32 %v1342_v32, %v1334_v31 }
 0xf64   :  { %2308 = vtanh.f32 %v2764_v34 }
 0xf67   :  { %v2307_v35 = vpop.eup %2306 }
 0xf68   :  { %1323 = vrot.lane.b32.xlu0 %v2307_v35, %s2411_s3 }
 0xf71   :  { %v2309_v38 = vpop.eup %2308 }
 0xf72   :  { %1347 = vrot.lane.b32.xlu1 %v2309_v38, %s2411_s3 }
 0xfda   :  { %v1324_v40 = vpop.permute.xlu0 %1323 }
 0xfdb   :  { %v1326_v39 = vmul.f32 %v2303_v20, %v1324_v40  ;;  %v1576_v40 = vld [vmem:[#allocation2 + $0x1c] sm:$0xf] }
 0xfdd   :  { %v2769_v41 = vpack.c.bf16 %v1326_v39, %v1326_v39 }
 0xfdf   :  { %1393 = vrot.lane.b32.xlu0 %v2769_v41, %s2409_s17 }
 0xfe4   :  { %v1348_v43 = vpop.permute.xlu1 %1347 }
 0xfe5   :  { %v1350_v42 = vmul.f32 %v2305_v25, %v1348_v43 }
 0xfe7   :  { %v2773_v44 = vpack.c.bf16 %v1350_v42, %v1350_v42 }
 0xfe9   :  { %1439 = vrot.lane.b32.xlu1 %v2773_v44, %s2409_s17 }
0x1051   :  { %v1394_v45 = vpop.permute.xlu0 %1393 }
0x1052   :  { %2139 = vmatmul.mubr.msk.bf16.vlgmr.msra.gmra.mxu0 %vm236_vm1, %v1394_v45 }
0x1053   :  { %2151 = vmatpush3.bf16.msra.mxu0 %v2497_v8  ;;  %2154 = vmatprep.mubr.msk.bf16.mxu0 %vm2408_vm0, %v2407_v4  ;;  %v1391_v8 = vld [vmem:[#allocation2 + $0x18] sm:$0xf] }
0x1054   :  { %2152 = vmatprep.subr.bf16.mxu0 %v2407_v4 }
0x1057   :  { %2153 = vmatpush3.bf16.msra.mxu0 %v2505_v10 }
0x1058   :  { %2166 = vmatprep.subr.mxu0 %v2407_v4 }
0x105b   :  { %v1440_v46 = vpop.permute.xlu1 %1439 }
0x105c   :  { %2147 = vmatmul.mubr.msk.bf16.vlgmr.msra.gmra.mxu1 %vm236_vm1, %v1440_v46 }
0x105d   :  { %2159 = vmatpush3.bf16.msra.mxu1 %v2523_v15  ;;  %2162 = vmatprep.mubr.msk.bf16.mxu1 %vm2408_vm0, %v2407_v4 }
0x105e   :  { %2160 = vmatprep.subr.bf16.mxu1 %v2407_v4 }
0x1061   :  { %2161 = vmatpush3.bf16.msra.mxu1 %v2535_v17 }
0x1112   :  { %v1432_v48 = vpop.f32.mrf.mxu0 }
0x1113   :  { %v1438_v49 = vadd.f32 %v1432_v48, %v1391_v8  ;;  %v1577_v8 = vld [vmem:[#allocation2] sm:$0xf] }
0x1114   :  { %v2140_v51 = vpop.f32.mrf.mxu0  ;;  %v1670_v48 = vrot.slane %v1577_v8, 2 }
0x1115   :  { %2310 = vtanh.f32 %v1438_v49  ;;  %v1973_v17 = vmul.f32 -1.442695, %v1438_v49 }
0x1116   :  { %v1435_v10 = vpop.f32.mrf.mxu0 }
0x1118   :  { %v2141_v52 = vpop.f32.mrf.mxu0 }
0x111c   :  { %v1478_v56 = vpop.f32.mrf.mxu1 }
0x111d   :  { %v1487_v57 = vadd.f32 %v1485_v54, %v1478_v56 }
0x111e   :  { %v2148_v59 = vpop.f32.mrf.mxu1 }
0x111f   :  { %2312 = vtanh.f32 %v1487_v57  ;;  %v1974_v63 = vmul.f32 -1.442695, %v1487_v57 }
0x1120   :  { %v1481_v15 = vpop.f32.mrf.mxu1  ;;  %2314 = vpow2.f32 %v1973_v17 }
0x1121   :  { %2316 = vpow2.f32 %v1974_v63 }
0x1122   :  { %v2311_v60 = vpop.eup %2310  ;;  %v2149_v61 = vpop.f32.mrf.mxu1 }
0x1123   :  { %1497 = vrot.lane.b32.xlu0 %v2311_v60, %s2411_s3 }
0x112c   :  { %v2313_v62 = vpop.eup %2312 }
0x112d   :  { %1521 = vrot.lane.b32.xlu1 %v2313_v62, %s2411_s3  ;;  %v2315_v0 = vpop.eup %2314 }
0x112e   :  { %v1491_v2 = vadd.f32 1.0, %v2315_v0  ;;  %v2317_v3 = vpop.eup %2316 }
0x112f   :  { %v1515_v6 = vadd.f32 1.0, %v2317_v3 }
0x1130   :  { %2318 = vrcp.f32 %v1491_v2 }
0x1131   :  { %2320 = vrcp.f32 %v1515_v6 }
0x113d   :  { %v2319_v7 = vpop.eup %2318 }
0x113e   :  { %v2321_v12 = vpop.eup %2320  ;;  %v1495_v16 = vmul.f32 %v2319_v7, %v2760_v30 }
0x113f   :  { %v1519_v23 = vmul.f32 %v2321_v12, %v2764_v34 }
0x1195   :  { %v1498_v9 = vpop.permute.xlu0 %1497 }
0x1196   :  { %v1500_v11 = vmul.f32 %v2319_v7, %v1498_v9 }
0x1198   :  { %1502 = vrot.lane.b32.xlu0 %v1500_v11, %s2409_s17 }
0x119f   :  { %v1522_v13 = vpop.permute.xlu1 %1521 }
0x11a0   :  { %v1524_v14 = vmul.f32 %v2321_v12, %v1522_v13 }
0x11a2   :  { %1526 = vrot.lane.b32.xlu1 %v1524_v14, %s2409_s17 }
0x120a   :  { %v1503_v19 = vpop.permute.xlu0 %1502 }
0x120b   :  { %v1505_v20 = vadd.f32 %v1503_v19, %v1495_v16 }
0x120d   :  { %2322 = vtanh.f32 %v1505_v20 }
0x1214   :  { %v1527_v24 = vpop.permute.xlu1 %1526 }
0x1215   :  { %v1529_v25 = vadd.f32 %v1527_v24, %v1519_v23  ;;  %v2412_v23 = vmov 1966171168  }
0x1216   :  { %v414_v24 = vunpack.c.l.s4 %v2412_v23 }
0x1217   :  { %2324 = vtanh.f32 %v1529_v25 }
0x121a   :  { %v2323_v26 = vpop.eup %2322 }
0x121b   :  { %1508 = vrot.lane.b32.xlu0 %v2323_v26, %s2411_s3  ;;  %v1795_v26 = vld [vmem:[%s2951_s6 + $0x38] sm:$0xff] }
0x1224   :  { %v2325_v27 = vpop.eup %2324 }
0x1225   :  { %1532 = vrot.lane.b32.xlu1 %v2325_v27, %s2411_s3  ;;  %v1793_v27 = vld [vmem:[%s2951_s6 + $0x28] sm:$0xff] }
0x128d   :  { %v1509_v28 = vpop.permute.xlu0 %1508 }
0x128e   :  { %v1511_v29 = vmul.f32 %v2319_v7, %v1509_v28 }
0x1290   :  { %v2798_v31 = vpack.c.bf16 %v1511_v29, %v1511_v29 }
0x1292   :  { %1578 = vrot.lane.b32.xlu0 %v2798_v31, %s2409_s17 }
0x1297   :  { %v1533_v30 = vpop.permute.xlu1 %1532 }
0x1298   :  { %v1535_v32 = vmul.f32 %v2321_v12, %v1533_v30 }
0x129a   :  { %v2802_v35 = vpack.c.bf16 %v1535_v32, %v1535_v32  ;;  %v1792_v32 = vld [vmem:[%s2951_s6 + $0x20] sm:$0xff] }
0x129c   :  { %1624 = vrot.lane.b32.xlu1 %v2802_v35, %s2409_s17 }
0x1304   :  { %v1579_v34 = vpop.permute.xlu0 %1578 }
0x1305   :  { %2155 = vmatmul.mubr.msk.bf16.vlgmr.msra.gmra.mxu0 %vm236_vm1, %v1579_v34  ;;  %v1791_v34 = vld [vmem:[%s2951_s6 + $0x18] sm:$0xff] }
0x1306   :  { %2182 = vmatprep.mubr.msk.f32.mxu0 %vm2408_vm0, %v2407_v4  ;;  %2167 = vmatpush3.msra.mxu0 %v1795_v26 }
0x1307   :  { %2168 = vmatprep.subr.mxu0 %v2407_v4 }
0x130e   :  { %v1625_v38 = vpop.permute.xlu1 %1624 }
0x130f   :  { %2163 = vmatmul.mubr.msk.bf16.vlgmr.msra.gmra.mxu1 %vm236_vm1, %v1625_v38 }
0x13c5   :  { %v1617_v39 = vpop.f32.mrf.mxu0 }
0x13c6   :  { %v1623_v43 = vadd.f32 %v1617_v39, %v1576_v40  ;;  %v1789_v39 = vld [vmem:[%s2951_s6 + $0x8] sm:$0xff] }
0x13c7   :  { %v2156_v42 = vpop.f32.mrf.mxu0 }
0x13c8   :  { %2326 = vtanh.f32 %v1623_v43  ;;  %v1977_v57 = vmul.f32 -1.442695, %v1623_v43 }
0x13c9   :  { %v1620_v45 = vpop.f32.mrf.mxu0 }
0x13ca   :  { %v1788_v45 = vld [vmem:[%s2951_s6] sm:$0xff] }
0x13cb   :  { %v2157_v46 = vpop.f32.mrf.mxu0 }
0x13cf   :  { %v1663_v49 = vpop.f32.mrf.mxu1 }
0x13d0   :  { %v1672_v51 = vadd.f32 %v1670_v48, %v1663_v49 }
0x13d1   :  { %v2164_v10 = vpop.f32.mrf.mxu1 }
0x13d2   :  { %2328 = vtanh.f32 %v1672_v51  ;;  %v1978_v59 = vmul.f32 -1.442695, %v1672_v51 }
0x13d3   :  { %v1666_v52 = vpop.f32.mrf.mxu1  ;;  %2330 = vpow2.f32 %v1977_v57 }
0x13d4   :  { %2332 = vpow2.f32 %v1978_v59 }
0x13d5   :  { %v2327_v53 = vpop.eup %2326  ;;  %v2165_v54 = vpop.f32.mrf.mxu1 }
0x13d6   :  { %1682 = vrot.lane.b32.xlu0 %v2327_v53, %s2411_s3 }
0x13df   :  { %v2329_v56 = vpop.eup %2328 }
0x13e0   :  { %1706 = vrot.lane.b32.xlu1 %v2329_v56, %s2411_s3  ;;  %v2331_v15 = vpop.eup %2330 }
0x13e1   :  { %v1676_v60 = vadd.f32 1.0, %v2331_v15  ;;  %v2333_v61 = vpop.eup %2332 }
0x13e2   :  { %v1700_v62 = vadd.f32 1.0, %v2333_v61 }
0x13e3   :  { %2334 = vrcp.f32 %v1676_v60 }
0x13e4   :  { %2336 = vrcp.f32 %v1700_v62 }
0x13f0   :  { %v2335_v17 = vpop.eup %2334 }
0x13f1   :  { %v2337_v2 = vpop.eup %2336  ;;  %v1680_v7 = vmul.f32 %v2335_v17, %v1505_v20  ;;  %v415_v20 = vunpack.c.0.s8 %v414_v24 }
0x13f2   :  { %v1704_v12 = vmul.f32 %v2337_v2, %v1529_v25  ;;  %v1794_v25 = vld [vmem:[%s2951_s6 + $0x30] sm:$0xff] }
0x13f3   :  { %2169 = vmatpush3.msra.mxu0 %v1794_v25  ;;  %v2828_v28 = vsub.s32 %v415_v20, %v2559_v21  ;;  %v1790_v21 = vld [vmem:[%s2951_s6 + $0x10] sm:$0xff]  ;;  %s2413_s6 = smov [#allocation5]  }
0x13f4   :  { %2170 = vmatprep.subr.mxu0 %v2407_v4 }
0x13f5   :  { %2171 = vmatpush3.msra.mxu0 %v1793_v27  ;;  %v419_v38 = vrot.slane %v2589_v33, %v2828_v28  ;;  %v609_v33 = vrot.slane %v2625_v18, %v2828_v28  ;;  %v798_v46 = vrot.slane %v2661_v1, %v2828_v28  ;;  %v440_v48 = vrot.slane %v2593_v37, %v2828_v28 }
0x13f6   :  { %2172 = vmatprep.subr.mxu0 %v2407_v4  ;;  %v630_v1 = vrot.slane %v2629_v22, %v2828_v28  ;;  %v1174_v37 = vrot.slane %v2733_v47, %v2828_v28  ;;  %v1359_v22 = vrot.slane %v2769_v41, %v2828_v28  ;;  %v1008_v47 = vrot.slane %v2701_v58, %v2828_v28 }
0x13f7   :  { %2173 = vmatpush3.msra.mxu0 %v1792_v32  ;;  %v426_v43 = vrot.slane %v419_v38, %v2828_v28  ;;  %v616_v18 = vrot.slane %v609_v33, %v2828_v28  ;;  %v805_v51 = vrot.slane %v798_v46, %v2828_v28  ;;  %v447_v10 = vrot.slane %v440_v48, %v2828_v28 }
0x13f8   :  { %2174 = vmatprep.subr.mxu0 %v2407_v4  ;;  %v637_v52 = vrot.slane %v630_v1, %v2828_v28  ;;  %v1181_v53 = vrot.slane %v1174_v37, %v2828_v28  ;;  %v1366_v57 = vrot.slane %v1359_v22, %v2828_v28  ;;  %v1194_v41 = vrot.slane %v2737_v50, %v2828_v28 }
0x13f9   :  { %2175 = vmatpush3.msra.mxu0 %v1791_v34  ;;  %v1015_v59 = vrot.slane %v1008_v47, %v2828_v28  ;;  %v1564_v61 = vrot.slane %v2802_v35, %v2828_v28 }
0x13fa   :  { %2176 = vmatprep.subr.mxu0 %v2407_v4  ;;  %v1201_v60 = vrot.slane %v1194_v41, %v2828_v28 }
0x13fb   :  { %2177 = vmatpush3.msra.mxu0 %v1790_v21 }
0x13fc   :  { %2178 = vmatprep.subr.mxu0 %v2407_v4 }
0x13fd   :  { %2179 = vmatpush3.msra.mxu0 %v1789_v39 }
0x13fe   :  { %2180 = vmatprep.subr.mxu0 %v2407_v4  ;;  %v987_v4 = vrot.slane %v2697_v55, %v2828_v28  ;;  %v819_v55 = vrot.slane %v2665_v5, %v2828_v28  ;;  %v1544_v5 = vrot.slane %v2798_v31, %v2828_v28  ;;  %v1379_v31 = vrot.slane %v2773_v44, %v2828_v28 }
0x13ff   :  { %2181 = vmatpush3.msra.mxu0 %v1788_v45 }
0x1400   :  { %v826_v54 = vrot.slane %v819_v55, %v2828_v28  ;;  %v1551_v15 = vrot.slane %v1544_v5, %v2828_v28 }
0x1448   :  { %v1683_v63 = vpop.permute.xlu0 %1682 }
0x1449   :  { %v1685_v0 = vmul.f32 %v2335_v17, %v1683_v63  ;;  %v1571_v63 = vrot.slane %v1564_v61, %v2828_v28 }
0x144b   :  { %1687 = vrot.lane.b32.xlu0 %v1685_v0, %s2409_s17 }
0x1452   :  { %v1707_v3 = vpop.permute.xlu1 %1706 }
0x1453   :  { %v1709_v6 = vmul.f32 %v2337_v2, %v1707_v3 }
0x1455   :  { %1711 = vrot.lane.b32.xlu1 %v1709_v6, %s2409_s17 }
0x14bd   :  { %v1688_v9 = vpop.permute.xlu0 %1687 }
0x14be   :  { %v1690_v11 = vadd.f32 %v1688_v9, %v1680_v7 }
0x14c0   :  { %2338 = vtanh.f32 %v1690_v11 }
0x14c7   :  { %v1712_v13 = vpop.permute.xlu1 %1711 }
0x14c8   :  { %v1714_v14 = vadd.f32 %v1712_v13, %v1704_v12 }
0x14ca   :  { %2340 = vtanh.f32 %v1714_v14 }
0x14cd   :  { %v2339_v16 = vpop.eup %2338 }
0x14ce   :  { %1693 = vrot.lane.b32.xlu0 %v2339_v16, %s2411_s3 }
0x14d7   :  { %v2341_v19 = vpop.eup %2340 }
0x14d8   :  { %1717 = vrot.lane.b32.xlu1 %v2341_v19, %s2411_s3 }
0x1540   :  { %v1694_v29 = vpop.permute.xlu0 %1693 }
0x1541   :  { %v1696_v30 = vmul.f32 %v2335_v17, %v1694_v29  ;;  %v1386_v17 = vrot.slane %v1379_v31, %v2828_v28 }
0x1543   :  { %v1768_v40 = vrot.slane %v1696_v30, %v2567_v36  ;;  %v1721_v56 = vpack.c.bf16 %v1696_v30, %v1696_v30 }
0x1545   :  { %1769 = vrot.lane.b32.xlu0 %v1768_v40, %s2409_s17  ;;  %v1729_v58 = vrot.slane %v1721_v56, %v2828_v28 }
0x1547   :  { %v1736_v50 = vrot.slane %v1729_v58, %v2828_v28 }
0x1549   :  { %427 = vrot.lane.b32.xlu0 %v426_v43, %s2409_s17 }
0x154a   :  { %v1718_v42 = vpop.permute.xlu1 %1717 }
0x154b   :  { %v1720_v8 = vmul.f32 %v2337_v2, %v1718_v42 }
0x154d   :  { %v1781_v49 = vrot.slane %v1720_v8, %v2567_v36  ;;  %617 = vrot.lane.b32.xlu0 %v616_v18, %s2409_s17  ;;  %v994_v36 = vrot.slane %v987_v4, %v2828_v28  ;;  %v1741_v62 = vpack.c.bf16 %v1720_v8, %v1720_v8 }
0x154f   :  { %1782 = vrot.lane.b32.xlu1 %v1781_v49, %s2411_s3  ;;  %v1749_v44 = vrot.slane %v1741_v62, %v2828_v28 }
0x1551   :  { %806 = vrot.lane.b32.xlu0 %v805_v51, %s2409_s17  ;;  %v1756_v0 = vrot.slane %v1749_v44, %v2828_v28 }
0x1553   :  { %448 = vrot.lane.b32.xlu1 %v447_v10, %s2411_s3 }
0x1555   :  { %995 = vrot.lane.b32.xlu0 %v994_v36, %s2409_s17 }
0x1557   :  { %638 = vrot.lane.b32.xlu1 %v637_v52, %s2411_s3 }
0x1559   :  { %1182 = vrot.lane.b32.xlu0 %v1181_v53, %s2409_s17 }
0x155b   :  { %827 = vrot.lane.b32.xlu1 %v826_v54, %s2411_s3 }
0x155d   :  { %1367 = vrot.lane.b32.xlu0 %v1366_v57, %s2409_s17 }
0x155f   :  { %1016 = vrot.lane.b32.xlu1 %v1015_v59, %s2411_s3 }
0x1561   :  { %1552 = vrot.lane.b32.xlu0 %v1551_v15, %s2409_s17 }
0x1563   :  { %1202 = vrot.lane.b32.xlu1 %v1201_v60, %s2411_s3 }
0x1565   :  { %1737 = vrot.lane.b32.xlu0 %v1736_v50, %s2409_s17  ;;  %s1896_s17 = sshll.u32 %s2413_s6, 4  ;;  %s1897_s17 = int_to_ptr.vmem [resolvable:$true] %s1896_s17 }
0x1566   :  { %s2342_s23 = scalar_lea.vmem %s1897_s17, 32  ;;  %p2347_p1 = scmp.lt.s32.totalorder %s1897_s17, %s1897_s17 }
0x1567   :  { %1387 = vrot.lane.b32.xlu1 %v1386_v17, %s2411_s3  ;;  %p2343_p0 = scmp.ne.s32.totalorder %s1897_s17, %s2342_s23  ;;  %p2348_p2 = scmp.lt.s32.totalorder %s2342_s23, %s2342_s23 }
0x1569   :  { %p2349_p3 = por %p2348_p2, %p2347_p1 }
0x156b   :  { %1572 = vrot.lane.b32.xlu1 %v1571_v63, %s2411_s3  ;;  %p2350_p4 = pnand %p2349_p3, %p2343_p0 }
0x156f   :  { %1757 = vrot.lane.b32.xlu1 %v1756_v0, %s2411_s3 }
0x15b7   :  { %v1770_v2 = vpop.permute.xlu0 %1769 }
0x15b8   :  { %1773 = vst.msk [vmem:[#allocation5] sm:$0x3] %vm1772_vm3, %v1770_v2 }
0x15bb   :  { %v428_v35 = vpop.permute.xlu0 %427 }
0x15bc   :  { %431 = vst.msk [vmem:[#allocation3] sm:$0x1] %vm430_vm4, %v428_v35 }
0x15bf   :  { %v618_v3 = vpop.permute.xlu0 %617 }
0x15c0   :  { %621 = vst.msk [vmem:[#allocation3 + $0x1] sm:$0x1] %vm430_vm4, %v618_v3 }
0x15c1   :  { %v1783_v6 = vpop.permute.xlu1 %1782 }
0x15c2   :  { %1786 = vst.msk [vmem:[#allocation5] sm:$0x3] %vm1785_vm5, %v1783_v6 }
0x15c3   :  { %v807_v7 = vpop.permute.xlu0 %806 }
0x15c4   :  { %810 = vst.msk [vmem:[#allocation3 + $0x2] sm:$0x1] %vm430_vm4, %v807_v7 }
0x15c5   :  { %v449_v9 = vpop.permute.xlu1 %448 }
0x15c6   :  { %453 = vst.msk [vmem:[#allocation3 + $0x7] sm:$0x1] %vm452_vm6, %v449_v9 }
0x15c7   :  { %v996_v11 = vpop.permute.xlu0 %995 }
0x15c8   :  { %999 = vst.msk [vmem:[#allocation3 + $0x3] sm:$0x1] %vm430_vm4, %v996_v11 }
0x15c9   :  { %v639_v12 = vpop.permute.xlu1 %638  ;;  %v1787_v13 = vld [vmem:[#allocation5] sm:$0x3] }
0x15ca   :  { %642 = vst.msk [vmem:[#allocation3 + $0x6] sm:$0x1] %vm452_vm6, %v639_v12  ;;  %2183 = vmatmul.mubr.msk.f32.vlgmr.msra.gmra.mxu0 %vm102_vm2, %v1787_v13 }
0x15cb   :  { %v1183_v14 = vpop.permute.xlu0 %1182 }
0x15cd   :  { %v828_v16 = vpop.permute.xlu1 %827 }
0x15ce   :  { %831 = vst.msk [vmem:[#allocation3 + $0x5] sm:$0x1] %vm452_vm6, %v828_v16 }
0x15cf   :  { %v1368_v19 = vpop.permute.xlu0 %1367 }
0x15d0   :  { %1370 = vst.msk [vmem:[#allocation3 + $0x5] sm:$0x1] %vm430_vm4, %v1368_v19 }
0x15d1   :  { %v1017_v23 = vpop.permute.xlu1 %1016 }
0x15d2   :  { %1020 = vst.msk [vmem:[#allocation3 + $0x4] sm:$0x1] %vm452_vm6, %v1017_v23 }
0x15d3   :  { %1185 = vst.msk [vmem:[#allocation3 + $0x4] sm:$0x1] %vm430_vm4, %v1183_v14  ;;  %v1553_v24 = vpop.permute.xlu0 %1552 }
0x15d4   :  { %1555 = vst.msk [vmem:[#allocation3 + $0x6] sm:$0x1] %vm430_vm4, %v1553_v24 }
0x15d5   :  { %v1203_v26 = vpop.permute.xlu1 %1202 }
0x15d6   :  { %1205 = vst.msk [vmem:[#allocation3 + $0x3] sm:$0x1] %vm452_vm6, %v1203_v26 }
0x15d7   :  { %v1738_v20 = vpop.permute.xlu0 %1737 }
0x15d8   :  { %1740 = vst.msk [vmem:[#allocation3 + $0x7] sm:$0x1] %vm430_vm4, %v1738_v20 }
0x15d9   :  { %v1388_v25 = vpop.permute.xlu1 %1387 }
0x15da   :  { %1390 = vst.msk [vmem:[#allocation3 + $0x2] sm:$0x1] %vm452_vm6, %v1388_v25 }
0x15dd   :  { %v1573_v27 = vpop.permute.xlu1 %1572 }
0x15de   :  { %1575 = vst.msk [vmem:[#allocation3 + $0x1] sm:$0x1] %vm452_vm6, %v1573_v27 }
0x15e1   :  { %v1758_v28 = vpop.permute.xlu1 %1757 }
0x15e2   :  { %1760 = vst.msk [vmem:[#allocation3] sm:$0x1] %vm452_vm6, %v1758_v28 }
0x15e3   :  { %2353 = shalt.err (!%p2350_p4)
}
0x15e4   :  { %1899 = dma.vmem_to_hbm [thread:$0]  %s1897_s17, 32, %s2954_s9, [#allocation6]  }
0x15e5   :  { %s2362_s4 = scalar_lea.vmem %s1884_s22, 128  ;;  %p2367_p6 = scmp.lt.s32.totalorder %s1884_s22, %s1884_s22 }
0x15e6   :  { %p2363_p5 = scmp.ne.s32.totalorder %s1884_s22, %s2362_s4  ;;  %p2368_p7 = scmp.lt.s32.totalorder %s2362_s4, %s2362_s4 }
0x15e8   :  { %p2369_p8 = por %p2368_p7, %p2367_p6 }
0x15ea   :  { %p2370_p9 = pnand %p2369_p8, %p2363_p5 }
0x15ec   :  { %2373 = shalt.err (!%p2370_p9)
}
0x15ed   :  { %s2415_s3 = smov 16   ;;  %s2416_s24 = smov 1   ;;  %v1979_v29 = vld [vmem:[%s2952_s7] ss:$0 sm:$0xff]  ;;  %vm1876_vm7 = vcmask 25600  }
0x15ee   :  { %1889 = dma.vmem_to_hbm [thread:$0]  %s1884_s22, 128, %s2953_s8, [#allocation4], %s2415_s3, %s2415_s3, %s2416_s24  }
0x15ef   :  { %s2417_s28 = smov [#allocation7]  }
0x15f0   :  { %s1906_s29 = sshll.u32 %s2417_s28, 4  ;;  %s1907_s29 = int_to_ptr.vmem [resolvable:$true] %s1906_s29 }
0x15f1   :  { %s2382_s9 = scalar_lea.vmem %s1907_s29, 32  ;;  %p2387_p11 = scmp.lt.s32.totalorder %s1907_s29, %s1907_s29 }
0x15f2   :  { %p2383_p10 = scmp.ne.s32.totalorder %s1907_s29, %s2382_s9  ;;  %p2388_p12 = scmp.lt.s32.totalorder %s2382_s9, %s2382_s9 }
0x15f4   :  { %p2389_p13 = por %p2388_p12, %p2387_p11 }
0x15f6   :  { %p2390_p0 = pnand %p2389_p13, %p2383_p10 }
0x168a   :  { %v1872_v30 = vpop.f32.mrf.mxu0 }
0x168b   :  { %v1873_v32 = vadd.f32 %v1979_v29, %v1872_v30 }
0x168c   :  { %v2184_v34 = vpop.f32.mrf.mxu0 }
0x168d   :  { %1877 = vst.msk [vmem:[#allocation7] sm:$0x3] %vm1876_vm7, %v1873_v32 }
0x168e   :  { %2393 = shalt.err (!%p2390_p0)
}
0x168f   :  { %1909 = dma.vmem_to_hbm [thread:$0]  %s1907_s29, 32, %s2955_s10, [#allocation6]  }
0x1690   :  { %2402 = dma.done.wait [#allocation4], 128  }
0x1691   :  { %2403 = vsyncadd [#allocation4], 4294967168 }
0x1692   :  { %2404 = dma.done.wait [#allocation6], 64  }
0x1693   :  { %2405 = vsyncadd [#allocation6], 4294967232 }
0x1694   :  { %1919 = vsyncpa [#allocation4], 1 }
0x1695   :  { %1920 = vsyncpa [#allocation6], 1 }

// kernel: bert_lstm_forward.2
= control target key start
LH: loop header
LB: loop body
LE: loop exit
PB: predicated region body
PF: predicated region fallthrough
CT: control target
= control target key end

     0   :  { %13 = vsyncpa [#allocation4], 0  ;;  %s3671_s0 = inlined_call_operand.vmem [shape: bf16[16,768], index: 0, kind: input, shape index: {}]   ;;  %s3672_s1 = inlined_call_operand.hbm [shape: bf16[768,256], index: 1, kind: input, shape index: {}]   ;;  %s3673_s2 = inlined_call_operand.vmem [shape: bf16[2,32,128], index: 2, kind: input, shape index: {}]   ;;  %s3674_s3 = inlined_call_operand.vmem [shape: f32[1,256], index: 3, kind: input, shape index: {}]   ;;  %s3675_s4 = inlined_call_operand.vmem [shape: f32[2,2,32], index: 4, kind: input, shape index: {}]   ;;  %s3676_s5 = inlined_call_operand.vmem [shape: f32[2,2,32], index: 5, kind: input, shape index: {}]   ;;  %s3677_s6 = inlined_call_operand.vmem [shape: bf16[8,2,64], index: 6, kind: output, shape index: {0}]   ;;  %s3678_s7 = inlined_call_operand.hbm [shape: f32[2,64], index: 7, kind: output, shape index: {1}]  }
   0x1   :  { %14 = vsyncpa [#allocation5], 0  ;;  %s3134_s24 = smov [#allocation3]  }
   0x2   :  { %s22_s25 = sshll.u32 %s3134_s24, 4  ;;  %s23_s25 = int_to_ptr.vmem [resolvable:$true] %s22_s25 }
   0x3   :  { %s3098_s26 = scalar_lea.vmem %s23_s25, 12288  ;;  %p3103_p1 = scmp.lt.s32.totalorder %s23_s25, %s23_s25 }
   0x4   :  { %p3099_p0 = scmp.ne.s32.totalorder %s23_s25, %s3098_s26  ;;  %p3104_p2 = scmp.lt.s32.totalorder %s3098_s26, %s3098_s26 }
   0x6   :  { %p3105_p3 = por %p3104_p2, %p3103_p1 }
   0x8   :  { %p3106_p4 = pnand %p3105_p3, %p3099_p0 }
   0xa   :  { %3109 = shalt.err (!%p3106_p4)
}
   0xb   :  { %s3135_s27 = smov 128   ;;  %s3136_s28 = smov 8  }
   0xc   :  { %28 = dma.hbm_to_vmem [thread:$0]  %s3672_s1, 12288, %s23_s25, [#allocation4], %s3135_s27, %s3135_s27, %s3136_s28  }
   0xd   :  { %3130 = dma.done.wait [#allocation4], 12288  }
   0xe   :  { %3131 = vsyncadd [#allocation4], 4294955008  ;;  %v2801_v0 = vld [vmem:[#allocation3 + $0x74] ss:$8 sps:$4 sm:$0xff]   ;;  %v2803_v1 = vld [vmem:[#allocation3 + $0x70] ss:$8 sps:$4 sm:$0xff]  }
   0xf   :  { %665 = vmatprep.subr.bf16.mxu0 %v2801_v0  ;;  %v2804_v2 = vld [vmem:[#allocation3 + $0x174] ss:$8 sps:$4 sm:$0xff]   ;;  %v2806_v3 = vld [vmem:[#allocation3 + $0x170] ss:$8 sps:$4 sm:$0xff]   ;;  %v2807_v4 = vld [vmem:[#allocation3 + $0x64] ss:$8 sps:$4 sm:$0xff]  }
  0x10   :  { %666 = vmatpush1.bf16.msra.mxu0 %v2803_v1  ;;  %v2809_v5 = vld [vmem:[#allocation3 + $0x60] ss:$8 sps:$4 sm:$0xff]   ;;  %708 = vmatprep.subr.bf16.mxu1 %v2804_v2  ;;  %v2810_v6 = vld [vmem:[#allocation3 + $0x164] ss:$8 sps:$4 sm:$0xff]   ;;  %v2813_v8 = vld [vmem:[#allocation3 + $0x54] ss:$8 sps:$4 sm:$0xff]  }
  0x11   :  { %709 = vmatpush1.bf16.msra.mxu1 %v2806_v3  ;;  %667 = vmatprep.subr.bf16.mxu0 %v2807_v4  ;;  %v2812_v7 = vld [vmem:[#allocation3 + $0x160] ss:$8 sps:$4 sm:$0xff]   ;;  %v2815_v9 = vld [vmem:[#allocation3 + $0x50] ss:$8 sps:$4 sm:$0xff]   ;;  %v2816_v10 = vld [vmem:[#allocation3 + $0x154] ss:$8 sps:$4 sm:$0xff]  }
  0x12   :  { %710 = vmatprep.subr.bf16.mxu1 %v2810_v6  ;;  %v2819_v11 = vld [vmem:[#allocation3 + $0x44] ss:$8 sps:$4 sm:$0xff]   ;;  %v2818_v12 = vld [vmem:[#allocation3 + $0x150] ss:$8 sps:$4 sm:$0xff]   ;;  %v2821_v14 = vld [vmem:[#allocation3 + $0x40] ss:$8 sps:$4 sm:$0xff]  }
  0x13   :  { %v2822_v13 = vld [vmem:[#allocation3 + $0x144] ss:$8 sps:$4 sm:$0xff]   ;;  %v2825_v15 = vld [vmem:[#allocation3 + $0x34] ss:$8 sps:$4 sm:$0xff]   ;;  %v2824_v16 = vld [vmem:[#allocation3 + $0x140] ss:$8 sps:$4 sm:$0xff]  }
  0x14   :  { %668 = vmatpush1.bf16.msra.mxu0 %v2809_v5  ;;  %v2828_v17 = vld [vmem:[#allocation3 + $0x134] ss:$8 sps:$4 sm:$0xff]   ;;  %v2827_v18 = vld [vmem:[#allocation3 + $0x30] ss:$8 sps:$4 sm:$0xff]   ;;  %v2831_v19 = vld [vmem:[#allocation3 + $0x24] ss:$8 sps:$4 sm:$0xff]  }
  0x15   :  { %669 = vmatprep.subr.bf16.mxu0 %v2813_v8  ;;  %711 = vmatpush1.bf16.msra.mxu1 %v2812_v7  ;;  %v2830_v20 = vld [vmem:[#allocation3 + $0x130] ss:$8 sps:$4 sm:$0xff]   ;;  %v2834_v21 = vld [vmem:[#allocation3 + $0x124] ss:$8 sps:$4 sm:$0xff]   ;;  %v2833_v22 = vld [vmem:[#allocation3 + $0x20] ss:$8 sps:$4 sm:$0xff]  }
  0x16   :  { %712 = vmatprep.subr.bf16.mxu1 %v2816_v10  ;;  %v2837_v23 = vld [vmem:[#allocation3 + $0x14] ss:$8 sps:$4 sm:$0xff]   ;;  %v2836_v24 = vld [vmem:[#allocation3 + $0x120] ss:$8 sps:$4 sm:$0xff]   ;;  %v2839_v26 = vld [vmem:[#allocation3 + $0x10] ss:$8 sps:$4 sm:$0xff]  }
  0x17   :  { %v2840_v25 = vld [vmem:[#allocation3 + $0x114] ss:$8 sps:$4 sm:$0xff]   ;;  %v2843_v27 = vld [vmem:[#allocation3 + $0x4] ss:$8 sps:$4 sm:$0xff]   ;;  %v2842_v28 = vld [vmem:[#allocation3 + $0x110] ss:$8 sps:$4 sm:$0xff]  }
  0x18   :  { %670 = vmatpush1.bf16.msra.mxu0 %v2815_v9  ;;  %v2846_v29 = vld [vmem:[#allocation3 + $0x104] ss:$8 sps:$4 sm:$0xff]   ;;  %v2845_v30 = vld [vmem:[#allocation3] ss:$8 sps:$4 sm:$0xff]   ;;  %v2849_v31 = vld [vmem:[#allocation3 + $0xf4] ss:$8 sps:$4 sm:$0xff]  }
  0x19   :  { %671 = vmatprep.subr.bf16.mxu0 %v2819_v11  ;;  %713 = vmatpush1.bf16.msra.mxu1 %v2818_v12  ;;  %v2848_v32 = vld [vmem:[#allocation3 + $0x100] ss:$8 sps:$4 sm:$0xff]   ;;  %v2852_v33 = vld [vmem:[#allocation3 + $0x1f4] ss:$8 sps:$4 sm:$0xff]   ;;  %v2851_v34 = vld [vmem:[#allocation3 + $0xf0] ss:$8 sps:$4 sm:$0xff]  }
  0x1a   :  { %714 = vmatprep.subr.bf16.mxu1 %v2822_v13  ;;  %v2855_v35 = vld [vmem:[#allocation3 + $0xe4] ss:$8 sps:$4 sm:$0xff]   ;;  %v2854_v36 = vld [vmem:[#allocation3 + $0x1f0] ss:$8 sps:$4 sm:$0xff]   ;;  %v2857_v38 = vld [vmem:[#allocation3 + $0xe0] ss:$8 sps:$4 sm:$0xff]  }
  0x1b   :  { %v2858_v37 = vld [vmem:[#allocation3 + $0x1e4] ss:$8 sps:$4 sm:$0xff]   ;;  %v2861_v39 = vld [vmem:[#allocation3 + $0xd4] ss:$8 sps:$4 sm:$0xff]   ;;  %v2860_v40 = vld [vmem:[#allocation3 + $0x1e0] ss:$8 sps:$4 sm:$0xff]  }
  0x1c   :  { %672 = vmatpush1.bf16.msra.mxu0 %v2821_v14  ;;  %v2864_v41 = vld [vmem:[#allocation3 + $0x1d4] ss:$8 sps:$4 sm:$0xff]   ;;  %v2863_v42 = vld [vmem:[#allocation3 + $0xd0] ss:$8 sps:$4 sm:$0xff]   ;;  %v2867_v43 = vld [vmem:[#allocation3 + $0xc4] ss:$8 sps:$4 sm:$0xff]  }
  0x1d   :  { %673 = vmatprep.subr.bf16.mxu0 %v2825_v15  ;;  %715 = vmatpush1.bf16.msra.mxu1 %v2824_v16  ;;  %v2866_v44 = vld [vmem:[#allocation3 + $0x1d0] ss:$8 sps:$4 sm:$0xff]   ;;  %v2870_v45 = vld [vmem:[#allocation3 + $0x1c4] ss:$8 sps:$4 sm:$0xff]   ;;  %v2869_v46 = vld [vmem:[#allocation3 + $0xc0] ss:$8 sps:$4 sm:$0xff]  }
  0x1e   :  { %716 = vmatprep.subr.bf16.mxu1 %v2828_v17  ;;  %v2898_v47 = vld [vmem:[%s3671_s0 + $0x4] ss:$24 sps:$4 sm:$0xff]   ;;  %v2872_v49 = vld [vmem:[#allocation3 + $0x1c0] ss:$8 sps:$4 sm:$0xff]   ;;  %v2875_v52 = vld [vmem:[#allocation3 + $0xb0] ss:$8 sps:$4 sm:$0xff]  }
  0x1f   :  { %v2873_v48 = vld [vmem:[#allocation3 + $0xb4] ss:$8 sps:$4 sm:$0xff]   ;;  %697 = vmatprep.mubr.bf16.mxu0 %v2898_v47  ;;  %v2905_v51 = vld [vmem:[%s3671_s0 + $0xc] ss:$24 sps:$4 sm:$0xff]   ;;  %v2878_v54 = vld [vmem:[#allocation3 + $0x1b0] ss:$8 sps:$4 sm:$0xff]  }
  0x20   :  { %674 = vmatpush1.bf16.msra.mxu0 %v2827_v18  ;;  %v2876_v50 = vld [vmem:[#allocation3 + $0x1b4] ss:$8 sps:$4 sm:$0xff]   ;;  %v2879_v53 = vld [vmem:[#allocation3 + $0xa4] ss:$8 sps:$4 sm:$0xff]   ;;  %740 = vmatprep.mubr.bf16.mxu1 %v2905_v51  ;;  %v2881_v56 = vld [vmem:[#allocation3 + $0xa0] ss:$8 sps:$4 sm:$0xff]  }
  0x21   :  { %675 = vmatprep.subr.bf16.mxu0 %v2831_v19  ;;  %717 = vmatpush1.bf16.msra.mxu1 %v2830_v20  ;;  %v2882_v55 = vld [vmem:[#allocation3 + $0x1a4] ss:$8 sps:$4 sm:$0xff]   ;;  %v2885_v57 = vld [vmem:[#allocation3 + $0x94] ss:$8 sps:$4 sm:$0xff]   ;;  %v2884_v58 = vld [vmem:[#allocation3 + $0x1a0] ss:$8 sps:$4 sm:$0xff]  }
  0x22   :  { %718 = vmatprep.subr.bf16.mxu1 %v2834_v21  ;;  %v2888_v59 = vld [vmem:[#allocation3 + $0x194] ss:$8 sps:$4 sm:$0xff]   ;;  %v2887_v60 = vld [vmem:[#allocation3 + $0x90] ss:$8 sps:$4 sm:$0xff]   ;;  %v2891_v61 = vld [vmem:[#allocation3 + $0x84] ss:$8 sps:$4 sm:$0xff]  }
  0x23   :  { %v2890_v62 = vld [vmem:[#allocation3 + $0x190] ss:$8 sps:$4 sm:$0xff]   ;;  %v2894_v63 = vld [vmem:[#allocation3 + $0x184] ss:$8 sps:$4 sm:$0xff]   ;;  %v2893_v0 = vld [vmem:[#allocation3 + $0x80] ss:$8 sps:$4 sm:$0xff]  }
  0x24   :  { %676 = vmatpush1.bf16.msra.mxu0 %v2833_v22  ;;  %v2902_v1 = vld [vmem:[#allocation3 + $0x274] ss:$8 sps:$4 sm:$0xff]   ;;  %v2899_v2 = vld [vmem:[#allocation3 + $0x180] ss:$8 sps:$4 sm:$0xff]   ;;  %v2900_v4 = vld [vmem:[#allocation3 + $0x270] ss:$8 sps:$4 sm:$0xff]  }
  0x25   :  { %677 = vmatprep.subr.bf16.mxu0 %v2837_v23  ;;  %719 = vmatpush1.bf16.msra.mxu1 %v2836_v24  ;;  %v2896_v3 = vld [vmem:[%s3671_s0] ss:$24 sps:$4 sm:$0xff]   ;;  %v2908_v6 = vld [vmem:[#allocation3 + $0x264] ss:$8 sps:$4 sm:$0xff]   ;;  %v3137_v8 = vmov 0.0   ;;  %vm3138_vm0 = vmmov 0  }
  0x26   :  { %720 = vmatprep.subr.bf16.mxu1 %v2840_v25  ;;  %v2903_v5 = vld [vmem:[%s3671_s0 + $0x8] ss:$24 sps:$4 sm:$0xff]   ;;  %v2911_v9 = vld [vmem:[#allocation3 + $0x254] ss:$8 sps:$4 sm:$0xff]   ;;  %v2909_v14 = vld [vmem:[#allocation3 + $0x250] ss:$8 sps:$4 sm:$0xff]  }
  0x27   :  { %v2906_v7 = vld [vmem:[#allocation3 + $0x260] ss:$8 sps:$4 sm:$0xff]   ;;  %v2953_v10 = vld [vmem:[%s3671_s0 + $0x14] ss:$24 sps:$4 sm:$0xff]   ;;  %vm881_vm1 = vcmask 261120   ;;  %v3227_v18 = vld [vmem:[%s3673_s2 + $0x18] sm:$0xff]  }
  0x28   :  { %678 = vmatpush1.bf16.msra.mxu0 %v2839_v26  ;;  %v3206_v11 = vld [vmem:[%s3673_s2 + $0x8] sm:$0xff]   ;;  %v3211_v12 = vld [vmem:[%s3673_s2] sm:$0xff]   ;;  %s3139_s27 = smov 32   ;;  %v2917_v20 = vld [vmem:[#allocation3 + $0x234] ss:$8 sps:$4 sm:$0xff]   ;;  %vm1097_vm2 = vcmask 516352  }
  0x29   :  { %679 = vmatprep.subr.bf16.mxu0 %v2843_v27  ;;  %721 = vmatpush1.bf16.msra.mxu1 %v2842_v28  ;;  %v859_v13 = vld [vmem:[%s3675_s4] sm:$0x3]  ;;  %v2914_v15 = vld [vmem:[#allocation3 + $0x244] ss:$8 sps:$4 sm:$0xff]   ;;  %v3236_v21 = vld [vmem:[%s3673_s2 + $0x10] sm:$0xff]   ;;  %vm1075_vm3 = vcmask 253952  }
  0x2a   :  { %722 = vmatprep.subr.bf16.mxu1 %v2846_v29  ;;  %v868_v16 = vpack.c.bf16 %v859_v13, %v859_v13  ;;  %v2570_v17 = vld.sshfl [vmem:[%s3676_s5] sm:$0x3 pattern:$0x76325410]  ;;  %v2561_v22 = vld [vmem:[%s3675_s4 + $0x2] sm:$0x3] }
  0x2b   :  { %1001 = vrot.lane.b32.xlu1 %v2570_v17, %s3139_s27  ;;  %v2912_v19 = vld [vmem:[#allocation3 + $0x240] ss:$8 sps:$4 sm:$0xff]   ;;  %v2915_v23 = vld [vmem:[#allocation3 + $0x230] ss:$8 sps:$4 sm:$0xff]   ;;  %v2920_v24 = vld [vmem:[#allocation3 + $0x224] ss:$8 sps:$4 sm:$0xff]   ;;  %v926_v25 = vpack.c.bf16 %v2561_v22, %v2561_v22 }
  0x2c   :  { %680 = vmatpush1.bf16.msra.mxu0 %v2845_v30  ;;  %v2918_v26 = vld [vmem:[#allocation3 + $0x220] ss:$8 sps:$4 sm:$0xff]   ;;  %v2923_v27 = vld [vmem:[#allocation3 + $0x214] ss:$8 sps:$4 sm:$0xff]   ;;  %v2921_v28 = vld [vmem:[#allocation3 + $0x210] ss:$8 sps:$4 sm:$0xff]  }
  0x2d   :  { %681 = vmatprep.subr.bf16.mxu0 %v2849_v31  ;;  %723 = vmatpush1.bf16.msra.mxu1 %v2848_v32  ;;  %v2926_v29 = vld [vmem:[#allocation3 + $0x204] ss:$8 sps:$4 sm:$0xff]   ;;  %v2924_v30 = vld [vmem:[#allocation3 + $0x200] ss:$8 sps:$4 sm:$0xff]   ;;  %v2929_v31 = vld [vmem:[#allocation3 + $0x2f4] ss:$8 sps:$4 sm:$0xff]  }
  0x2e   :  { %724 = vmatprep.subr.bf16.mxu1 %v2852_v33  ;;  %v2927_v32 = vld [vmem:[#allocation3 + $0x2f0] ss:$8 sps:$4 sm:$0xff]   ;;  %v2932_v33 = vld [vmem:[#allocation3 + $0x2e4] ss:$8 sps:$4 sm:$0xff]   ;;  %vm2417_vm4 = vcmask 254976   ;;  %s3143_s19 = smov [#allocation6]  }
  0x2f   :  { %v2951_v47 = vld [vmem:[%s3671_s0 + $0x10] ss:$24 sps:$4 sm:$0xff]   ;;  %s2440_s20 = sshll.u32 %s3143_s19, 4  ;;  %vm2430_vm5 = vcmask 517376   ;;  %s2441_s20 = int_to_ptr.vmem [resolvable:$true] %s2440_s20 }
  0x30   :  { %682 = vmatpush2.bf16.msra.mxu0 %v2851_v34  ;;  %v2930_v34 = vld [vmem:[#allocation3 + $0x2e0] ss:$8 sps:$4 sm:$0xff]   ;;  %s3110_s21 = scalar_lea.vmem %s2441_s20, 32  ;;  %p3115_p6 = scmp.lt.s32.totalorder %s2441_s20, %s2441_s20 }
  0x31   :  { %683 = vmatprep.subr.bf16.mxu0 %v2855_v35  ;;  %725 = vmatpush2.bf16.msra.mxu1 %v2854_v36  ;;  %v2935_v35 = vld [vmem:[#allocation3 + $0x2d4] ss:$8 sps:$4 sm:$0xff]   ;;  %v2933_v36 = vld [vmem:[#allocation3 + $0x2d0] ss:$8 sps:$4 sm:$0xff]   ;;  %p3111_p5 = scmp.ne.s32.totalorder %s2441_s20, %s3110_s21  ;;  %p3116_p7 = scmp.lt.s32.totalorder %s3110_s21, %s3110_s21 }
  0x32   :  { %726 = vmatprep.subr.bf16.mxu1 %v2858_v37  ;;  %v2938_v37 = vld [vmem:[#allocation3 + $0x2c4] ss:$8 sps:$4 sm:$0xff]  }
  0x33   :  { %p3117_p8 = por %p3116_p7, %p3115_p6 }
  0x34   :  { %684 = vmatpush2.bf16.msra.mxu0 %v2857_v38  ;;  %v2936_v38 = vld [vmem:[#allocation3 + $0x2c0] ss:$8 sps:$4 sm:$0xff]  }
  0x35   :  { %685 = vmatprep.subr.bf16.mxu0 %v2861_v39  ;;  %727 = vmatpush2.bf16.msra.mxu1 %v2860_v40  ;;  %v2941_v39 = vld [vmem:[#allocation3 + $0x2b4] ss:$8 sps:$4 sm:$0xff]   ;;  %v2939_v40 = vld [vmem:[#allocation3 + $0x2b0] ss:$8 sps:$4 sm:$0xff]   ;;  %p3118_p9 = pnand %p3117_p8, %p3111_p5 }
  0x36   :  { %728 = vmatprep.subr.bf16.mxu1 %v2864_v41  ;;  %v2944_v41 = vld [vmem:[#allocation3 + $0x2a4] ss:$8 sps:$4 sm:$0xff]  }
  0x38   :  { %686 = vmatpush2.bf16.msra.mxu0 %v2863_v42  ;;  %v2942_v42 = vld [vmem:[#allocation3 + $0x2a0] ss:$8 sps:$4 sm:$0xff]  }
  0x39   :  { %687 = vmatprep.subr.bf16.mxu0 %v2867_v43  ;;  %729 = vmatpush2.bf16.msra.mxu1 %v2866_v44  ;;  %v2947_v43 = vld [vmem:[#allocation3 + $0x294] ss:$8 sps:$4 sm:$0xff]   ;;  %v2945_v44 = vld [vmem:[#allocation3 + $0x290] ss:$8 sps:$4 sm:$0xff]  }
  0x3a   :  { %730 = vmatprep.subr.bf16.mxu1 %v2870_v45  ;;  %v2950_v45 = vld [vmem:[#allocation3 + $0x284] ss:$8 sps:$4 sm:$0xff]  }
  0x3c   :  { %688 = vmatpush2.bf16.msra.mxu0 %v2869_v46  ;;  %v2948_v46 = vld [vmem:[#allocation3 + $0x280] ss:$8 sps:$4 sm:$0xff]  }
  0x3d   :  { %689 = vmatprep.subr.bf16.mxu0 %v2873_v48  ;;  %731 = vmatpush2.bf16.msra.mxu1 %v2872_v49 }
  0x3e   :  { %732 = vmatprep.subr.bf16.mxu1 %v2876_v50 }
  0x40   :  { %690 = vmatpush2.bf16.msra.mxu0 %v2875_v52 }
  0x41   :  { %691 = vmatprep.subr.bf16.mxu0 %v2879_v53  ;;  %733 = vmatpush2.bf16.msra.mxu1 %v2878_v54 }
  0x42   :  { %734 = vmatprep.subr.bf16.mxu1 %v2882_v55 }
  0x44   :  { %692 = vmatpush2.bf16.msra.mxu0 %v2881_v56 }
  0x45   :  { %693 = vmatprep.subr.bf16.mxu0 %v2885_v57  ;;  %735 = vmatpush2.bf16.msra.mxu1 %v2884_v58 }
  0x46   :  { %736 = vmatprep.subr.bf16.mxu1 %v2888_v59 }
  0x48   :  { %694 = vmatpush2.bf16.msra.mxu0 %v2887_v60  ;;  %v145_v60 = vlaneseq }
  0x49   :  { %695 = vmatprep.subr.bf16.mxu0 %v2891_v61  ;;  %737 = vmatpush2.bf16.msra.mxu1 %v2890_v62 }
  0x4a   :  { %738 = vmatprep.subr.bf16.mxu1 %v2894_v63  ;;  %v3263_v61 = vshrl.u32 %v145_v60, 7 }
  0x4c   :  { %696 = vmatpush2.bf16.msra.mxu0 %v2893_v0  ;;  %v147_v63 = vsub.s32 0, %v3263_v61  ;;  %v151_v0 = vsub.s32 1, %v3263_v61 }
  0x4d   :  { %751 = vmatprep.subr.bf16.mxu0 %v2902_v1  ;;  %739 = vmatpush2.bf16.msra.mxu1 %v2899_v2  ;;  %v143_v1 = vld [vmem:[%s3674_s3] sm:$0x3]  ;;  %s3141_s3 = smov 64  }
  0x4e   :  { %2663 = vmatprep.subr.bf16.mxu1 %v3137_v8 }
  0x4f   :  { %698 = vmatmul.mubr.bf16.vlgmr.msra.gmra.mxu0 %v2896_v3  ;;  %v148_v3 = vrot.slane %v143_v1, %v147_v63 }
  0x50   :  { %752 = vmatpush1.bf16.msra.mxu0 %v2900_v4  ;;  %741 = vmatmul.mubr.bf16.vlgmr.msra.gmra.mxu1 %v2903_v5  ;;  %v152_v4 = vrot.slane %v143_v1, %v151_v0 }
  0x51   :  { %753 = vmatprep.subr.bf16.mxu0 %v2908_v6  ;;  %783 = vmatprep.mubr.bf16.mxu0 %v2953_v10  ;;  %v3140_v6 = vmov 1983009808  }
  0x52   :  { %2667 = vmatprep.mubr.msk.bf16.mxu1 %vm3138_vm0, %v3137_v8  ;;  %2664 = vmatpush3.bf16.msra.mxu1 %v3206_v11 }
  0x53   :  { %2665 = vmatprep.subr.bf16.mxu1 %v3137_v8 }
  0x54   :  { %754 = vmatpush1.bf16.msra.mxu0 %v2906_v7  ;;  %v801_v7 = vunpack.c.l.s4 %v3140_v6 }
  0x55   :  { %755 = vmatprep.subr.bf16.mxu0 %v2911_v9 }
  0x56   :  { %2666 = vmatpush3.bf16.msra.mxu1 %v3211_v12 }
  0x57   :  { %2671 = vmatprep.subr.bf16.mxu1 %v3137_v8 }
  0x58   :  { %756 = vmatpush1.bf16.msra.mxu0 %v2909_v14  ;;  %v802_v14 = vunpack.c.0.s8 %v801_v7 }
  0x59   :  { %757 = vmatprep.subr.bf16.mxu0 %v2914_v15  ;;  %2668 = vmatmul.mubr.msk.bf16.vlgmr.msra.gmra.mxu1 %vm881_vm1, %v868_v16 }
  0x5a   :  { %2672 = vmatpush3.bf16.msra.mxu1 %v3227_v18  ;;  %2675 = vmatprep.mubr.msk.bf16.mxu1 %vm3138_vm0, %v3137_v8 }
  0x5b   :  { %2673 = vmatprep.subr.bf16.mxu1 %v3137_v8 }
  0x5c   :  { %758 = vmatpush1.bf16.msra.mxu0 %v2912_v19 }
  0x5d   :  { %759 = vmatprep.subr.bf16.mxu0 %v2917_v20 }
  0x5e   :  { %2674 = vmatpush3.bf16.msra.mxu1 %v3236_v21 }
  0x5f   :  { %2679 = vmatprep.subr.bf16.mxu1 %v3137_v8 }
  0x60   :  { %760 = vmatpush1.bf16.msra.mxu0 %v2915_v23  ;;  %v3271_v23 = vsub.s32 %v802_v14, %v3263_v61 }
  0x61   :  { %761 = vmatprep.subr.bf16.mxu0 %v2920_v24  ;;  %2676 = vmatmul.mubr.msk.bf16.vlgmr.msra.gmra.mxu1 %vm881_vm1, %v926_v25 }
  0x62   :  { %2680 = vmatpush3.bf16.msra.mxu1 %v3206_v11  ;;  %2683 = vmatprep.mubr.msk.bf16.mxu1 %vm3138_vm0, %v3137_v8 }
  0x63   :  { %2681 = vmatprep.subr.bf16.mxu1 %v3137_v8 }
  0x64   :  { %762 = vmatpush1.bf16.msra.mxu0 %v2918_v26 }
  0x65   :  { %763 = vmatprep.subr.bf16.mxu0 %v2923_v27 }
  0x66   :  { %2682 = vmatpush3.bf16.msra.mxu1 %v3211_v12 }
  0x67   :  { %2687 = vmatprep.subr.bf16.mxu1 %v3137_v8 }
  0x68   :  { %764 = vmatpush1.bf16.msra.mxu0 %v2921_v28 }
  0x69   :  { %765 = vmatprep.subr.bf16.mxu0 %v2926_v29 }
  0x6c   :  { %766 = vmatpush1.bf16.msra.mxu0 %v2924_v30 }
  0x6d   :  { %767 = vmatprep.subr.bf16.mxu0 %v2929_v31 }
  0x70   :  { %768 = vmatpush2.bf16.msra.mxu0 %v2927_v32 }
  0x71   :  { %769 = vmatprep.subr.bf16.mxu0 %v2932_v33 }
  0x74   :  { %770 = vmatpush2.bf16.msra.mxu0 %v2930_v34 }
  0x75   :  { %771 = vmatprep.subr.bf16.mxu0 %v2935_v35 }
  0x78   :  { %772 = vmatpush2.bf16.msra.mxu0 %v2933_v36 }
  0x79   :  { %773 = vmatprep.subr.bf16.mxu0 %v2938_v37 }
  0x7c   :  { %774 = vmatpush2.bf16.msra.mxu0 %v2936_v38 }
  0x7d   :  { %775 = vmatprep.subr.bf16.mxu0 %v2941_v39 }
  0x80   :  { %776 = vmatpush2.bf16.msra.mxu0 %v2939_v40 }
  0x81   :  { %777 = vmatprep.subr.bf16.mxu0 %v2944_v41 }
  0x84   :  { %778 = vmatpush2.bf16.msra.mxu0 %v2942_v42 }
  0x85   :  { %779 = vmatprep.subr.bf16.mxu0 %v2947_v43 }
  0x88   :  { %780 = vmatpush2.bf16.msra.mxu0 %v2945_v44 }
  0x89   :  { %781 = vmatprep.subr.bf16.mxu0 %v2950_v45 }
  0x8c   :  { %782 = vmatpush2.bf16.msra.mxu0 %v2948_v46 }
  0x8d   :  { %2727 = vmatprep.subr.bf16.mxu0 %v3137_v8 }
  0x8f   :  { %784 = vmatmul.mubr.bf16.vlgmr.msra.gmra.mxu0 %v2951_v47 }
  0x90   :  { %2728 = vmatpush3.bf16.msra.mxu0 %v3206_v11  ;;  %2731 = vmatprep.mubr.msk.bf16.mxu0 %vm3138_vm0, %v3137_v8 }
  0x91   :  { %2729 = vmatprep.subr.bf16.mxu0 %v3137_v8 }
  0x94   :  { %2730 = vmatpush3.bf16.msra.mxu0 %v3211_v12 }
  0x95   :  { %2743 = vmatprep.subr.bf16.mxu0 %v3137_v8 }
  0x9d   :  { %v1002_v1 = vpop.permute.xlu1 %1001 }
 0x10f   :  { %v699_v62 = vpop.f32.mrf.mxu0 }
 0x110   :  { %v742_v48 = vpop.f32.mrf.mxu1  ;;  %v700_v9 = vadd.f32 %v699_v62, %v148_v3 }
 0x111   :  { %v701_v2 = vpop.f32.mrf.mxu0 }
 0x112   :  { %v744_v49 = vpop.f32.mrf.mxu1  ;;  %v702_v10 = vadd.f32 %v701_v2, %v152_v4  ;;  %v743_v16 = vadd.f32 %v742_v48, %v700_v9 }
 0x113   :  { %v703_v5 = vpop.f32.mrf.mxu0 }
 0x114   :  { %v746_v50 = vpop.f32.mrf.mxu1  ;;  %v704_v17 = vadd.f32 %v703_v5, %v148_v3  ;;  %v745_v19 = vadd.f32 %v744_v49, %v702_v10 }
 0x115   :  { %v705_v13 = vpop.f32.mrf.mxu0 }
 0x116   :  { %v748_v51 = vpop.f32.mrf.mxu1  ;;  %v706_v20 = vadd.f32 %v705_v13, %v152_v4  ;;  %v747_v27 = vadd.f32 %v746_v50, %v704_v17 }
 0x118   :  { %v749_v28 = vadd.f32 %v748_v51, %v706_v20  ;;  %v2572_v51 = vld.sshfl [vmem:[%s3676_s5 + $0x2] sm:$0x3 pattern:$0x76325410] }
 0x119   :  { %v919_v52 = vpop.f32.mrf.mxu1 }
 0x11b   :  { %v2669_v53 = vpop.f32.mrf.mxu1 }
 0x11d   :  { %v922_v54 = vpop.f32.mrf.mxu1 }
 0x11f   :  { %v2670_v55 = vpop.f32.mrf.mxu1 }
 0x121   :  { %v976_v56 = vpop.f32.mrf.mxu1 }
 0x123   :  { %v2677_v57 = vpop.f32.mrf.mxu1 }
 0x125   :  { %v979_v58 = vpop.f32.mrf.mxu1 }
 0x127   :  { %v2678_v59 = vpop.f32.mrf.mxu1 }
 0x14f   :  { %v785_v15 = vpop.f32.mrf.mxu0 }
 0x150   :  { %v786_v24 = vadd.f32 %v785_v15, %v743_v16 }
 0x151   :  { %v787_v22 = vpop.f32.mrf.mxu0 }
 0x152   :  { %v788_v25 = vadd.f32 %v787_v22, %v745_v19 }
 0x153   :  { %v789_v26 = vpop.f32.mrf.mxu0 }
 0x154   :  { %v798_v29 = vcombine.low %v786_v24, %v788_v25  ;;  %v799_v30 = vcombine.high %v786_v24, %v788_v25  ;;  %v790_v34 = vadd.f32 %v789_v26, %v747_v27 }
 0x155   :  { %v791_v31 = vpop.f32.mrf.mxu0 }
 0x156   :  { %v806_v32 = vrot.slane %v798_v29, %v3271_v23  ;;  %v813_v33 = vrot.slane %v799_v30, %v3271_v23  ;;  %2553 = vst.sshfl [vmem:[#allocation2] sm:$0x33 pattern:$0x76325410] %v798_v29  ;;  %v792_v35 = vadd.f32 %v791_v31, %v749_v28 }
 0x157   :  { %2554 = vst.sshfl [vmem:[#allocation2 + $0x8] sm:$0x33 pattern:$0x76325410] %v799_v30 }
 0x158   :  { %v814_v36 = vcombine.high %v806_v32, %v806_v32  ;;  %v815_v37 = vcombine.high %v813_v33, %v813_v33  ;;  %v816_v38 = vcombine.low %v790_v34, %v792_v35  ;;  %v817_v39 = vcombine.high %v790_v34, %v792_v35 }
 0x15a   :  { %843 = vst [vmem:[#allocation2 + $0x4] sm:$0xf] %v814_v36  ;;  %845 = vst [vmem:[#allocation2 + $0xc] sm:$0xf] %v815_v37  ;;  %v824_v40 = vrot.slane %v816_v38, %v3271_v23  ;;  %v831_v41 = vrot.slane %v817_v39, %v3271_v23 }
 0x15b   :  { %2555 = vst.sshfl [vmem:[#allocation2 + $0x10] sm:$0x33 pattern:$0x76325410] %v816_v38 }
 0x15c   :  { %2556 = vst.sshfl [vmem:[#allocation2 + $0x18] sm:$0x33 pattern:$0x76325410] %v817_v39  ;;  %v832_v42 = vcombine.high %v824_v40, %v824_v40  ;;  %v833_v43 = vcombine.high %v831_v41, %v831_v41 }
 0x15d   :  { %v865_v44 = vld [vmem:[#allocation2] sm:$0xf] }
 0x15e   :  { %847 = vst [vmem:[#allocation2 + $0x14] sm:$0xf] %v832_v42  ;;  %849 = vst [vmem:[#allocation2 + $0x1c] sm:$0xf] %v833_v43  ;;  %v925_v45 = vadd.f32 %v919_v52, %v865_v44 }
 0x160   :  { %2958 = vtanh.f32 %v925_v45  ;;  %v2569_v53 = vmul.f32 -1.442695, %v925_v45 }
 0x161   :  { %v1100_v25 = vld [vmem:[#allocation2 + $0x4] sm:$0xf] }
 0x163   :  { %v1102_v31 = vld [vmem:[#allocation2 + $0x18] sm:$0xf] }
 0x164   :  { %v1195_v32 = vrot.slane %v1102_v31, 2 }
 0x165   :  { %v867_v46 = vld [vmem:[#allocation2 + $0x1c] sm:$0xf] }
 0x166   :  { %v983_v47 = vrot.slane %v867_v46, 2 }
 0x168   :  { %v985_v48 = vadd.f32 %v983_v47, %v976_v56 }
 0x16a   :  { %2960 = vtanh.f32 %v985_v48  ;;  %v2571_v52 = vmul.f32 -1.442695, %v985_v48 }
 0x16b   :  { %2962 = vpow2.f32 %v2569_v53 }
 0x16c   :  { %2964 = vpow2.f32 %v2571_v52 }
 0x16d   :  { %v2959_v49 = vpop.eup %2958 }
 0x16e   :  { %1006 = vrot.lane.b32.xlu0 %v2959_v49, %s3141_s3 }
 0x177   :  { %v2961_v50 = vpop.eup %2960 }
 0x178   :  { %1041 = vrot.lane.b32.xlu0 %v2961_v50, %s3141_s3  ;;  %v2963_v54 = vpop.eup %2962 }
 0x179   :  { %v989_v55 = vadd.f32 1.0, %v2963_v54  ;;  %v2965_v56 = vpop.eup %2964 }
 0x17a   :  { %v1024_v57 = vadd.f32 1.0, %v2965_v56 }
 0x17b   :  { %2966 = vrcp.f32 %v989_v55 }
 0x17c   :  { %1036 = vrot.lane.b32.xlu0 %v2572_v51, %s3139_s27  ;;  %2968 = vrcp.f32 %v1024_v57 }
 0x188   :  { %v2967_v58 = vpop.eup %2966 }
 0x189   :  { %v2969_v62 = vpop.eup %2968  ;;  %v1004_v2 = vmul.f32 %v2967_v58, %v1002_v1 }
 0x1e0   :  { %v1007_v59 = vpop.permute.xlu0 %1006 }
 0x1e1   :  { %v1009_v60 = vmul.f32 %v2967_v58, %v1007_v59 }
 0x1e3   :  { %1011 = vrot.lane.b32.xlu1 %v1009_v60, %s3139_s27 }
 0x1ea   :  { %v1042_v63 = vpop.permute.xlu0 %1041 }
 0x1eb   :  { %v1044_v0 = vmul.f32 %v2969_v62, %v1042_v63 }
 0x1ed   :  { %1046 = vrot.lane.b32.xlu1 %v1044_v0, %s3139_s27 }
 0x1ee   :  { %v1037_v5 = vpop.permute.xlu0 %1036 }
 0x1ef   :  { %v1039_v6 = vmul.f32 %v2969_v62, %v1037_v5  ;;  %v1289_v5 = vld [vmem:[#allocation2 + $0x8] sm:$0xf] }
 0x255   :  { %v1012_v3 = vpop.permute.xlu1 %1011 }
 0x256   :  { %v3285_v4 = vadd.f32 %v1012_v3, %v1004_v2 }
 0x258   :  { %2970 = vtanh.f32 %v3285_v4 }
 0x25f   :  { %v1047_v7 = vpop.permute.xlu1 %1046 }
 0x260   :  { %v3288_v9 = vadd.f32 %v1047_v7, %v1039_v6 }
 0x262   :  { %2972 = vtanh.f32 %v3288_v9 }
 0x265   :  { %v2971_v10 = vpop.eup %2970 }
 0x266   :  { %1017 = vrot.lane.b32.xlu0 %v2971_v10, %s3141_s3 }
 0x26f   :  { %v2973_v13 = vpop.eup %2972 }
 0x270   :  { %1052 = vrot.lane.b32.xlu1 %v2973_v13, %s3141_s3 }
 0x2d8   :  { %v1018_v14 = vpop.permute.xlu0 %1017 }
 0x2d9   :  { %v1020_v15 = vmul.f32 %v2967_v58, %v1018_v14  ;;  %v1291_v14 = vld [vmem:[#allocation2 + $0x14] sm:$0xf] }
 0x2db   :  { %v3293_v16 = vpack.c.bf16 %v1020_v15, %v1020_v15  ;;  %v1384_v15 = vrot.slane %v1291_v14, 2 }
 0x2dd   :  { %1103 = vrot.lane.b32.xlu0 %v3293_v16, %s3139_s27 }
 0x2e2   :  { %v1053_v17 = vpop.permute.xlu1 %1052 }
 0x2e3   :  { %v1055_v19 = vmul.f32 %v2969_v62, %v1053_v17 }
 0x2e5   :  { %v3297_v20 = vpack.c.bf16 %v1055_v19, %v1055_v19 }
 0x2e7   :  { %1149 = vrot.lane.b32.xlu1 %v3297_v20, %s3139_s27 }
 0x34f   :  { %v1104_v22 = vpop.permute.xlu0 %1103 }
 0x350   :  { %2684 = vmatmul.mubr.msk.bf16.vlgmr.msra.gmra.mxu1 %vm881_vm1, %v1104_v22 }
 0x351   :  { %2688 = vmatpush3.bf16.msra.mxu1 %v3227_v18  ;;  %2691 = vmatprep.mubr.msk.bf16.mxu1 %vm3138_vm0, %v3137_v8 }
 0x352   :  { %2689 = vmatprep.subr.bf16.mxu1 %v3137_v8 }
 0x355   :  { %2690 = vmatpush3.bf16.msra.mxu1 %v3236_v21 }
 0x356   :  { %2695 = vmatprep.subr.bf16.mxu1 %v3137_v8 }
 0x359   :  { %v1150_v24 = vpop.permute.xlu1 %1149 }
 0x35a   :  { %2692 = vmatmul.mubr.msk.bf16.vlgmr.msra.gmra.mxu1 %vm881_vm1, %v1150_v24 }
 0x35b   :  { %2696 = vmatpush3.bf16.msra.mxu1 %v3206_v11  ;;  %2699 = vmatprep.mubr.msk.bf16.mxu1 %vm3138_vm0, %v3137_v8 }
 0x35c   :  { %2697 = vmatprep.subr.bf16.mxu1 %v3137_v8 }
 0x35f   :  { %2698 = vmatpush3.bf16.msra.mxu1 %v3211_v12 }
 0x360   :  { %2703 = vmatprep.subr.bf16.mxu1 %v3137_v8 }
 0x410   :  { %v1142_v26 = vpop.f32.mrf.mxu1 }
 0x411   :  { %v1148_v27 = vadd.f32 %v1142_v26, %v1100_v25 }
 0x412   :  { %v2685_v28 = vpop.f32.mrf.mxu1 }
 0x413   :  { %2974 = vtanh.f32 %v1148_v27  ;;  %v2576_v40 = vmul.f32 -1.442695, %v1148_v27 }
 0x414   :  { %v1145_v29 = vpop.f32.mrf.mxu1 }
 0x416   :  { %v2686_v30 = vpop.f32.mrf.mxu1 }
 0x41a   :  { %v1188_v33 = vpop.f32.mrf.mxu1 }
 0x41b   :  { %v1197_v34 = vadd.f32 %v1195_v32, %v1188_v33 }
 0x41c   :  { %v2693_v35 = vpop.f32.mrf.mxu1 }
 0x41d   :  { %2976 = vtanh.f32 %v1197_v34  ;;  %v2577_v41 = vmul.f32 -1.442695, %v1197_v34 }
 0x41e   :  { %v1191_v36 = vpop.f32.mrf.mxu1  ;;  %2978 = vpow2.f32 %v2576_v40 }
 0x41f   :  { %2980 = vpow2.f32 %v2577_v41 }
 0x420   :  { %v2975_v37 = vpop.eup %2974  ;;  %v2694_v38 = vpop.f32.mrf.mxu1 }
 0x421   :  { %1207 = vrot.lane.b32.xlu0 %v2975_v37, %s3141_s3 }
 0x42a   :  { %v2977_v39 = vpop.eup %2976 }
 0x42b   :  { %1231 = vrot.lane.b32.xlu1 %v2977_v39, %s3141_s3  ;;  %v2979_v42 = vpop.eup %2978 }
 0x42c   :  { %v1201_v43 = vadd.f32 1.0, %v2979_v42  ;;  %v2981_v44 = vpop.eup %2980 }
 0x42d   :  { %v1225_v45 = vadd.f32 1.0, %v2981_v44 }
 0x42e   :  { %2982 = vrcp.f32 %v1201_v43 }
 0x42f   :  { %2984 = vrcp.f32 %v1225_v45 }
 0x43b   :  { %v2983_v46 = vpop.eup %2982 }
 0x43c   :  { %v2985_v49 = vpop.eup %2984  ;;  %v1205_v53 = vmul.f32 %v2983_v46, %v3285_v4 }
 0x43d   :  { %v1229_v55 = vmul.f32 %v2985_v49, %v3288_v9 }
 0x493   :  { %v1208_v47 = vpop.permute.xlu0 %1207 }
 0x494   :  { %v1210_v48 = vmul.f32 %v2983_v46, %v1208_v47 }
 0x496   :  { %1212 = vrot.lane.b32.xlu0 %v1210_v48, %s3139_s27 }
 0x49d   :  { %v1232_v50 = vpop.permute.xlu1 %1231 }
 0x49e   :  { %v1234_v51 = vmul.f32 %v2985_v49, %v1232_v50 }
 0x4a0   :  { %1236 = vrot.lane.b32.xlu1 %v1234_v51, %s3139_s27 }
 0x508   :  { %v1213_v52 = vpop.permute.xlu0 %1212 }
 0x509   :  { %v3320_v54 = vadd.f32 %v1213_v52, %v1205_v53 }
 0x50b   :  { %2986 = vtanh.f32 %v3320_v54 }
 0x512   :  { %v1237_v56 = vpop.permute.xlu1 %1236 }
 0x513   :  { %v3324_v57 = vadd.f32 %v1237_v56, %v1229_v55  ;;  %v1478_v56 = vld [vmem:[#allocation2 + $0xc] sm:$0xf] }
 0x515   :  { %2988 = vtanh.f32 %v3324_v57 }
 0x518   :  { %v2987_v58 = vpop.eup %2986 }
 0x519   :  { %1218 = vrot.lane.b32.xlu0 %v2987_v58, %s3141_s3 }
 0x522   :  { %v2989_v59 = vpop.eup %2988 }
 0x523   :  { %1242 = vrot.lane.b32.xlu1 %v2989_v59, %s3141_s3 }
 0x58b   :  { %v1219_v60 = vpop.permute.xlu0 %1218 }
 0x58c   :  { %v1221_v62 = vmul.f32 %v2983_v46, %v1219_v60 }
 0x58e   :  { %v3329_v63 = vpack.c.bf16 %v1221_v62, %v1221_v62 }
 0x590   :  { %1292 = vrot.lane.b32.xlu0 %v3329_v63, %s3139_s27 }
 0x595   :  { %v1243_v0 = vpop.permute.xlu1 %1242 }
 0x596   :  { %v1245_v1 = vmul.f32 %v2985_v49, %v1243_v0  ;;  %v1480_v0 = vld [vmem:[#allocation2 + $0x10] sm:$0xf] }
 0x598   :  { %v3333_v2 = vpack.c.bf16 %v1245_v1, %v1245_v1  ;;  %v1573_v1 = vrot.slane %v1480_v0, 2 }
 0x59a   :  { %1338 = vrot.lane.b32.xlu1 %v3333_v2, %s3139_s27 }
 0x602   :  { %v1293_v3 = vpop.permute.xlu0 %1292 }
 0x603   :  { %2700 = vmatmul.mubr.msk.bf16.vlgmr.msra.gmra.mxu1 %vm881_vm1, %v1293_v3 }
 0x604   :  { %2704 = vmatpush3.bf16.msra.mxu1 %v3227_v18  ;;  %2707 = vmatprep.mubr.msk.bf16.mxu1 %vm3138_vm0, %v3137_v8 }
 0x605   :  { %2705 = vmatprep.subr.bf16.mxu1 %v3137_v8 }
 0x608   :  { %2706 = vmatpush3.bf16.msra.mxu1 %v3236_v21 }
 0x609   :  { %2711 = vmatprep.subr.bf16.mxu1 %v3137_v8 }
 0x60c   :  { %v1339_v4 = vpop.permute.xlu1 %1338 }
 0x60d   :  { %2708 = vmatmul.mubr.msk.bf16.vlgmr.msra.gmra.mxu1 %vm881_vm1, %v1339_v4 }
 0x60e   :  { %2712 = vmatpush3.bf16.msra.mxu1 %v3206_v11  ;;  %2715 = vmatprep.mubr.msk.bf16.mxu1 %vm3138_vm0, %v3137_v8 }
 0x60f   :  { %2713 = vmatprep.subr.bf16.mxu1 %v3137_v8 }
 0x612   :  { %2714 = vmatpush3.bf16.msra.mxu1 %v3211_v12 }
 0x613   :  { %2719 = vmatprep.subr.bf16.mxu1 %v3137_v8 }
 0x6c3   :  { %v1331_v6 = vpop.f32.mrf.mxu1 }
 0x6c4   :  { %v1337_v7 = vadd.f32 %v1331_v6, %v1289_v5 }
 0x6c5   :  { %v2701_v9 = vpop.f32.mrf.mxu1 }
 0x6c6   :  { %2990 = vtanh.f32 %v1337_v7  ;;  %v2582_v28 = vmul.f32 -1.442695, %v1337_v7 }
 0x6c7   :  { %v1334_v10 = vpop.f32.mrf.mxu1 }
 0x6c9   :  { %v2702_v13 = vpop.f32.mrf.mxu1 }
 0x6cd   :  { %v1377_v17 = vpop.f32.mrf.mxu1 }
 0x6ce   :  { %v1386_v19 = vadd.f32 %v1384_v15, %v1377_v17 }
 0x6cf   :  { %v2709_v22 = vpop.f32.mrf.mxu1 }
 0x6d0   :  { %2992 = vtanh.f32 %v1386_v19  ;;  %v2583_v29 = vmul.f32 -1.442695, %v1386_v19 }
 0x6d1   :  { %v1380_v24 = vpop.f32.mrf.mxu1  ;;  %2994 = vpow2.f32 %v2582_v28 }
 0x6d2   :  { %2996 = vpow2.f32 %v2583_v29 }
 0x6d3   :  { %v2991_v25 = vpop.eup %2990  ;;  %v2710_v26 = vpop.f32.mrf.mxu1 }
 0x6d4   :  { %1396 = vrot.lane.b32.xlu0 %v2991_v25, %s3141_s3 }
 0x6dd   :  { %v2993_v27 = vpop.eup %2992 }
 0x6de   :  { %1420 = vrot.lane.b32.xlu1 %v2993_v27, %s3141_s3  ;;  %v2995_v30 = vpop.eup %2994 }
 0x6df   :  { %v1390_v31 = vadd.f32 1.0, %v2995_v30  ;;  %v2997_v32 = vpop.eup %2996 }
 0x6e0   :  { %v1414_v33 = vadd.f32 1.0, %v2997_v32 }
 0x6e1   :  { %2998 = vrcp.f32 %v1390_v31 }
 0x6e2   :  { %3000 = vrcp.f32 %v1414_v33 }
 0x6ee   :  { %v2999_v34 = vpop.eup %2998 }
 0x6ef   :  { %v3001_v37 = vpop.eup %3000  ;;  %v1394_v40 = vmul.f32 %v2999_v34, %v3320_v54 }
 0x6f0   :  { %v1418_v43 = vmul.f32 %v3001_v37, %v3324_v57 }
 0x746   :  { %v1397_v35 = vpop.permute.xlu0 %1396 }
 0x747   :  { %v1399_v36 = vmul.f32 %v2999_v34, %v1397_v35 }
 0x749   :  { %1401 = vrot.lane.b32.xlu0 %v1399_v36, %s3139_s27 }
 0x750   :  { %v1421_v38 = vpop.permute.xlu1 %1420 }
 0x751   :  { %v1423_v39 = vmul.f32 %v3001_v37, %v1421_v38 }
 0x753   :  { %1425 = vrot.lane.b32.xlu1 %v1423_v39, %s3139_s27 }
 0x7bb   :  { %v1402_v41 = vpop.permute.xlu0 %1401 }
 0x7bc   :  { %v3356_v42 = vadd.f32 %v1402_v41, %v1394_v40 }
 0x7be   :  { %3002 = vtanh.f32 %v3356_v42 }
 0x7c5   :  { %v1426_v44 = vpop.permute.xlu1 %1425 }
 0x7c6   :  { %v3360_v45 = vadd.f32 %v1426_v44, %v1418_v43 }
 0x7c8   :  { %3004 = vtanh.f32 %v3360_v45 }
 0x7cb   :  { %v3003_v46 = vpop.eup %3002 }
 0x7cc   :  { %1407 = vrot.lane.b32.xlu0 %v3003_v46, %s3141_s3  ;;  %v1666_v46 = vld [vmem:[#allocation2 + $0x10] sm:$0xf] }
 0x7d5   :  { %v3005_v47 = vpop.eup %3004 }
 0x7d6   :  { %1431 = vrot.lane.b32.xlu1 %v3005_v47, %s3141_s3 }
 0x83e   :  { %v1408_v48 = vpop.permute.xlu0 %1407 }
 0x83f   :  { %v1410_v49 = vmul.f32 %v2999_v34, %v1408_v48 }
 0x841   :  { %v3365_v50 = vpack.c.bf16 %v1410_v49, %v1410_v49 }
 0x843   :  { %1481 = vrot.lane.b32.xlu0 %v3365_v50, %s3139_s27 }
 0x848   :  { %v1432_v51 = vpop.permute.xlu1 %1431 }
 0x849   :  { %v1434_v53 = vmul.f32 %v3001_v37, %v1432_v51 }
 0x84b   :  { %v3369_v52 = vpack.c.bf16 %v1434_v53, %v1434_v53 }
 0x84d   :  { %1527 = vrot.lane.b32.xlu1 %v3369_v52, %s3139_s27 }
 0x8b5   :  { %v1482_v54 = vpop.permute.xlu0 %1481 }
 0x8b6   :  { %2716 = vmatmul.mubr.msk.bf16.vlgmr.msra.gmra.mxu1 %vm881_vm1, %v1482_v54  ;;  %v1667_v54 = vld [vmem:[#allocation2 + $0xc] sm:$0xf] }
 0x8b7   :  { %2720 = vmatpush3.bf16.msra.mxu1 %v3227_v18  ;;  %2723 = vmatprep.mubr.msk.bf16.mxu1 %vm3138_vm0, %v3137_v8 }
 0x8b8   :  { %2721 = vmatprep.subr.bf16.mxu1 %v3137_v8 }
 0x8bb   :  { %2722 = vmatpush3.bf16.msra.mxu1 %v3236_v21 }
 0x8bc   :  { %2735 = vmatprep.subr.bf16.mxu1 %v3137_v8 }
 0x8bf   :  { %v1528_v55 = vpop.permute.xlu1 %1527 }
 0x8c0   :  { %2724 = vmatmul.mubr.msk.bf16.vlgmr.msra.gmra.mxu1 %vm881_vm1, %v1528_v55  ;;  %v1760_v55 = vrot.slane %v1667_v54, 2 }
 0x8c1   :  { %2736 = vmatpush3.bf16.msra.mxu1 %v3227_v18  ;;  %2739 = vmatprep.mubr.msk.bf16.mxu1 %vm3138_vm0, %v3137_v8 }
 0x8c2   :  { %2737 = vmatprep.subr.bf16.mxu1 %v3137_v8 }
 0x8c5   :  { %2738 = vmatpush3.bf16.msra.mxu1 %v3236_v21 }
 0x8c6   :  { %2751 = vmatprep.subr.bf16.mxu1 %v3137_v8 }
 0x976   :  { %v1520_v57 = vpop.f32.mrf.mxu1 }
 0x977   :  { %v1526_v58 = vadd.f32 %v1520_v57, %v1478_v56 }
 0x978   :  { %v2717_v59 = vpop.f32.mrf.mxu1 }
 0x979   :  { %3006 = vtanh.f32 %v1526_v58  ;;  %v2588_v13 = vmul.f32 -1.442695, %v1526_v58 }
 0x97a   :  { %v1523_v60 = vpop.f32.mrf.mxu1 }
 0x97c   :  { %v2718_v62 = vpop.f32.mrf.mxu1 }
 0x980   :  { %v1566_v3 = vpop.f32.mrf.mxu1 }
 0x981   :  { %v1575_v4 = vadd.f32 %v1573_v1, %v1566_v3 }
 0x982   :  { %v2725_v5 = vpop.f32.mrf.mxu1 }
 0x983   :  { %3008 = vtanh.f32 %v1575_v4  ;;  %v2589_v14 = vmul.f32 -1.442695, %v1575_v4 }
 0x984   :  { %v1569_v6 = vpop.f32.mrf.mxu1  ;;  %3010 = vpow2.f32 %v2588_v13 }
 0x985   :  { %3012 = vpow2.f32 %v2589_v14 }
 0x986   :  { %v3007_v7 = vpop.eup %3006  ;;  %v2726_v9 = vpop.f32.mrf.mxu1 }
 0x987   :  { %1585 = vrot.lane.b32.xlu0 %v3007_v7, %s3141_s3 }
 0x990   :  { %v3009_v10 = vpop.eup %3008 }
 0x991   :  { %1609 = vrot.lane.b32.xlu1 %v3009_v10, %s3141_s3  ;;  %v3011_v15 = vpop.eup %3010 }
 0x992   :  { %v1579_v17 = vadd.f32 1.0, %v3011_v15  ;;  %v3013_v19 = vpop.eup %3012 }
 0x993   :  { %v1603_v22 = vadd.f32 1.0, %v3013_v19 }
 0x994   :  { %3014 = vrcp.f32 %v1579_v17 }
 0x995   :  { %3016 = vrcp.f32 %v1603_v22 }
 0x9a1   :  { %v3015_v24 = vpop.eup %3014 }
 0x9a2   :  { %v3017_v27 = vpop.eup %3016  ;;  %v1583_v30 = vmul.f32 %v3015_v24, %v3356_v42 }
 0x9a3   :  { %v1607_v33 = vmul.f32 %v3017_v27, %v3360_v45 }
 0x9f9   :  { %v1586_v25 = vpop.permute.xlu0 %1585 }
 0x9fa   :  { %v1588_v26 = vmul.f32 %v3015_v24, %v1586_v25 }
 0x9fc   :  { %1590 = vrot.lane.b32.xlu0 %v1588_v26, %s3139_s27 }
 0xa03   :  { %v1610_v28 = vpop.permute.xlu1 %1609 }
 0xa04   :  { %v1612_v29 = vmul.f32 %v3017_v27, %v1610_v28 }
 0xa06   :  { %1614 = vrot.lane.b32.xlu1 %v1612_v29, %s3139_s27 }
 0xa6e   :  { %v1591_v31 = vpop.permute.xlu0 %1590 }
 0xa6f   :  { %v3392_v32 = vadd.f32 %v1591_v31, %v1583_v30 }
 0xa71   :  { %3018 = vtanh.f32 %v3392_v32 }
 0xa78   :  { %v1615_v34 = vpop.permute.xlu1 %1614 }
 0xa79   :  { %v3396_v35 = vadd.f32 %v1615_v34, %v1607_v33 }
 0xa7b   :  { %3020 = vtanh.f32 %v3396_v35 }
 0xa7e   :  { %v3019_v36 = vpop.eup %3018 }
 0xa7f   :  { %1596 = vrot.lane.b32.xlu0 %v3019_v36, %s3141_s3 }
 0xa88   :  { %v3021_v37 = vpop.eup %3020 }
 0xa89   :  { %1620 = vrot.lane.b32.xlu1 %v3021_v37, %s3141_s3 }
 0xaf1   :  { %v1597_v38 = vpop.permute.xlu0 %1596 }
 0xaf2   :  { %v1599_v39 = vmul.f32 %v3015_v24, %v1597_v38 }
 0xaf4   :  { %v3401_v40 = vpack.c.bf16 %v1599_v39, %v1599_v39 }
 0xaf6   :  { %1668 = vrot.lane.b32.xlu0 %v3401_v40, %s3139_s27 }
 0xafb   :  { %v1621_v41 = vpop.permute.xlu1 %1620 }
 0xafc   :  { %v1623_v42 = vmul.f32 %v3017_v27, %v1621_v41 }
 0xafe   :  { %v3405_v43 = vpack.c.bf16 %v1623_v42, %v1623_v42 }
 0xb00   :  { %1714 = vrot.lane.b32.xlu1 %v3405_v43, %s3139_s27 }
 0xb68   :  { %v1669_v44 = vpop.permute.xlu0 %1668 }
 0xb69   :  { %2732 = vmatmul.mubr.msk.bf16.vlgmr.msra.gmra.mxu0 %vm881_vm1, %v1669_v44  ;;  %v1852_v44 = vld [vmem:[#allocation2 + $0x8] sm:$0xf] }
 0xb6a   :  { %2744 = vmatpush3.bf16.msra.mxu0 %v3206_v11  ;;  %2747 = vmatprep.mubr.msk.bf16.mxu0 %vm3138_vm0, %v3137_v8 }
 0xb6b   :  { %2745 = vmatprep.subr.bf16.mxu0 %v3137_v8 }
 0xb6e   :  { %2746 = vmatpush3.bf16.msra.mxu0 %v3211_v12 }
 0xb6f   :  { %2759 = vmatprep.subr.bf16.mxu0 %v3137_v8 }
 0xb72   :  { %v1715_v45 = vpop.permute.xlu1 %1714 }
 0xb73   :  { %2740 = vmatmul.mubr.msk.bf16.vlgmr.msra.gmra.mxu1 %vm881_vm1, %v1715_v45  ;;  %v1945_v45 = vrot.slane %v1852_v44, 2 }
 0xb74   :  { %2752 = vmatpush3.bf16.msra.mxu1 %v3227_v18  ;;  %2755 = vmatprep.mubr.msk.bf16.mxu1 %vm3138_vm0, %v3137_v8 }
 0xb75   :  { %2753 = vmatprep.subr.bf16.mxu1 %v3137_v8 }
 0xb78   :  { %2754 = vmatpush3.bf16.msra.mxu1 %v3236_v21 }
 0xb79   :  { %2767 = vmatprep.subr.bf16.mxu1 %v3137_v8 }
 0xc29   :  { %v1707_v47 = vpop.f32.mrf.mxu0 }
 0xc2a   :  { %v1713_v48 = vadd.f32 %v1707_v47, %v1666_v46 }
 0xc2b   :  { %v2733_v49 = vpop.f32.mrf.mxu0 }
 0xc2c   :  { %3022 = vtanh.f32 %v1713_v48  ;;  %v2594_v1 = vmul.f32 -1.442695, %v1713_v48 }
 0xc2d   :  { %v1710_v51 = vpop.f32.mrf.mxu0 }
 0xc2f   :  { %v2734_v53 = vpop.f32.mrf.mxu0 }
 0xc33   :  { %v1753_v56 = vpop.f32.mrf.mxu1 }
 0xc34   :  { %v1762_v57 = vadd.f32 %v1760_v55, %v1753_v56 }
 0xc35   :  { %v2741_v58 = vpop.f32.mrf.mxu1 }
 0xc36   :  { %3024 = vtanh.f32 %v1762_v57  ;;  %v2595_v3 = vmul.f32 -1.442695, %v1762_v57 }
 0xc37   :  { %v1756_v59 = vpop.f32.mrf.mxu1  ;;  %3026 = vpow2.f32 %v2594_v1 }
 0xc38   :  { %3028 = vpow2.f32 %v2595_v3 }
 0xc39   :  { %v3023_v60 = vpop.eup %3022  ;;  %v2742_v62 = vpop.f32.mrf.mxu1 }
 0xc3a   :  { %1772 = vrot.lane.b32.xlu0 %v3023_v60, %s3141_s3 }
 0xc43   :  { %v3025_v0 = vpop.eup %3024 }
 0xc44   :  { %1796 = vrot.lane.b32.xlu1 %v3025_v0, %s3141_s3  ;;  %v3027_v4 = vpop.eup %3026 }
 0xc45   :  { %v1766_v5 = vadd.f32 1.0, %v3027_v4  ;;  %v3029_v6 = vpop.eup %3028 }
 0xc46   :  { %v1790_v7 = vadd.f32 1.0, %v3029_v6 }
 0xc47   :  { %3030 = vrcp.f32 %v1766_v5 }
 0xc48   :  { %3032 = vrcp.f32 %v1790_v7 }
 0xc54   :  { %v3031_v9 = vpop.eup %3030 }
 0xc55   :  { %v3033_v14 = vpop.eup %3032  ;;  %v1770_v19 = vmul.f32 %v3031_v9, %v3392_v32 }
 0xc56   :  { %v1794_v25 = vmul.f32 %v3033_v14, %v3396_v35 }
 0xcac   :  { %v1773_v10 = vpop.permute.xlu0 %1772 }
 0xcad   :  { %v1775_v13 = vmul.f32 %v3031_v9, %v1773_v10 }
 0xcaf   :  { %1777 = vrot.lane.b32.xlu0 %v1775_v13, %s3139_s27 }
 0xcb6   :  { %v1797_v15 = vpop.permute.xlu1 %1796 }
 0xcb7   :  { %v1799_v17 = vmul.f32 %v3033_v14, %v1797_v15 }
 0xcb9   :  { %1801 = vrot.lane.b32.xlu1 %v1799_v17, %s3139_s27 }
 0xd21   :  { %v1778_v22 = vpop.permute.xlu0 %1777 }
 0xd22   :  { %v3428_v24 = vadd.f32 %v1778_v22, %v1770_v19 }
 0xd24   :  { %3034 = vtanh.f32 %v3428_v24 }
 0xd2b   :  { %v1802_v26 = vpop.permute.xlu1 %1801 }
 0xd2c   :  { %v3432_v27 = vadd.f32 %v1802_v26, %v1794_v25 }
 0xd2e   :  { %3036 = vtanh.f32 %v3432_v27 }
 0xd31   :  { %v3035_v28 = vpop.eup %3034 }
 0xd32   :  { %1783 = vrot.lane.b32.xlu0 %v3035_v28, %s3141_s3  ;;  %v3087_v28 = vld [vmem:[%s3673_s2] sm:$0xff]  }
 0xd3b   :  { %v3037_v29 = vpop.eup %3036 }
 0xd3c   :  { %1807 = vrot.lane.b32.xlu1 %v3037_v29, %s3141_s3 }
 0xda4   :  { %v1784_v30 = vpop.permute.xlu0 %1783 }
 0xda5   :  { %v1786_v31 = vmul.f32 %v3031_v9, %v1784_v30  ;;  %v3088_v30 = vld [vmem:[%s3673_s2 + $0x18] sm:$0xff]  }
 0xda7   :  { %v3437_v32 = vpack.c.bf16 %v1786_v31, %v1786_v31  ;;  %v3089_v31 = vld [vmem:[%s3673_s2 + $0x10] sm:$0xff]  }
 0xda9   :  { %1853 = vrot.lane.b32.xlu0 %v3437_v32, %s3139_s27 }
 0xdae   :  { %v1808_v33 = vpop.permute.xlu1 %1807 }
 0xdaf   :  { %v1810_v34 = vmul.f32 %v3033_v14, %v1808_v33  ;;  %v2036_v33 = vld [vmem:[#allocation2 + $0x18] sm:$0xf] }
 0xdb1   :  { %v3441_v35 = vpack.c.bf16 %v1810_v34, %v1810_v34 }
 0xdb3   :  { %1899 = vrot.lane.b32.xlu1 %v3441_v35, %s3139_s27 }
 0xe1b   :  { %v1854_v36 = vpop.permute.xlu0 %1853 }
 0xe1c   :  { %2748 = vmatmul.mubr.msk.bf16.vlgmr.msra.gmra.mxu0 %vm881_vm1, %v1854_v36 }
 0xe1d   :  { %2760 = vmatpush3.bf16.msra.mxu0 %v3206_v11  ;;  %2763 = vmatprep.mubr.msk.bf16.mxu0 %vm3138_vm0, %v3137_v8  ;;  %v1851_v11 = vld [vmem:[#allocation2 + $0x14] sm:$0xf] }
 0xe1e   :  { %2761 = vmatprep.subr.bf16.mxu0 %v3137_v8 }
 0xe21   :  { %2762 = vmatpush3.bf16.msra.mxu0 %v3211_v12 }
 0xe22   :  { %2775 = vmatprep.subr.bf16.mxu0 %v3137_v8 }
 0xe25   :  { %v1900_v37 = vpop.permute.xlu1 %1899 }
 0xe26   :  { %2756 = vmatmul.mubr.msk.bf16.vlgmr.msra.gmra.mxu1 %vm881_vm1, %v1900_v37 }
 0xe27   :  { %2768 = vmatpush3.bf16.msra.mxu1 %v3227_v18  ;;  %2771 = vmatprep.mubr.msk.bf16.mxu1 %vm3138_vm0, %v3137_v8 }
 0xe28   :  { %2769 = vmatprep.subr.bf16.mxu1 %v3137_v8 }
 0xe2b   :  { %2770 = vmatpush3.bf16.msra.mxu1 %v3236_v21 }
 0xe2c   :  { %2783 = vmatprep.subr.bf16.mxu1 %v3137_v8 }
 0xedc   :  { %v1892_v38 = vpop.f32.mrf.mxu0 }
 0xedd   :  { %v1898_v39 = vadd.f32 %v1892_v38, %v1851_v11 }
 0xede   :  { %v2749_v12 = vpop.f32.mrf.mxu0 }
 0xedf   :  { %3038 = vtanh.f32 %v1898_v39  ;;  %v2600_v53 = vmul.f32 -1.442695, %v1898_v39  ;;  %v2037_v39 = vld [vmem:[#allocation2 + $0x4] sm:$0xf] }
 0xee0   :  { %v1895_v41 = vpop.f32.mrf.mxu0  ;;  %v2130_v12 = vrot.slane %v2037_v39, 2 }
 0xee2   :  { %v2750_v42 = vpop.f32.mrf.mxu0 }
 0xee6   :  { %v1938_v46 = vpop.f32.mrf.mxu1 }
 0xee7   :  { %v1947_v18 = vadd.f32 %v1945_v45, %v1938_v46 }
 0xee8   :  { %v2757_v47 = vpop.f32.mrf.mxu1 }
 0xee9   :  { %3040 = vtanh.f32 %v1947_v18  ;;  %v2601_v54 = vmul.f32 -1.442695, %v1947_v18 }
 0xeea   :  { %v1941_v48 = vpop.f32.mrf.mxu1  ;;  %3042 = vpow2.f32 %v2600_v53 }
 0xeeb   :  { %3044 = vpow2.f32 %v2601_v54 }
 0xeec   :  { %v3039_v49 = vpop.eup %3038  ;;  %v2758_v51 = vpop.f32.mrf.mxu1 }
 0xeed   :  { %1957 = vrot.lane.b32.xlu0 %v3039_v49, %s3141_s3 }
 0xef6   :  { %v3041_v21 = vpop.eup %3040 }
 0xef7   :  { %1981 = vrot.lane.b32.xlu1 %v3041_v21, %s3141_s3  ;;  %v3043_v55 = vpop.eup %3042 }
 0xef8   :  { %v1951_v56 = vadd.f32 1.0, %v3043_v55  ;;  %v3045_v57 = vpop.eup %3044 }
 0xef9   :  { %v1975_v58 = vadd.f32 1.0, %v3045_v57 }
 0xefa   :  { %3046 = vrcp.f32 %v1951_v56 }
 0xefb   :  { %3048 = vrcp.f32 %v1975_v58 }
 0xf07   :  { %v3047_v59 = vpop.eup %3046 }
 0xf08   :  { %v3049_v0 = vpop.eup %3048  ;;  %v1955_v4 = vmul.f32 %v3047_v59, %v3428_v24 }
 0xf09   :  { %v1979_v7 = vmul.f32 %v3049_v0, %v3432_v27  ;;  %v3086_v27 = vld [vmem:[%s3673_s2 + $0x8] sm:$0xff]  }
 0xf5f   :  { %v1958_v60 = vpop.permute.xlu0 %1957 }
 0xf60   :  { %v1960_v62 = vmul.f32 %v3047_v59, %v1958_v60 }
 0xf62   :  { %1962 = vrot.lane.b32.xlu0 %v1960_v62, %s3139_s27 }
 0xf69   :  { %v1982_v1 = vpop.permute.xlu1 %1981 }
 0xf6a   :  { %v1984_v3 = vmul.f32 %v3049_v0, %v1982_v1 }
 0xf6c   :  { %1986 = vrot.lane.b32.xlu1 %v1984_v3, %s3139_s27 }
 0xfd4   :  { %v1963_v5 = vpop.permute.xlu0 %1962 }
 0xfd5   :  { %v3464_v6 = vadd.f32 %v1963_v5, %v1955_v4 }
 0xfd7   :  { %3050 = vtanh.f32 %v3464_v6 }
 0xfde   :  { %v1987_v9 = vpop.permute.xlu1 %1986 }
 0xfdf   :  { %v3468_v10 = vadd.f32 %v1987_v9, %v1979_v7 }
 0xfe1   :  { %3052 = vtanh.f32 %v3468_v10 }
 0xfe4   :  { %v3051_v13 = vpop.eup %3050 }
 0xfe5   :  { %1968 = vrot.lane.b32.xlu0 %v3051_v13, %s3141_s3 }
 0xfee   :  { %v3053_v14 = vpop.eup %3052 }
 0xfef   :  { %1992 = vrot.lane.b32.xlu1 %v3053_v14, %s3141_s3 }
0x1057   :  { %v1969_v15 = vpop.permute.xlu0 %1968 }
0x1058   :  { %v1971_v17 = vmul.f32 %v3047_v59, %v1969_v15 }
0x105a   :  { %v3473_v19 = vpack.c.bf16 %v1971_v17, %v1971_v17 }
0x105c   :  { %2038 = vrot.lane.b32.xlu0 %v3473_v19, %s3139_s27 }
0x1061   :  { %v1993_v22 = vpop.permute.xlu1 %1992 }
0x1062   :  { %v1995_v24 = vmul.f32 %v3049_v0, %v1993_v22 }
0x1064   :  { %v3477_v25 = vpack.c.bf16 %v1995_v24, %v1995_v24  ;;  %v2221_v24 = vld [vmem:[#allocation2 + $0x1c] sm:$0xf] }
0x1066   :  { %2084 = vrot.lane.b32.xlu1 %v3477_v25, %s3139_s27 }
0x10ce   :  { %v2039_v26 = vpop.permute.xlu0 %2038 }
0x10cf   :  { %2764 = vmatmul.mubr.msk.bf16.vlgmr.msra.gmra.mxu0 %vm881_vm1, %v2039_v26 }
0x10d0   :  { %2776 = vmatpush3.bf16.msra.mxu0 %v3086_v27  ;;  %2779 = vmatprep.mubr.msk.bf16.mxu0 %vm3138_vm0, %v3137_v8 }
0x10d1   :  { %2777 = vmatprep.subr.bf16.mxu0 %v3137_v8 }
0x10d4   :  { %2778 = vmatpush3.bf16.msra.mxu0 %v3087_v28 }
0x10d8   :  { %v2085_v29 = vpop.permute.xlu1 %2084 }
0x10d9   :  { %2772 = vmatmul.mubr.msk.bf16.vlgmr.msra.gmra.mxu1 %vm881_vm1, %v2085_v29 }
0x10da   :  { %2784 = vmatpush3.bf16.msra.mxu1 %v3088_v30  ;;  %2787 = vmatprep.mubr.msk.bf16.mxu1 %vm3138_vm0, %v3137_v8 }
0x10db   :  { %2785 = vmatprep.subr.bf16.mxu1 %v3137_v8 }
0x10de   :  { %2786 = vmatpush3.bf16.msra.mxu1 %v3089_v31  ;;  %v2222_v31 = vld [vmem:[#allocation2] sm:$0xf] }
0x118f   :  { %v2077_v34 = vpop.f32.mrf.mxu0 }
0x1190   :  { %v2083_v36 = vadd.f32 %v2077_v34, %v2036_v33  ;;  %v2315_v33 = vrot.slane %v2222_v31, 2 }
0x1191   :  { %v2765_v37 = vpop.f32.mrf.mxu0 }
0x1192   :  { %3054 = vtanh.f32 %v2083_v36  ;;  %v2606_v47 = vmul.f32 -1.442695, %v2083_v36 }
0x1193   :  { %v2080_v11 = vpop.f32.mrf.mxu0 }
0x1195   :  { %v2766_v38 = vpop.f32.mrf.mxu0 }
0x1199   :  { %v2123_v41 = vpop.f32.mrf.mxu1 }
0x119a   :  { %v2132_v42 = vadd.f32 %v2130_v12, %v2123_v41 }
0x119b   :  { %v2773_v44 = vpop.f32.mrf.mxu1 }
0x119c   :  { %3056 = vtanh.f32 %v2132_v42  ;;  %v2607_v48 = vmul.f32 -1.442695, %v2132_v42 }
0x119d   :  { %v2126_v45 = vpop.f32.mrf.mxu1  ;;  %3058 = vpow2.f32 %v2606_v47 }
0x119e   :  { %3060 = vpow2.f32 %v2607_v48 }
0x119f   :  { %v3055_v8 = vpop.eup %3054  ;;  %v2774_v46 = vpop.f32.mrf.mxu1 }
0x11a0   :  { %2142 = vrot.lane.b32.xlu0 %v3055_v8, %s3141_s3 }
0x11a9   :  { %v3057_v18 = vpop.eup %3056 }
0x11aa   :  { %2166 = vrot.lane.b32.xlu1 %v3057_v18, %s3141_s3  ;;  %v3059_v49 = vpop.eup %3058 }
0x11ab   :  { %v2136_v51 = vadd.f32 1.0, %v3059_v49  ;;  %v3061_v21 = vpop.eup %3060 }
0x11ac   :  { %v2160_v53 = vadd.f32 1.0, %v3061_v21 }
0x11ad   :  { %3062 = vrcp.f32 %v2136_v51 }
0x11ae   :  { %3064 = vrcp.f32 %v2160_v53 }
0x11ba   :  { %v3063_v54 = vpop.eup %3062 }
0x11bb   :  { %v3065_v57 = vpop.eup %3064  ;;  %v2140_v60 = vmul.f32 %v3063_v54, %v3464_v6 }
0x11bc   :  { %v2164_v1 = vmul.f32 %v3065_v57, %v3468_v10 }
0x1212   :  { %v2143_v55 = vpop.permute.xlu0 %2142 }
0x1213   :  { %v2145_v56 = vmul.f32 %v3063_v54, %v2143_v55 }
0x1215   :  { %2147 = vrot.lane.b32.xlu0 %v2145_v56, %s3139_s27  ;;  %v3142_v56 = vmov 1966171168  }
0x121c   :  { %v2167_v58 = vpop.permute.xlu1 %2166 }
0x121d   :  { %v2169_v59 = vmul.f32 %v3065_v57, %v2167_v58 }
0x121f   :  { %2171 = vrot.lane.b32.xlu1 %v2169_v59, %s3139_s27 }
0x1287   :  { %v2148_v62 = vpop.permute.xlu0 %2147 }
0x1288   :  { %v2150_v0 = vadd.f32 %v2148_v62, %v2140_v60 }
0x128a   :  { %3066 = vtanh.f32 %v2150_v0 }
0x1291   :  { %v2172_v3 = vpop.permute.xlu1 %2171 }
0x1292   :  { %v2174_v4 = vadd.f32 %v2172_v3, %v2164_v1 }
0x1294   :  { %3068 = vtanh.f32 %v2174_v4 }
0x1297   :  { %v3067_v5 = vpop.eup %3066 }
0x1298   :  { %2153 = vrot.lane.b32.xlu0 %v3067_v5, %s3141_s3 }
0x12a1   :  { %v3069_v7 = vpop.eup %3068 }
0x12a2   :  { %2177 = vrot.lane.b32.xlu1 %v3069_v7, %s3141_s3 }
0x130a   :  { %v2154_v9 = vpop.permute.xlu0 %2153 }
0x130b   :  { %v2156_v13 = vmul.f32 %v3063_v54, %v2154_v9 }
0x130d   :  { %v3509_v14 = vpack.c.bf16 %v2156_v13, %v2156_v13 }
0x130f   :  { %2223 = vrot.lane.b32.xlu0 %v3509_v14, %s3139_s27 }
0x1314   :  { %v2178_v6 = vpop.permute.xlu1 %2177 }
0x1315   :  { %v2180_v15 = vmul.f32 %v3065_v57, %v2178_v6  ;;  %v1059_v57 = vunpack.c.l.s4 %v3142_v56 }
0x1317   :  { %v3513_v17 = vpack.c.bf16 %v2180_v15, %v2180_v15  ;;  %v1060_v58 = vunpack.c.0.s8 %v1059_v57 }
0x1319   :  { %2269 = vrot.lane.b32.xlu1 %v3513_v17, %s3139_s27  ;;  %v3532_v1 = vsub.s32 %v1060_v58, %v3263_v61 }
0x131b   :  { %v1085_v3 = vrot.slane %v3297_v20, %v3532_v1  ;;  %v1064_v9 = vrot.slane %v3293_v16, %v3532_v1  ;;  %v1653_v13 = vrot.slane %v3405_v43, %v3532_v1  ;;  %v1254_v6 = vrot.slane %v3329_v63, %v3532_v1 }
0x131c   :  { %v1819_v16 = vrot.slane %v3437_v32, %v3532_v1  ;;  %v1443_v43 = vrot.slane %v3365_v50, %v3532_v1  ;;  %v2004_v63 = vrot.slane %v3473_v19, %v3532_v1  ;;  %v1632_v32 = vrot.slane %v3401_v40, %v3532_v1 }
0x131d   :  { %v1092_v7 = vrot.slane %v1085_v3, %v3532_v1  ;;  %v1660_v15 = vrot.slane %v1653_v13, %v3532_v1  ;;  %v2189_v50 = vrot.slane %v3509_v14, %v3532_v1  ;;  %v1839_v19 = vrot.slane %v3441_v35, %v3532_v1 }
0x131e   :  { %v2209_v35 = vrot.slane %v3513_v17, %v3532_v1 }
0x131f   :  { %v2196_v40 = vrot.slane %v2189_v50, %v3532_v1  ;;  %v1846_v14 = vrot.slane %v1839_v19, %v3532_v1 }
0x1381   :  { %v2224_v10 = vpop.permute.xlu0 %2223 }
0x1382   :  { %2780 = vmatmul.mubr.msk.bf16.vlgmr.msra.gmra.mxu0 %vm881_vm1, %v2224_v10  ;;  %v1261_v10 = vrot.slane %v1254_v6, %v3532_v1 }
0x138b   :  { %v2270_v22 = vpop.permute.xlu1 %2269 }
0x138c   :  { %2788 = vmatmul.mubr.msk.bf16.vlgmr.msra.gmra.mxu1 %vm881_vm1, %v2270_v22  ;;  %v1826_v22 = vrot.slane %v1819_v16, %v3532_v1 }
0x1442   :  { %v2262_v26 = vpop.f32.mrf.mxu0 }
0x1443   :  { %v2268_v27 = vadd.f32 %v2262_v26, %v2221_v24  ;;  %v1450_v24 = vrot.slane %v1443_v43, %v3532_v1  ;;  %v2011_v26 = vrot.slane %v2004_v63, %v3532_v1 }
0x1444   :  { %v2781_v28 = vpop.f32.mrf.mxu0 }
0x1445   :  { %3070 = vtanh.f32 %v2268_v27  ;;  %v2612_v41 = vmul.f32 -1.442695, %v2268_v27  ;;  %v1639_v27 = vrot.slane %v1632_v32, %v3532_v1  ;;  %v2024_v28 = vrot.slane %v3477_v25, %v3532_v1 }
0x1446   :  { %v2265_v29 = vpop.f32.mrf.mxu0 }
0x1447   :  { %v2031_v29 = vrot.slane %v2024_v28, %v3532_v1 }
0x1448   :  { %v2782_v30 = vpop.f32.mrf.mxu0 }
0x1449   :  { %v2216_v30 = vrot.slane %v2209_v35, %v3532_v1 }
0x144c   :  { %v2308_v34 = vpop.f32.mrf.mxu1 }
0x144d   :  { %v2317_v36 = vadd.f32 %v2315_v33, %v2308_v34 }
0x144e   :  { %v2789_v37 = vpop.f32.mrf.mxu1 }
0x144f   :  { %3072 = vtanh.f32 %v2317_v36  ;;  %v2613_v42 = vmul.f32 -1.442695, %v2317_v36 }
0x1450   :  { %v2311_v11 = vpop.f32.mrf.mxu1  ;;  %3074 = vpow2.f32 %v2612_v41 }
0x1451   :  { %3076 = vpow2.f32 %v2613_v42 }
0x1452   :  { %v3071_v38 = vpop.eup %3070  ;;  %v2790_v39 = vpop.f32.mrf.mxu1 }
0x1453   :  { %2327 = vrot.lane.b32.xlu0 %v3071_v38, %s3141_s3 }
0x145c   :  { %v3073_v12 = vpop.eup %3072 }
0x145d   :  { %2351 = vrot.lane.b32.xlu1 %v3073_v12, %s3141_s3  ;;  %v3075_v44 = vpop.eup %3074 }
0x145e   :  { %v2321_v45 = vadd.f32 1.0, %v3075_v44  ;;  %v3077_v8 = vpop.eup %3076 }
0x145f   :  { %v2345_v46 = vadd.f32 1.0, %v3077_v8 }
0x1460   :  { %3078 = vrcp.f32 %v2321_v45 }
0x1461   :  { %3080 = vrcp.f32 %v2345_v46 }
0x146d   :  { %v3521_v18 = vpop.eup %3078 }
0x146e   :  { %v3525_v49 = vpop.eup %3080  ;;  %v2325_v53 = vmul.f32 %v3521_v18, %v2150_v0  ;;  %v1275_v0 = vrot.slane %v3333_v2, %v3532_v1 }
0x146f   :  { %v2349_v59 = vmul.f32 %v3525_v49, %v2174_v4  ;;  %v1464_v4 = vrot.slane %v3369_v52, %v3532_v1  ;;  %v1071_v52 = vrot.slane %v1064_v9, %v3532_v1 }
0x1470   :  { %v1282_v61 = vrot.slane %v1275_v0, %v3532_v1 }
0x1471   :  { %v1471_v2 = vrot.slane %v1464_v4, %v3532_v1 }
0x14c5   :  { %v2328_v47 = vpop.permute.xlu0 %2327 }
0x14c6   :  { %v2330_v48 = vmul.f32 %v3521_v18, %v2328_v47 }
0x14c8   :  { %2332 = vrot.lane.b32.xlu0 %v2330_v48, %s3139_s27 }
0x14cf   :  { %v2352_v51 = vpop.permute.xlu1 %2351 }
0x14d0   :  { %v2354_v21 = vmul.f32 %v3525_v49, %v2352_v51 }
0x14d2   :  { %2356 = vrot.lane.b32.xlu1 %v2354_v21, %s3139_s27 }
0x153a   :  { %v2333_v54 = vpop.permute.xlu0 %2332 }
0x153b   :  { %v2335_v55 = vadd.f32 %v2333_v54, %v2325_v53 }
0x153d   :  { %3082 = vtanh.f32 %v2335_v55 }
0x1544   :  { %v2357_v60 = vpop.permute.xlu1 %2356 }
0x1545   :  { %v2359_v62 = vadd.f32 %v2357_v60, %v2349_v59 }
0x1547   :  { %3084 = vtanh.f32 %v2359_v62 }
0x154a   :  { %v3083_v5 = vpop.eup %3082 }
0x154b   :  { %2338 = vrot.lane.b32.xlu0 %v3083_v5, %s3141_s3 }
0x154f   :  { %1093 = vrot.lane.b32.xlu0 %v1092_v7, %s3141_s3 }
0x1553   :  { %1283 = vrot.lane.b32.xlu0 %v1282_v61, %s3141_s3 }
0x1554   :  { %v3085_v20 = vpop.eup %3084 }
0x1555   :  { %2362 = vrot.lane.b32.xlu1 %v3085_v20, %s3141_s3 }
0x1557   :  { %1472 = vrot.lane.b32.xlu0 %v1471_v2, %s3141_s3 }
0x1559   :  { %1072 = vrot.lane.b32.xlu1 %v1071_v52, %s3139_s27 }
0x155b   :  { %1661 = vrot.lane.b32.xlu0 %v1660_v15, %s3141_s3 }
0x155d   :  { %1262 = vrot.lane.b32.xlu1 %v1261_v10, %s3139_s27 }
0x155f   :  { %1827 = vrot.lane.b32.xlu0 %v1826_v22, %s3139_s27 }
0x1561   :  { %1451 = vrot.lane.b32.xlu1 %v1450_v24, %s3139_s27 }
0x1563   :  { %2012 = vrot.lane.b32.xlu0 %v2011_v26, %s3139_s27 }
0x1565   :  { %1640 = vrot.lane.b32.xlu1 %v1639_v27, %s3139_s27 }
0x1567   :  { %2197 = vrot.lane.b32.xlu0 %v2196_v40, %s3139_s27 }
0x1569   :  { %1847 = vrot.lane.b32.xlu1 %v1846_v14, %s3141_s3 }
0x156d   :  { %2032 = vrot.lane.b32.xlu1 %v2031_v29, %s3141_s3 }
0x1571   :  { %2217 = vrot.lane.b32.xlu1 %v2216_v30, %s3141_s3 }
0x15bd   :  { %v2339_v31 = vpop.permute.xlu0 %2338 }
0x15be   :  { %v2341_v25 = vmul.f32 %v3521_v18, %v2339_v31 }
0x15c0   :  { %v2366_v33 = vpack.c.bf16 %v2341_v25, %v2341_v25  ;;  %v2413_v34 = vrot.slane %v2341_v25, %v3271_v23 }
0x15c1   :  { %v1094_v36 = vpop.permute.xlu0 %1093 }
0x15c2   :  { %v2374_v37 = vrot.slane %v2366_v33, %v3532_v1  ;;  %2573 = vst.msk [vmem:[%s3677_s6 + $0x7] sm:$0x1] %vm1097_vm2, %v1094_v36  ;;  %2414 = vrot.lane.b32.xlu0 %v2413_v34, %s3139_s27 }
0x15c4   :  { %v2381_v17 = vrot.slane %v2374_v37, %v3532_v1 }
0x15c5   :  { %v1284_v11 = vpop.permute.xlu0 %1283 }
0x15c6   :  { %2579 = vst.msk [vmem:[%s3677_s6 + $0x6] sm:$0x1] %vm1097_vm2, %v1284_v11  ;;  %2382 = vrot.lane.b32.xlu0 %v2381_v17, %s3139_s27 }
0x15c7   :  { %v2363_v38 = vpop.permute.xlu1 %2362 }
0x15c8   :  { %v2365_v39 = vmul.f32 %v3525_v49, %v2363_v38 }
0x15c9   :  { %v1473_v12 = vpop.permute.xlu0 %1472 }
0x15ca   :  { %v2386_v41 = vpack.c.bf16 %v2365_v39, %v2365_v39  ;;  %v2426_v42 = vrot.slane %v2365_v39, %v3271_v23  ;;  %2585 = vst.msk [vmem:[%s3677_s6 + $0x5] sm:$0x1] %vm1097_vm2, %v1473_v12 }
0x15cb   :  { %v1073_v44 = vpop.permute.xlu1 %1072 }
0x15cc   :  { %v2394_v45 = vrot.slane %v2386_v41, %v3532_v1  ;;  %1076 = vst.msk [vmem:[%s3677_s6] sm:$0x1] %vm1075_vm3, %v1073_v44  ;;  %2427 = vrot.lane.b32.xlu1 %v2426_v42, %s3141_s3 }
0x15cd   :  { %v1662_v8 = vpop.permute.xlu0 %1661 }
0x15ce   :  { %2591 = vst.msk [vmem:[%s3677_s6 + $0x4] sm:$0x1] %vm1097_vm2, %v1662_v8  ;;  %v2401_v23 = vrot.slane %v2394_v45, %v3532_v1 }
0x15cf   :  { %v1263_v46 = vpop.permute.xlu1 %1262 }
0x15d0   :  { %2578 = vst.msk [vmem:[%s3677_s6 + $0x1] sm:$0x1] %vm1075_vm3, %v1263_v46  ;;  %2402 = vrot.lane.b32.xlu1 %v2401_v23, %s3141_s3 }
0x15d1   :  { %v1828_v18 = vpop.permute.xlu0 %1827 }
0x15d2   :  { %2596 = vst.msk [vmem:[%s3677_s6 + $0x4] sm:$0x1] %vm1075_vm3, %v1828_v18 }
0x15d3   :  { %v1452_v47 = vpop.permute.xlu1 %1451 }
0x15d4   :  { %2584 = vst.msk [vmem:[%s3677_s6 + $0x2] sm:$0x1] %vm1075_vm3, %v1452_v47 }
0x15d5   :  { %v2013_v48 = vpop.permute.xlu0 %2012 }
0x15d6   :  { %2602 = vst.msk [vmem:[%s3677_s6 + $0x5] sm:$0x1] %vm1075_vm3, %v2013_v48 }
0x15d7   :  { %v1641_v49 = vpop.permute.xlu1 %1640 }
0x15d8   :  { %2590 = vst.msk [vmem:[%s3677_s6 + $0x3] sm:$0x1] %vm1075_vm3, %v1641_v49 }
0x15d9   :  { %v2198_v51 = vpop.permute.xlu0 %2197 }
0x15da   :  { %2608 = vst.msk [vmem:[%s3677_s6 + $0x6] sm:$0x1] %vm1075_vm3, %v2198_v51 }
0x15db   :  { %v1848_v21 = vpop.permute.xlu1 %1847 }
0x15dc   :  { %2597 = vst.msk [vmem:[%s3677_s6 + $0x3] sm:$0x1] %vm1097_vm2, %v1848_v21 }
0x15df   :  { %v2033_v53 = vpop.permute.xlu1 %2032 }
0x15e0   :  { %2603 = vst.msk [vmem:[%s3677_s6 + $0x2] sm:$0x1] %vm1097_vm2, %v2033_v53 }
0x15e3   :  { %v2218_v54 = vpop.permute.xlu1 %2217 }
0x15e4   :  { %2609 = vst.msk [vmem:[%s3677_s6 + $0x1] sm:$0x1] %vm1097_vm2, %v2218_v54 }
0x1634   :  { %v2415_v55 = vpop.permute.xlu0 %2414 }
0x1635   :  { %2418 = vst.msk [vmem:[#allocation6] sm:$0x3] %vm2417_vm4, %v2415_v55 }
0x1638   :  { %v2383_v56 = vpop.permute.xlu0 %2382 }
0x1639   :  { %2614 = vst.msk [vmem:[%s3677_s6 + $0x7] sm:$0x1] %vm1075_vm3, %v2383_v56 }
0x163e   :  { %v2428_v57 = vpop.permute.xlu1 %2427 }
0x163f   :  { %2431 = vst.msk [vmem:[#allocation6] sm:$0x3] %vm2430_vm5, %v2428_v57 }
0x1640   :  { %3121 = shalt.err (!%p3118_p9)
}
0x1641   :  { %2443 = dma.vmem_to_hbm [thread:$0]  %s2441_s20, 32, %s3678_s7, [#allocation5]  }
0x1642   :  { %v2403_v58 = vpop.permute.xlu1 %2402 }
0x1643   :  { %2405 = vst.msk [vmem:[%s3677_s6] sm:$0x1] %vm1097_vm2, %v2403_v58 }
0x1644   :  { %3132 = dma.done.wait [#allocation5], 32  }
0x1645   :  { %3133 = vsyncadd [#allocation5], 4294967264 }
0x1646   :  { %2449 = vsyncpa [#allocation4], 1 }
0x1647   :  { %2450 = vsyncpa [#allocation5], 1 }

</bundles_post_ra>
